<compile_context>
chip_gen: v7x
topology: tpu7x:2x2x1
jax: 0.10.0
libtpu: 0.0.40
codegen_flags: <defaults>
</compile_context>

<pallas_src>
import functools

import jax
import jax.numpy as jnp
from jax import lax
from jax.experimental import pallas as pl
from jax.experimental.pallas import tpu as pltpu


def _mask_loss_kernel(*refs, size_reduction, n_valid):
    """One grid step == one block of `tb` batch samples.

    Ref order (sr > 1):
      validf, negf, s_h, s_w, output, mask, scores
    Ref order (sr == 1):
      validf, negf, output, mask, scores
    """
    if size_reduction > 1:
        (validf_ref, negf_ref, s_h_ref, s_w_ref,
         output_ref, mask_ref, scores_ref) = refs
    else:
        validf_ref, negf_ref, output_ref, mask_ref, scores_ref = refs
        s_h_ref = s_w_ref = None

    tb, H, W = output_ref.shape
    inv_n = 0.1 / n_valid

    # Resident constants (fetched once; block index never changes).
    validf = validf_ref[...]                       # (H, W) f32: 1 inside crop
    negf = negf_ref[...]                           # (H, W) f32: 0 inside, -FLT_MAX outside
    if size_reduction > 1:
        s_h = s_h_ref[...]                         # (H, Hm) bf16 selection matrix
        s_w = s_w_ref[...]                         # (Wm, W) bf16 selection matrix

    # Crop-masked f32 output for the whole block (broadcast hoisted out of loop).
    out_c = output_ref[...].astype(jnp.float32) * validf[None, :, :]   # (tb, H, W)

    def _sum2(x):   # (H, W) -> (1, 1)
        return jnp.sum(jnp.sum(x, axis=1, keepdims=True), axis=0, keepdims=True)

    def _max2(x):   # (H, W) -> (1, 1)
        return jnp.max(jnp.max(x, axis=1, keepdims=True), axis=0, keepdims=True)

    for t in range(tb):   # static unroll over the samples in this block
        # ---- max_pool2d(mask, sr) ---------------------------------------
        if size_reduction > 1:
            # 0/1 mask: window "max" == (window count > 0); counts via MXU.
            # int8 -> f32 -> bf16 (both converts are known-supported); values
            # are exact small integers so bf16/f32 accumulation is exact.
            m_t = mask_ref[t].astype(jnp.float32).astype(jnp.bfloat16)   # (Hm, Wm)
            cnt_h = jnp.dot(s_h, m_t, preferred_element_type=jnp.float32)  # (H, Wm)
            cnt = jnp.dot(cnt_h.astype(jnp.bfloat16), s_w,
                          preferred_element_type=jnp.float32)              # (H, W)
            pooled = (cnt > 0.5).astype(jnp.float32)
        else:
            pooled = mask_ref[t].astype(jnp.float32)                       # (H, W)

        # ---- per-sample scores ------------------------------------------
        oc = out_c[t]                      # crop-masked output           (H, W)
        inside = oc * pooled               # out * mask   (crop-masked)
        outside = oc - inside              # out * (1 - mask) for a 0/1 mask

        sum_in = _sum2(inside)                             # (1, 1)
        sum_out = _sum2(oc) - sum_in                       # derived, no extra mul
        max_in = _max2(inside + negf)                      # max over the crop
        max_out = _max2(outside + negf)

        scores_ref[t, :, 0:1] = max_out * 0.9 + sum_out * inv_n           # outside
        scores_ref[t, :, 1:2] = 1.0 - (max_in * 0.9 + sum_in * inv_n)     # inside


def _pick_block_b(B, H, W, Hm, Wm, out_itemsize, mask_itemsize):
    """Largest divisor of B that keeps the per-step working set ~8 MiB, capped at 8."""
    per_sample = (2 * (H * W * out_itemsize + Hm * Wm * mask_itemsize)  # 2x-buffered blocks
                  + 6 * Hm * Wm                                          # f32+bf16 mask transients
                  + 4 * H * W * 4)                                       # f32 (H, W) intermediates
    budget = 8 * 1024 * 1024
    tb = int(max(1, min(B, budget // max(per_sample, 1), 8)))
    while B % tb:
        tb -= 1
    return tb


@jax.jit
def mask_loss(output, mask):
    """Pallas equivalent of MaskLoss.forward(output, mask).

    output: (B, H, W) float (f32 or bf16 — bf16 halves its HBM traffic).
    mask  : (B, Hm, Wm) 0/1 values; pass int8/uint8 to keep HBM at 1 B/elem.
    """
    B, H, W = output.shape
    Bm, Hm, Wm = mask.shape
    assert Bm == B, "batch dims must match"
    size_reduction = int(Hm // H)
    assert size_reduction >= 1
    assert Hm == H * size_reduction and Wm == W * size_reduction, (
        "mask spatial dims must be integer multiples of the output dims")
    # Same builtin round()/min() combination as the PyTorch module.
    crop_pixels = min(round(8 / size_reduction), 2)
    assert H > 2 * crop_pixels and W > 2 * crop_pixels

    if mask.dtype == jnp.bool_:
        mask = mask.astype(jnp.int8)

    n_valid = (H - 2 * crop_pixels) * (W - 2 * crop_pixels)

    # Hoisted crop masks (computed once outside the kernel, resident in VMEM).
    rows = lax.broadcasted_iota(jnp.int32, (H, W), 0)
    cols = lax.broadcasted_iota(jnp.int32, (H, W), 1)
    valid = ((rows >= crop_pixels) & (rows < H - crop_pixels) &
             (cols >= crop_pixels) & (cols < W - crop_pixels))
    validf = valid.astype(jnp.float32)
    negf = jnp.where(valid, 0.0, jnp.finfo(jnp.float32).min).astype(jnp.float32)

    tb = _pick_block_b(B, H, W, Hm, Wm, output.dtype.itemsize, mask.dtype.itemsize)
    grid = (B // tb,)

    def _const_spec(shape):
        return pl.BlockSpec(shape, lambda b: (0, 0))   # resident constant block

    in_specs = [_const_spec((H, W)), _const_spec((H, W))]
    args = [validf, negf]

    if size_reduction > 1:
        sr = size_reduction
        # 0/1 window-selection matrices for the MXU max-pool (built only when needed).
        s_h = (jnp.arange(Hm)[None, :] // sr ==
               jnp.arange(H)[:, None]).astype(jnp.bfloat16)   # (H, Hm)
        s_w = (jnp.arange(Wm)[:, None] // sr ==
               jnp.arange(W)[None, :]).astype(jnp.bfloat16)   # (Wm, W)
        in_specs += [_const_spec((H, Hm)), _const_spec((Wm, W))]
        args += [s_h, s_w]

    in_specs += [
        pl.BlockSpec((tb, H, W), lambda b: (b, 0, 0)),
        pl.BlockSpec((tb, Hm, Wm), lambda b: (b, 0, 0)),
    ]
    args += [output, mask]

    kernel = functools.partial(
        _mask_loss_kernel,
        size_reduction=size_reduction,
        n_valid=float(n_valid),
    )

    scores = pl.pallas_call(
        kernel,
        grid=grid,
        in_specs=in_specs,
        out_specs=pl.BlockSpec((tb, 1, 2), lambda b: (b, 0, 0)),
        out_shape=jax.ShapeDtypeStruct((B, 1, 2), jnp.float32),
        compiler_params=pltpu.CompilerParams(
            dimension_semantics=("parallel",),     # batch axis; megacore-shardable
            vmem_limit_bytes=32 * 1024 * 1024),
    )(*args)

    outside = scores[:, 0, 0]
    inside = scores[:, 0, 1]

    # Tiny JAX epilogue over B scalars: batch means, imbalance, final loss.
    outside_mean = jnp.mean(outside)
    inside_mean = jnp.mean(inside)
    imbalance = jnp.abs(inside_mean - outside_mean)
    loss = outside_mean + inside_mean * 1.1 + imbalance * imbalance * imbalance
    return loss, {"outside_mask": outside, "inside_mask": inside}


def mask_loss_ref(output, mask):
    """Pure-JAX reference (mirrors the PyTorch forward) for verification."""
    B, H, W = output.shape
    Hm = mask.shape[1]
    sr = Hm // H
    cp = min(round(8 / sr), 2)
    m = mask.astype(jnp.float32)
    pooled = m.reshape(B, H, sr, W, sr).max(axis=(2, 4))
    out_c = output[:, cp:H - cp, cp:W - cp].reshape(B, -1).astype(jnp.float32)
    msk_c = pooled[:, cp:H - cp, cp:W - cp].reshape(B, -1)
    outside = out_c * (1.0 - msk_c)
    outside = outside.max(-1) * 0.9 + outside.mean(-1) * 0.1
    inside = out_c * msk_c
    inside = 1.0 - (inside.max(-1) * 0.9 + inside.mean(-1) * 0.1)
    om, im = outside.mean(), inside.mean()
    imb = jnp.abs(im - om) ** 3
    return om + im * 1.1 + imb, outside, inside


if __name__ == "__main__":
    key = jax.random.PRNGKey(0)
    k1, k2 = jax.random.split(key)

    B, H, W = 16, 32, 32         # model output resolution (16 samples -> 2 grid steps)
    SR = 2                       # mask is SR x finer -> size_reduction = 2
    Hm, Wm = H * SR, W * SR

    output = jax.random.uniform(k1, (B, H, W), dtype=jnp.float32)
    # 0/1 mask stored as 1 byte per element in HBM; cast in-kernel.
    mask = (jax.random.uniform(k2, (B, Hm, Wm)) > 0.7).astype(jnp.int8)

    loss, extras = mask_loss(output, mask)
    jax.block_until_ready(loss)
    jax.block_until_ready(extras["outside_mask"])
    jax.block_until_ready(extras["inside_mask"])

    ref_loss, ref_out, ref_in = mask_loss_ref(output, mask)
    assert jnp.allclose(loss, ref_loss, atol=1e-5), (loss, ref_loss)
    assert jnp.allclose(extras["outside_mask"], ref_out, atol=1e-5)
    assert jnp.allclose(extras["inside_mask"], ref_in, atol=1e-5)

    print("KERNEL_OK")
</pallas_src>

<mosaic_0001>
module attributes {stable_mosaic.version = 11 : i64} {
  func.func @_mask_loss_kernel(%arg0: i32, %arg1: memref<32x32xf32, #tpu.memory_space<vmem>>, %arg2: memref<32x32xf32, #tpu.memory_space<vmem>>, %arg3: memref<32x64xbf16, #tpu.memory_space<vmem>>, %arg4: memref<64x32xbf16, #tpu.memory_space<vmem>>, %arg5: memref<8x32x32xf32, #tpu.memory_space<vmem>>, %arg6: memref<8x64x64xi8, #tpu.memory_space<vmem>>, %arg7: memref<8x1x2xf32, #tpu.memory_space<vmem>>) attributes {dimension_semantics = [#tpu.dimension_semantics<parallel>], iteration_bounds = array<i64: 2>, scalar_prefetch = 0 : i64, scratch_operands = 0 : i64, tpu.core_type = #tpu.core_type<tc>, window_params = [{pipeline_mode = #tpu.pipeline_mode<synchronous>, transform_indices = @transform_0, window_bounds = array<i64: 32, 32>}, {pipeline_mode = #tpu.pipeline_mode<synchronous>, transform_indices = @transform_1, window_bounds = array<i64: 32, 32>}, {pipeline_mode = #tpu.pipeline_mode<synchronous>, transform_indices = @transform_2, window_bounds = array<i64: 32, 64>}, {pipeline_mode = #tpu.pipeline_mode<synchronous>, transform_indices = @transform_3, window_bounds = array<i64: 64, 32>}, {transform_indices = @transform_4, window_bounds = array<i64: 8, 32, 32>}, {transform_indices = @transform_5, window_bounds = array<i64: 8, 64, 64>}, {transform_indices = @transform_6, window_bounds = array<i64: 8, 1, 2>}]} {
    %c0 = arith.constant 0 : index
    %c0_0 = arith.constant 0 : index
    %0 = vector.load %arg1[%c0, %c0_0] : memref<32x32xf32, #tpu.memory_space<vmem>>, vector<32x32xf32>
    %c0_1 = arith.constant 0 : index
    %c0_2 = arith.constant 0 : index
    %1 = vector.load %arg2[%c0_1, %c0_2] : memref<32x32xf32, #tpu.memory_space<vmem>>, vector<32x32xf32>
    %c0_3 = arith.constant 0 : index
    %c0_4 = arith.constant 0 : index
    %2 = vector.load %arg3[%c0_3, %c0_4] : memref<32x64xbf16, #tpu.memory_space<vmem>>, vector<32x64xbf16>
    %c0_5 = arith.constant 0 : index
    %c0_6 = arith.constant 0 : index
    %3 = vector.load %arg4[%c0_5, %c0_6] : memref<64x32xbf16, #tpu.memory_space<vmem>>, vector<64x32xbf16>
    %c0_7 = arith.constant 0 : index
    %c0_8 = arith.constant 0 : index
    %c0_9 = arith.constant 0 : index
    %4 = vector.load %arg5[%c0_7, %c0_8, %c0_9] : memref<8x32x32xf32, #tpu.memory_space<vmem>>, vector<8x32x32xf32>
    %5 = vector.shape_cast %0 : vector<32x32xf32> to vector<1x32x32xf32>
    %6 = vector.broadcast %5 : vector<1x32x32xf32> to vector<8x32x32xf32>
    %7 = arith.mulf %4, %6 : vector<8x32x32xf32>
    %c0_10 = arith.constant 0 : index
    %c0_11 = arith.constant 0 : index
    %c0_12 = arith.constant 0 : index
    %8 = vector.load %arg6[%c0_10, %c0_11, %c0_12] : memref<8x64x64xi8, #tpu.memory_space<vmem>>, vector<1x64x64xi8>
    %9 = vector.shape_cast %8 : vector<1x64x64xi8> to vector<64x64xi8>
    %10 = arith.sitofp %9 : vector<64x64xi8> to vector<64x64xf32>
    %11 = arith.truncf %10 : vector<64x64xf32> to vector<64x64xbf16>
    %cst = arith.constant dense<0.000000e+00> : vector<32x64xf32>
    %12 = tpu.matmul %2, %11, %cst {dimension_numbers = #tpu.dot_dimension_numbers<[1], [0], [0], [1], [0, 0, 1, 1], [], []>} : vector<32x64xbf16>, vector<64x64xbf16>, vector<32x64xf32> -> vector<32x64xf32>
    %13 = arith.truncf %12 : vector<32x64xf32> to vector<32x64xbf16>
    %cst_13 = arith.constant dense<0.000000e+00> : vector<32x32xf32>
    %14 = tpu.matmul %13, %3, %cst_13 {dimension_numbers = #tpu.dot_dimension_numbers<[1], [0], [0], [1], [0, 0, 1, 1], [], []>} : vector<32x64xbf16>, vector<64x32xbf16>, vector<32x32xf32> -> vector<32x32xf32>
    %cst_14 = arith.constant 5.000000e-01 : f32
    %15 = vector.broadcast %cst_14 : f32 to vector<32x32xf32>
    %16 = arith.cmpf ogt, %14, %15 : vector<32x32xf32>
    %17 = arith.extui %16 : vector<32x32xi1> to vector<32x32xi32>
    %18 = arith.sitofp %17 : vector<32x32xi32> to vector<32x32xf32>
    %19 = vector.extract_strided_slice %7 {offsets = [0, 0, 0], sizes = [1, 32, 32], strides = [1, 1, 1]} : vector<8x32x32xf32> to vector<1x32x32xf32>
    %20 = vector.shape_cast %19 : vector<1x32x32xf32> to vector<32x32xf32>
    %21 = arith.mulf %20, %18 : vector<32x32xf32>
    %22 = arith.subf %20, %21 : vector<32x32xf32>
    %cst_15 = arith.constant dense<0.000000e+00> : vector<32xf32>
    %23 = vector.multi_reduction <add>, %21, %cst_15 [1] : vector<32x32xf32> to vector<32xf32>
    %24 = vector.shape_cast %23 : vector<32xf32> to vector<32x1xf32>
    %cst_16 = arith.constant dense<0.000000e+00> : vector<1xf32>
    %25 = vector.multi_reduction <add>, %24, %cst_16 [0] : vector<32x1xf32> to vector<1xf32>
    %26 = vector.shape_cast %25 : vector<1xf32> to vector<1x1xf32>
    %cst_17 = arith.constant dense<0.000000e+00> : vector<32xf32>
    %27 = vector.multi_reduction <add>, %20, %cst_17 [1] : vector<32x32xf32> to vector<32xf32>
    %28 = vector.shape_cast %27 : vector<32xf32> to vector<32x1xf32>
    %cst_18 = arith.constant dense<0.000000e+00> : vector<1xf32>
    %29 = vector.multi_reduction <add>, %28, %cst_18 [0] : vector<32x1xf32> to vector<1xf32>
    %30 = vector.shape_cast %29 : vector<1xf32> to vector<1x1xf32>
    %31 = arith.subf %30, %26 : vector<1x1xf32>
    %32 = arith.addf %21, %1 : vector<32x32xf32>
    %cst_19 = arith.constant dense<0xFF800000> : vector<32xf32>
    %33 = vector.multi_reduction <maximumf>, %32, %cst_19 [1] : vector<32x32xf32> to vector<32xf32>
    %34 = vector.shape_cast %33 : vector<32xf32> to vector<32x1xf32>
    %cst_20 = arith.constant dense<0xFF800000> : vector<1xf32>
    %35 = vector.multi_reduction <maximumf>, %34, %cst_20 [0] : vector<32x1xf32> to vector<1xf32>
    %36 = vector.shape_cast %35 : vector<1xf32> to vector<1x1xf32>
    %37 = arith.addf %22, %1 : vector<32x32xf32>
    %cst_21 = arith.constant dense<0xFF800000> : vector<32xf32>
    %38 = vector.multi_reduction <maximumf>, %37, %cst_21 [1] : vector<32x32xf32> to vector<32xf32>
    %39 = vector.shape_cast %38 : vector<32xf32> to vector<32x1xf32>
    %cst_22 = arith.constant dense<0xFF800000> : vector<1xf32>
    %40 = vector.multi_reduction <maximumf>, %39, %cst_22 [0] : vector<32x1xf32> to vector<1xf32>
    %41 = vector.shape_cast %40 : vector<1xf32> to vector<1x1xf32>
    %cst_23 = arith.constant 0.899999976 : f32
    %42 = vector.broadcast %cst_23 : f32 to vector<1x1xf32>
    %43 = arith.mulf %41, %42 : vector<1x1xf32>
    %cst_24 = arith.constant 1.27551015E-4 : f32
    %44 = vector.broadcast %cst_24 : f32 to vector<1x1xf32>
    %45 = arith.mulf %31, %44 : vector<1x1xf32>
    %46 = arith.addf %43, %45 : vector<1x1xf32>
    %c0_25 = arith.constant 0 : index
    %c0_26 = arith.constant 0 : index
    %c0_27 = arith.constant 0 : index
    %47 = vector.load %arg7[%c0_25, %c0_26, %c0_27] : memref<8x1x2xf32, #tpu.memory_space<vmem>>, vector<1x1x1xf32>
    %48 = vector.shape_cast %47 : vector<1x1x1xf32> to vector<1x1xf32>
    %49 = vector.shape_cast %46 : vector<1x1xf32> to vector<1x1x1xf32>
    tpu.vector_store %arg7[%c0_25, %c0_26, %c0_27], %49 {strides = array<i32>} : memref<8x1x2xf32, #tpu.memory_space<vmem>>, vector<1x1x1xf32>,
    %cst_28 = arith.constant 0.899999976 : f32
    %50 = vector.broadcast %cst_28 : f32 to vector<1x1xf32>
    %51 = arith.mulf %36, %50 : vector<1x1xf32>
    %cst_29 = arith.constant 1.27551015E-4 : f32
    %52 = vector.broadcast %cst_29 : f32 to vector<1x1xf32>
    %53 = arith.mulf %26, %52 : vector<1x1xf32>
    %54 = arith.addf %51, %53 : vector<1x1xf32>
    %cst_30 = arith.constant 1.000000e+00 : f32
    %55 = vector.broadcast %cst_30 : f32 to vector<1x1xf32>
    %56 = arith.subf %55, %54 : vector<1x1xf32>
    %c0_31 = arith.constant 0 : index
    %c0_32 = arith.constant 0 : index
    %c1 = arith.constant 1 : index
    %57 = vector.load %arg7[%c0_31, %c0_32, %c1] : memref<8x1x2xf32, #tpu.memory_space<vmem>>, vector<1x1x1xf32>
    %58 = vector.shape_cast %57 : vector<1x1x1xf32> to vector<1x1xf32>
    %59 = vector.shape_cast %56 : vector<1x1xf32> to vector<1x1x1xf32>
    tpu.vector_store %arg7[%c0_31, %c0_32, %c1], %59 {strides = array<i32>} : memref<8x1x2xf32, #tpu.memory_space<vmem>>, vector<1x1x1xf32>,
    %c1_33 = arith.constant 1 : index
    %c0_34 = arith.constant 0 : index
    %c0_35 = arith.constant 0 : index
    %60 = vector.load %arg6[%c1_33, %c0_34, %c0_35] : memref<8x64x64xi8, #tpu.memory_space<vmem>>, vector<1x64x64xi8>
    %61 = vector.shape_cast %60 : vector<1x64x64xi8> to vector<64x64xi8>
    %62 = arith.sitofp %61 : vector<64x64xi8> to vector<64x64xf32>
    %63 = arith.truncf %62 : vector<64x64xf32> to vector<64x64xbf16>
    %cst_36 = arith.constant dense<0.000000e+00> : vector<32x64xf32>
    %64 = tpu.matmul %2, %63, %cst_36 {dimension_numbers = #tpu.dot_dimension_numbers<[1], [0], [0], [1], [0, 0, 1, 1], [], []>} : vector<32x64xbf16>, vector<64x64xbf16>, vector<32x64xf32> -> vector<32x64xf32>
    %65 = arith.truncf %64 : vector<32x64xf32> to vector<32x64xbf16>
    %cst_37 = arith.constant dense<0.000000e+00> : vector<32x32xf32>
    %66 = tpu.matmul %65, %3, %cst_37 {dimension_numbers = #tpu.dot_dimension_numbers<[1], [0], [0], [1], [0, 0, 1, 1], [], []>} : vector<32x64xbf16>, vector<64x32xbf16>, vector<32x32xf32> -> vector<32x32xf32>
    %cst_38 = arith.constant 5.000000e-01 : f32
    %67 = vector.broadcast %cst_38 : f32 to vector<32x32xf32>
    %68 = arith.cmpf ogt, %66, %67 : vector<32x32xf32>
    %69 = arith.extui %68 : vector<32x32xi1> to vector<32x32xi32>
    %70 = arith.sitofp %69 : vector<32x32xi32> to vector<32x32xf32>
    %71 = vector.extract_strided_slice %7 {offsets = [1, 0, 0], sizes = [1, 32, 32], strides = [1, 1, 1]} : vector<8x32x32xf32> to vector<1x32x32xf32>
    %72 = vector.shape_cast %71 : vector<1x32x32xf32> to vector<32x32xf32>
    %73 = arith.mulf %72, %70 : vector<32x32xf32>
    %74 = arith.subf %72, %73 : vector<32x32xf32>
    %cst_39 = arith.constant dense<0.000000e+00> : vector<32xf32>
    %75 = vector.multi_reduction <add>, %73, %cst_39 [1] : vector<32x32xf32> to vector<32xf32>
    %76 = vector.shape_cast %75 : vector<32xf32> to vector<32x1xf32>
    %cst_40 = arith.constant dense<0.000000e+00> : vector<1xf32>
    %77 = vector.multi_reduction <add>, %76, %cst_40 [0] : vector<32x1xf32> to vector<1xf32>
    %78 = vector.shape_cast %77 : vector<1xf32> to vector<1x1xf32>
    %cst_41 = arith.constant dense<0.000000e+00> : vector<32xf32>
    %79 = vector.multi_reduction <add>, %72, %cst_41 [1] : vector<32x32xf32> to vector<32xf32>
    %80 = vector.shape_cast %79 : vector<32xf32> to vector<32x1xf32>
    %cst_42 = arith.constant dense<0.000000e+00> : vector<1xf32>
    %81 = vector.multi_reduction <add>, %80, %cst_42 [0] : vector<32x1xf32> to vector<1xf32>
    %82 = vector.shape_cast %81 : vector<1xf32> to vector<1x1xf32>
    %83 = arith.subf %82, %78 : vector<1x1xf32>
    %84 = arith.addf %73, %1 : vector<32x32xf32>
    %cst_43 = arith.constant dense<0xFF800000> : vector<32xf32>
    %85 = vector.multi_reduction <maximumf>, %84, %cst_43 [1] : vector<32x32xf32> to vector<32xf32>
    %86 = vector.shape_cast %85 : vector<32xf32> to vector<32x1xf32>
    %cst_44 = arith.constant dense<0xFF800000> : vector<1xf32>
    %87 = vector.multi_reduction <maximumf>, %86, %cst_44 [0] : vector<32x1xf32> to vector<1xf32>
    %88 = vector.shape_cast %87 : vector<1xf32> to vector<1x1xf32>
    %89 = arith.addf %74, %1 : vector<32x32xf32>
    %cst_45 = arith.constant dense<0xFF800000> : vector<32xf32>
    %90 = vector.multi_reduction <maximumf>, %89, %cst_45 [1] : vector<32x32xf32> to vector<32xf32>
    %91 = vector.shape_cast %90 : vector<32xf32> to vector<32x1xf32>
    %cst_46 = arith.constant dense<0xFF800000> : vector<1xf32>
    %92 = vector.multi_reduction <maximumf>, %91, %cst_46 [0] : vector<32x1xf32> to vector<1xf32>
    %93 = vector.shape_cast %92 : vector<1xf32> to vector<1x1xf32>
    %cst_47 = arith.constant 0.899999976 : f32
    %94 = vector.broadcast %cst_47 : f32 to vector<1x1xf32>
    %95 = arith.mulf %93, %94 : vector<1x1xf32>
    %cst_48 = arith.constant 1.27551015E-4 : f32
    %96 = vector.broadcast %cst_48 : f32 to vector<1x1xf32>
    %97 = arith.mulf %83, %96 : vector<1x1xf32>
    %98 = arith.addf %95, %97 : vector<1x1xf32>
    %c1_49 = arith.constant 1 : index
    %c0_50 = arith.constant 0 : index
    %c0_51 = arith.constant 0 : index
    %99 = vector.load %arg7[%c1_49, %c0_50, %c0_51] : memref<8x1x2xf32, #tpu.memory_space<vmem>>, vector<1x1x1xf32>
    %100 = vector.shape_cast %99 : vector<1x1x1xf32> to vector<1x1xf32>
    %101 = vector.shape_cast %98 : vector<1x1xf32> to vector<1x1x1xf32>
    tpu.vector_store %arg7[%c1_49, %c0_50, %c0_51], %101 {strides = array<i32>} : memref<8x1x2xf32, #tpu.memory_space<vmem>>, vector<1x1x1xf32>,
    %cst_52 = arith.constant 0.899999976 : f32
    %102 = vector.broadcast %cst_52 : f32 to vector<1x1xf32>
    %103 = arith.mulf %88, %102 : vector<1x1xf32>
    %cst_53 = arith.constant 1.27551015E-4 : f32
    %104 = vector.broadcast %cst_53 : f32 to vector<1x1xf32>
    %105 = arith.mulf %78, %104 : vector<1x1xf32>
    %106 = arith.addf %103, %105 : vector<1x1xf32>
    %cst_54 = arith.constant 1.000000e+00 : f32
    %107 = vector.broadcast %cst_54 : f32 to vector<1x1xf32>
    %108 = arith.subf %107, %106 : vector<1x1xf32>
    %c1_55 = arith.constant 1 : index
    %c0_56 = arith.constant 0 : index
    %c1_57 = arith.constant 1 : index
    %109 = vector.load %arg7[%c1_55, %c0_56, %c1_57] : memref<8x1x2xf32, #tpu.memory_space<vmem>>, vector<1x1x1xf32>
    %110 = vector.shape_cast %109 : vector<1x1x1xf32> to vector<1x1xf32>
    %111 = vector.shape_cast %108 : vector<1x1xf32> to vector<1x1x1xf32>
    tpu.vector_store %arg7[%c1_55, %c0_56, %c1_57], %111 {strides = array<i32>} : memref<8x1x2xf32, #tpu.memory_space<vmem>>, vector<1x1x1xf32>,
    %c2 = arith.constant 2 : index
    %c0_58 = arith.constant 0 : index
    %c0_59 = arith.constant 0 : index
    %112 = vector.load %arg6[%c2, %c0_58, %c0_59] : memref<8x64x64xi8, #tpu.memory_space<vmem>>, vector<1x64x64xi8>
    %113 = vector.shape_cast %112 : vector<1x64x64xi8> to vector<64x64xi8>
    %114 = arith.sitofp %113 : vector<64x64xi8> to vector<64x64xf32>
    %115 = arith.truncf %114 : vector<64x64xf32> to vector<64x64xbf16>
    %cst_60 = arith.constant dense<0.000000e+00> : vector<32x64xf32>
    %116 = tpu.matmul %2, %115, %cst_60 {dimension_numbers = #tpu.dot_dimension_numbers<[1], [0], [0], [1], [0, 0, 1, 1], [], []>} : vector<32x64xbf16>, vector<64x64xbf16>, vector<32x64xf32> -> vector<32x64xf32>
    %117 = arith.truncf %116 : vector<32x64xf32> to vector<32x64xbf16>
    %cst_61 = arith.constant dense<0.000000e+00> : vector<32x32xf32>
    %118 = tpu.matmul %117, %3, %cst_61 {dimension_numbers = #tpu.dot_dimension_numbers<[1], [0], [0], [1], [0, 0, 1, 1], [], []>} : vector<32x64xbf16>, vector<64x32xbf16>, vector<32x32xf32> -> vector<32x32xf32>
    %cst_62 = arith.constant 5.000000e-01 : f32
    %119 = vector.broadcast %cst_62 : f32 to vector<32x32xf32>
    %120 = arith.cmpf ogt, %118, %119 : vector<32x32xf32>
    %121 = arith.extui %120 : vector<32x32xi1> to vector<32x32xi32>
    %122 = arith.sitofp %121 : vector<32x32xi32> to vector<32x32xf32>
    %123 = vector.extract_strided_slice %7 {offsets = [2, 0, 0], sizes = [1, 32, 32], strides = [1, 1, 1]} : vector<8x32x32xf32> to vector<1x32x32xf32>
    %124 = vector.shape_cast %123 : vector<1x32x32xf32> to vector<32x32xf32>
    %125 = arith.mulf %124, %122 : vector<32x32xf32>
    %126 = arith.subf %124, %125 : vector<32x32xf32>
    %cst_63 = arith.constant dense<0.000000e+00> : vector<32xf32>
    %127 = vector.multi_reduction <add>, %125, %cst_63 [1] : vector<32x32xf32> to vector<32xf32>
    %128 = vector.shape_cast %127 : vector<32xf32> to vector<32x1xf32>
    %cst_64 = arith.constant dense<0.000000e+00> : vector<1xf32>
    %129 = vector.multi_reduction <add>, %128, %cst_64 [0] : vector<32x1xf32> to vector<1xf32>
    %130 = vector.shape_cast %129 : vector<1xf32> to vector<1x1xf32>
    %cst_65 = arith.constant dense<0.000000e+00> : vector<32xf32>
    %131 = vector.multi_reduction <add>, %124, %cst_65 [1] : vector<32x32xf32> to vector<32xf32>
    %132 = vector.shape_cast %131 : vector<32xf32> to vector<32x1xf32>
    %cst_66 = arith.constant dense<0.000000e+00> : vector<1xf32>
    %133 = vector.multi_reduction <add>, %132, %cst_66 [0] : vector<32x1xf32> to vector<1xf32>
    %134 = vector.shape_cast %133 : vector<1xf32> to vector<1x1xf32>
    %135 = arith.subf %134, %130 : vector<1x1xf32>
    %136 = arith.addf %125, %1 : vector<32x32xf32>
    %cst_67 = arith.constant dense<0xFF800000> : vector<32xf32>
    %137 = vector.multi_reduction <maximumf>, %136, %cst_67 [1] : vector<32x32xf32> to vector<32xf32>
    %138 = vector.shape_cast %137 : vector<32xf32> to vector<32x1xf32>
    %cst_68 = arith.constant dense<0xFF800000> : vector<1xf32>
    %139 = vector.multi_reduction <maximumf>, %138, %cst_68 [0] : vector<32x1xf32> to vector<1xf32>
    %140 = vector.shape_cast %139 : vector<1xf32> to vector<1x1xf32>
    %141 = arith.addf %126, %1 : vector<32x32xf32>
    %cst_69 = arith.constant dense<0xFF800000> : vector<32xf32>
    %142 = vector.multi_reduction <maximumf>, %141, %cst_69 [1] : vector<32x32xf32> to vector<32xf32>
    %143 = vector.shape_cast %142 : vector<32xf32> to vector<32x1xf32>
    %cst_70 = arith.constant dense<0xFF800000> : vector<1xf32>
    %144 = vector.multi_reduction <maximumf>, %143, %cst_70 [0] : vector<32x1xf32> to vector<1xf32>
    %145 = vector.shape_cast %144 : vector<1xf32> to vector<1x1xf32>
    %cst_71 = arith.constant 0.899999976 : f32
    %146 = vector.broadcast %cst_71 : f32 to vector<1x1xf32>
    %147 = arith.mulf %145, %146 : vector<1x1xf32>
    %cst_72 = arith.constant 1.27551015E-4 : f32
    %148 = vector.broadcast %cst_72 : f32 to vector<1x1xf32>
    %149 = arith.mulf %135, %148 : vector<1x1xf32>
    %150 = arith.addf %147, %149 : vector<1x1xf32>
    %c2_73 = arith.constant 2 : index
    %c0_74 = arith.constant 0 : index
    %c0_75 = arith.constant 0 : index
    %151 = vector.load %arg7[%c2_73, %c0_74, %c0_75] : memref<8x1x2xf32, #tpu.memory_space<vmem>>, vector<1x1x1xf32>
    %152 = vector.shape_cast %151 : vector<1x1x1xf32> to vector<1x1xf32>
    %153 = vector.shape_cast %150 : vector<1x1xf32> to vector<1x1x1xf32>
    tpu.vector_store %arg7[%c2_73, %c0_74, %c0_75], %153 {strides = array<i32>} : memref<8x1x2xf32, #tpu.memory_space<vmem>>, vector<1x1x1xf32>,
    %cst_76 = arith.constant 0.899999976 : f32
    %154 = vector.broadcast %cst_76 : f32 to vector<1x1xf32>
    %155 = arith.mulf %140, %154 : vector<1x1xf32>
    %cst_77 = arith.constant 1.27551015E-4 : f32
    %156 = vector.broadcast %cst_77 : f32 to vector<1x1xf32>
    %157 = arith.mulf %130, %156 : vector<1x1xf32>
    %158 = arith.addf %155, %157 : vector<1x1xf32>
    %cst_78 = arith.constant 1.000000e+00 : f32
    %159 = vector.broadcast %cst_78 : f32 to vector<1x1xf32>
    %160 = arith.subf %159, %158 : vector<1x1xf32>
    %c2_79 = arith.constant 2 : index
    %c0_80 = arith.constant 0 : index
    %c1_81 = arith.constant 1 : index
    %161 = vector.load %arg7[%c2_79, %c0_80, %c1_81] : memref<8x1x2xf32, #tpu.memory_space<vmem>>, vector<1x1x1xf32>
    %162 = vector.shape_cast %161 : vector<1x1x1xf32> to vector<1x1xf32>
    %163 = vector.shape_cast %160 : vector<1x1xf32> to vector<1x1x1xf32>
    tpu.vector_store %arg7[%c2_79, %c0_80, %c1_81], %163 {strides = array<i32>} : memref<8x1x2xf32, #tpu.memory_space<vmem>>, vector<1x1x1xf32>,
    %c3 = arith.constant 3 : index
    %c0_82 = arith.constant 0 : index
    %c0_83 = arith.constant 0 : index
    %164 = vector.load %arg6[%c3, %c0_82, %c0_83] : memref<8x64x64xi8, #tpu.memory_space<vmem>>, vector<1x64x64xi8>
    %165 = vector.shape_cast %164 : vector<1x64x64xi8> to vector<64x64xi8>
    %166 = arith.sitofp %165 : vector<64x64xi8> to vector<64x64xf32>
    %167 = arith.truncf %166 : vector<64x64xf32> to vector<64x64xbf16>
    %cst_84 = arith.constant dense<0.000000e+00> : vector<32x64xf32>
    %168 = tpu.matmul %2, %167, %cst_84 {dimension_numbers = #tpu.dot_dimension_numbers<[1], [0], [0], [1], [0, 0, 1, 1], [], []>} : vector<32x64xbf16>, vector<64x64xbf16>, vector<32x64xf32> -> vector<32x64xf32>
    %169 = arith.truncf %168 : vector<32x64xf32> to vector<32x64xbf16>
    %cst_85 = arith.constant dense<0.000000e+00> : vector<32x32xf32>
    %170 = tpu.matmul %169, %3, %cst_85 {dimension_numbers = #tpu.dot_dimension_numbers<[1], [0], [0], [1], [0, 0, 1, 1], [], []>} : vector<32x64xbf16>, vector<64x32xbf16>, vector<32x32xf32> -> vector<32x32xf32>
    %cst_86 = arith.constant 5.000000e-01 : f32
    %171 = vector.broadcast %cst_86 : f32 to vector<32x32xf32>
    %172 = arith.cmpf ogt, %170, %171 : vector<32x32xf32>
    %173 = arith.extui %172 : vector<32x32xi1> to vector<32x32xi32>
    %174 = arith.sitofp %173 : vector<32x32xi32> to vector<32x32xf32>
    %175 = vector.extract_strided_slice %7 {offsets = [3, 0, 0], sizes = [1, 32, 32], strides = [1, 1, 1]} : vector<8x32x32xf32> to vector<1x32x32xf32>
    %176 = vector.shape_cast %175 : vector<1x32x32xf32> to vector<32x32xf32>
    %177 = arith.mulf %176, %174 : vector<32x32xf32>
    %178 = arith.subf %176, %177 : vector<32x32xf32>
    %cst_87 = arith.constant dense<0.000000e+00> : vector<32xf32>
    %179 = vector.multi_reduction <add>, %177, %cst_87 [1] : vector<32x32xf32> to vector<32xf32>
    %180 = vector.shape_cast %179 : vector<32xf32> to vector<32x1xf32>
    %cst_88 = arith.constant dense<0.000000e+00> : vector<1xf32>
    %181 = vector.multi_reduction <add>, %180, %cst_88 [0] : vector<32x1xf32> to vector<1xf32>
    %182 = vector.shape_cast %181 : vector<1xf32> to vector<1x1xf32>
    %cst_89 = arith.constant dense<0.000000e+00> : vector<32xf32>
    %183 = vector.multi_reduction <add>, %176, %cst_89 [1] : vector<32x32xf32> to vector<32xf32>
    %184 = vector.shape_cast %183 : vector<32xf32> to vector<32x1xf32>
    %cst_90 = arith.constant dense<0.000000e+00> : vector<1xf32>
    %185 = vector.multi_reduction <add>, %184, %cst_90 [0] : vector<32x1xf32> to vector<1xf32>
    %186 = vector.shape_cast %185 : vector<1xf32> to vector<1x1xf32>
    %187 = arith.subf %186, %182 : vector<1x1xf32>
    %188 = arith.addf %177, %1 : vector<32x32xf32>
    %cst_91 = arith.constant dense<0xFF800000> : vector<32xf32>
    %189 = vector.multi_reduction <maximumf>, %188, %cst_91 [1] : vector<32x32xf32> to vector<32xf32>
    %190 = vector.shape_cast %189 : vector<32xf32> to vector<32x1xf32>
    %cst_92 = arith.constant dense<0xFF800000> : vector<1xf32>
    %191 = vector.multi_reduction <maximumf>, %190, %cst_92 [0] : vector<32x1xf32> to vector<1xf32>
    %192 = vector.shape_cast %191 : vector<1xf32> to vector<1x1xf32>
    %193 = arith.addf %178, %1 : vector<32x32xf32>
    %cst_93 = arith.constant dense<0xFF800000> : vector<32xf32>
    %194 = vector.multi_reduction <maximumf>, %193, %cst_93 [1] : vector<32x32xf32> to vector<32xf32>
    %195 = vector.shape_cast %194 : vector<32xf32> to vector<32x1xf32>
    %cst_94 = arith.constant dense<0xFF800000> : vector<1xf32>
    %196 = vector.multi_reduction <maximumf>, %195, %cst_94 [0] : vector<32x1xf32> to vector<1xf32>
    %197 = vector.shape_cast %196 : vector<1xf32> to vector<1x1xf32>
    %cst_95 = arith.constant 0.899999976 : f32
    %198 = vector.broadcast %cst_95 : f32 to vector<1x1xf32>
    %199 = arith.mulf %197, %198 : vector<1x1xf32>
    %cst_96 = arith.constant 1.27551015E-4 : f32
    %200 = vector.broadcast %cst_96 : f32 to vector<1x1xf32>
    %201 = arith.mulf %187, %200 : vector<1x1xf32>
    %202 = arith.addf %199, %201 : vector<1x1xf32>
    %c3_97 = arith.constant 3 : index
    %c0_98 = arith.constant 0 : index
    %c0_99 = arith.constant 0 : index
    %203 = vector.load %arg7[%c3_97, %c0_98, %c0_99] : memref<8x1x2xf32, #tpu.memory_space<vmem>>, vector<1x1x1xf32>
    %204 = vector.shape_cast %203 : vector<1x1x1xf32> to vector<1x1xf32>
    %205 = vector.shape_cast %202 : vector<1x1xf32> to vector<1x1x1xf32>
    tpu.vector_store %arg7[%c3_97, %c0_98, %c0_99], %205 {strides = array<i32>} : memref<8x1x2xf32, #tpu.memory_space<vmem>>, vector<1x1x1xf32>,
    %cst_100 = arith.constant 0.899999976 : f32
    %206 = vector.broadcast %cst_100 : f32 to vector<1x1xf32>
    %207 = arith.mulf %192, %206 : vector<1x1xf32>
    %cst_101 = arith.constant 1.27551015E-4 : f32
    %208 = vector.broadcast %cst_101 : f32 to vector<1x1xf32>
    %209 = arith.mulf %182, %208 : vector<1x1xf32>
    %210 = arith.addf %207, %209 : vector<1x1xf32>
    %cst_102 = arith.constant 1.000000e+00 : f32
    %211 = vector.broadcast %cst_102 : f32 to vector<1x1xf32>
    %212 = arith.subf %211, %210 : vector<1x1xf32>
    %c3_103 = arith.constant 3 : index
    %c0_104 = arith.constant 0 : index
    %c1_105 = arith.constant 1 : index
    %213 = vector.load %arg7[%c3_103, %c0_104, %c1_105] : memref<8x1x2xf32, #tpu.memory_space<vmem>>, vector<1x1x1xf32>
    %214 = vector.shape_cast %213 : vector<1x1x1xf32> to vector<1x1xf32>
    %215 = vector.shape_cast %212 : vector<1x1xf32> to vector<1x1x1xf32>
    tpu.vector_store %arg7[%c3_103, %c0_104, %c1_105], %215 {strides = array<i32>} : memref<8x1x2xf32, #tpu.memory_space<vmem>>, vector<1x1x1xf32>,
    %c4 = arith.constant 4 : index
    %c0_106 = arith.constant 0 : index
    %c0_107 = arith.constant 0 : index
    %216 = vector.load %arg6[%c4, %c0_106, %c0_107] : memref<8x64x64xi8, #tpu.memory_space<vmem>>, vector<1x64x64xi8>
    %217 = vector.shape_cast %216 : vector<1x64x64xi8> to vector<64x64xi8>
    %218 = arith.sitofp %217 : vector<64x64xi8> to vector<64x64xf32>
    %219 = arith.truncf %218 : vector<64x64xf32> to vector<64x64xbf16>
    %cst_108 = arith.constant dense<0.000000e+00> : vector<32x64xf32>
    %220 = tpu.matmul %2, %219, %cst_108 {dimension_numbers = #tpu.dot_dimension_numbers<[1], [0], [0], [1], [0, 0, 1, 1], [], []>} : vector<32x64xbf16>, vector<64x64xbf16>, vector<32x64xf32> -> vector<32x64xf32>
    %221 = arith.truncf %220 : vector<32x64xf32> to vector<32x64xbf16>
    %cst_109 = arith.constant dense<0.000000e+00> : vector<32x32xf32>
    %222 = tpu.matmul %221, %3, %cst_109 {dimension_numbers = #tpu.dot_dimension_numbers<[1], [0], [0], [1], [0, 0, 1, 1], [], []>} : vector<32x64xbf16>, vector<64x32xbf16>, vector<32x32xf32> -> vector<32x32xf32>
    %cst_110 = arith.constant 5.000000e-01 : f32
    %223 = vector.broadcast %cst_110 : f32 to vector<32x32xf32>
    %224 = arith.cmpf ogt, %222, %223 : vector<32x32xf32>
    %225 = arith.extui %224 : vector<32x32xi1> to vector<32x32xi32>
    %226 = arith.sitofp %225 : vector<32x32xi32> to vector<32x32xf32>
    %227 = vector.extract_strided_slice %7 {offsets = [4, 0, 0], sizes = [1, 32, 32], strides = [1, 1, 1]} : vector<8x32x32xf32> to vector<1x32x32xf32>
    %228 = vector.shape_cast %227 : vector<1x32x32xf32> to vector<32x32xf32>
    %229 = arith.mulf %228, %226 : vector<32x32xf32>
    %230 = arith.subf %228, %229 : vector<32x32xf32>
    %cst_111 = arith.constant dense<0.000000e+00> : vector<32xf32>
    %231 = vector.multi_reduction <add>, %229, %cst_111 [1] : vector<32x32xf32> to vector<32xf32>
    %232 = vector.shape_cast %231 : vector<32xf32> to vector<32x1xf32>
    %cst_112 = arith.constant dense<0.000000e+00> : vector<1xf32>
    %233 = vector.multi_reduction <add>, %232, %cst_112 [0] : vector<32x1xf32> to vector<1xf32>
    %234 = vector.shape_cast %233 : vector<1xf32> to vector<1x1xf32>
    %cst_113 = arith.constant dense<0.000000e+00> : vector<32xf32>
    %235 = vector.multi_reduction <add>, %228, %cst_113 [1] : vector<32x32xf32> to vector<32xf32>
    %236 = vector.shape_cast %235 : vector<32xf32> to vector<32x1xf32>
    %cst_114 = arith.constant dense<0.000000e+00> : vector<1xf32>
    %237 = vector.multi_reduction <add>, %236, %cst_114 [0] : vector<32x1xf32> to vector<1xf32>
    %238 = vector.shape_cast %237 : vector<1xf32> to vector<1x1xf32>
    %239 = arith.subf %238, %234 : vector<1x1xf32>
    %240 = arith.addf %229, %1 : vector<32x32xf32>
    %cst_115 = arith.constant dense<0xFF800000> : vector<32xf32>
    %241 = vector.multi_reduction <maximumf>, %240, %cst_115 [1] : vector<32x32xf32> to vector<32xf32>
    %242 = vector.shape_cast %241 : vector<32xf32> to vector<32x1xf32>
    %cst_116 = arith.constant dense<0xFF800000> : vector<1xf32>
    %243 = vector.multi_reduction <maximumf>, %242, %cst_116 [0] : vector<32x1xf32> to vector<1xf32>
    %244 = vector.shape_cast %243 : vector<1xf32> to vector<1x1xf32>
    %245 = arith.addf %230, %1 : vector<32x32xf32>
    %cst_117 = arith.constant dense<0xFF800000> : vector<32xf32>
    %246 = vector.multi_reduction <maximumf>, %245, %cst_117 [1] : vector<32x32xf32> to vector<32xf32>
    %247 = vector.shape_cast %246 : vector<32xf32> to vector<32x1xf32>
    %cst_118 = arith.constant dense<0xFF800000> : vector<1xf32>
    %248 = vector.multi_reduction <maximumf>, %247, %cst_118 [0] : vector<32x1xf32> to vector<1xf32>
    %249 = vector.shape_cast %248 : vector<1xf32> to vector<1x1xf32>
    %cst_119 = arith.constant 0.899999976 : f32
    %250 = vector.broadcast %cst_119 : f32 to vector<1x1xf32>
    %251 = arith.mulf %249, %250 : vector<1x1xf32>
    %cst_120 = arith.constant 1.27551015E-4 : f32
    %252 = vector.broadcast %cst_120 : f32 to vector<1x1xf32>
    %253 = arith.mulf %239, %252 : vector<1x1xf32>
    %254 = arith.addf %251, %253 : vector<1x1xf32>
    %c4_121 = arith.constant 4 : index
    %c0_122 = arith.constant 0 : index
    %c0_123 = arith.constant 0 : index
    %255 = vector.load %arg7[%c4_121, %c0_122, %c0_123] : memref<8x1x2xf32, #tpu.memory_space<vmem>>, vector<1x1x1xf32>
    %256 = vector.shape_cast %255 : vector<1x1x1xf32> to vector<1x1xf32>
    %257 = vector.shape_cast %254 : vector<1x1xf32> to vector<1x1x1xf32>
    tpu.vector_store %arg7[%c4_121, %c0_122, %c0_123], %257 {strides = array<i32>} : memref<8x1x2xf32, #tpu.memory_space<vmem>>, vector<1x1x1xf32>,
    %cst_124 = arith.constant 0.899999976 : f32
    %258 = vector.broadcast %cst_124 : f32 to vector<1x1xf32>
    %259 = arith.mulf %244, %258 : vector<1x1xf32>
    %cst_125 = arith.constant 1.27551015E-4 : f32
    %260 = vector.broadcast %cst_125 : f32 to vector<1x1xf32>
    %261 = arith.mulf %234, %260 : vector<1x1xf32>
    %262 = arith.addf %259, %261 : vector<1x1xf32>
    %cst_126 = arith.constant 1.000000e+00 : f32
    %263 = vector.broadcast %cst_126 : f32 to vector<1x1xf32>
    %264 = arith.subf %263, %262 : vector<1x1xf32>
    %c4_127 = arith.constant 4 : index
    %c0_128 = arith.constant 0 : index
    %c1_129 = arith.constant 1 : index
    %265 = vector.load %arg7[%c4_127, %c0_128, %c1_129] : memref<8x1x2xf32, #tpu.memory_space<vmem>>, vector<1x1x1xf32>
    %266 = vector.shape_cast %265 : vector<1x1x1xf32> to vector<1x1xf32>
    %267 = vector.shape_cast %264 : vector<1x1xf32> to vector<1x1x1xf32>
    tpu.vector_store %arg7[%c4_127, %c0_128, %c1_129], %267 {strides = array<i32>} : memref<8x1x2xf32, #tpu.memory_space<vmem>>, vector<1x1x1xf32>,
    %c5 = arith.constant 5 : index
    %c0_130 = arith.constant 0 : index
    %c0_131 = arith.constant 0 : index
    %268 = vector.load %arg6[%c5, %c0_130, %c0_131] : memref<8x64x64xi8, #tpu.memory_space<vmem>>, vector<1x64x64xi8>
    %269 = vector.shape_cast %268 : vector<1x64x64xi8> to vector<64x64xi8>
    %270 = arith.sitofp %269 : vector<64x64xi8> to vector<64x64xf32>
    %271 = arith.truncf %270 : vector<64x64xf32> to vector<64x64xbf16>
    %cst_132 = arith.constant dense<0.000000e+00> : vector<32x64xf32>
    %272 = tpu.matmul %2, %271, %cst_132 {dimension_numbers = #tpu.dot_dimension_numbers<[1], [0], [0], [1], [0, 0, 1, 1], [], []>} : vector<32x64xbf16>, vector<64x64xbf16>, vector<32x64xf32> -> vector<32x64xf32>
    %273 = arith.truncf %272 : vector<32x64xf32> to vector<32x64xbf16>
    %cst_133 = arith.constant dense<0.000000e+00> : vector<32x32xf32>
    %274 = tpu.matmul %273, %3, %cst_133 {dimension_numbers = #tpu.dot_dimension_numbers<[1], [0], [0], [1], [0, 0, 1, 1], [], []>} : vector<32x64xbf16>, vector<64x32xbf16>, vector<32x32xf32> -> vector<32x32xf32>
    %cst_134 = arith.constant 5.000000e-01 : f32
    %275 = vector.broadcast %cst_134 : f32 to vector<32x32xf32>
    %276 = arith.cmpf ogt, %274, %275 : vector<32x32xf32>
    %277 = arith.extui %276 : vector<32x32xi1> to vector<32x32xi32>
    %278 = arith.sitofp %277 : vector<32x32xi32> to vector<32x32xf32>
    %279 = vector.extract_strided_slice %7 {offsets = [5, 0, 0], sizes = [1, 32, 32], strides = [1, 1, 1]} : vector<8x32x32xf32> to vector<1x32x32xf32>
    %280 = vector.shape_cast %279 : vector<1x32x32xf32> to vector<32x32xf32>
    %281 = arith.mulf %280, %278 : vector<32x32xf32>
    %282 = arith.subf %280, %281 : vector<32x32xf32>
    %cst_135 = arith.constant dense<0.000000e+00> : vector<32xf32>
    %283 = vector.multi_reduction <add>, %281, %cst_135 [1] : vector<32x32xf32> to vector<32xf32>
    %284 = vector.shape_cast %283 : vector<32xf32> to vector<32x1xf32>
    %cst_136 = arith.constant dense<0.000000e+00> : vector<1xf32>
    %285 = vector.multi_reduction <add>, %284, %cst_136 [0] : vector<32x1xf32> to vector<1xf32>
    %286 = vector.shape_cast %285 : vector<1xf32> to vector<1x1xf32>
    %cst_137 = arith.constant dense<0.000000e+00> : vector<32xf32>
    %287 = vector.multi_reduction <add>, %280, %cst_137 [1] : vector<32x32xf32> to vector<32xf32>
    %288 = vector.shape_cast %287 : vector<32xf32> to vector<32x1xf32>
    %cst_138 = arith.constant dense<0.000000e+00> : vector<1xf32>
    %289 = vector.multi_reduction <add>, %288, %cst_138 [0] : vector<32x1xf32> to vector<1xf32>
    %290 = vector.shape_cast %289 : vector<1xf32> to vector<1x1xf32>
    %291 = arith.subf %290, %286 : vector<1x1xf32>
    %292 = arith.addf %281, %1 : vector<32x32xf32>
    %cst_139 = arith.constant dense<0xFF800000> : vector<32xf32>
    %293 = vector.multi_reduction <maximumf>, %292, %cst_139 [1] : vector<32x32xf32> to vector<32xf32>
    %294 = vector.shape_cast %293 : vector<32xf32> to vector<32x1xf32>
    %cst_140 = arith.constant dense<0xFF800000> : vector<1xf32>
    %295 = vector.multi_reduction <maximumf>, %294, %cst_140 [0] : vector<32x1xf32> to vector<1xf32>
    %296 = vector.shape_cast %295 : vector<1xf32> to vector<1x1xf32>
    %297 = arith.addf %282, %1 : vector<32x32xf32>
    %cst_141 = arith.constant dense<0xFF800000> : vector<32xf32>
    %298 = vector.multi_reduction <maximumf>, %297, %cst_141 [1] : vector<32x32xf32> to vector<32xf32>
    %299 = vector.shape_cast %298 : vector<32xf32> to vector<32x1xf32>
    %cst_142 = arith.constant dense<0xFF800000> : vector<1xf32>
    %300 = vector.multi_reduction <maximumf>, %299, %cst_142 [0] : vector<32x1xf32> to vector<1xf32>
    %301 = vector.shape_cast %300 : vector<1xf32> to vector<1x1xf32>
    %cst_143 = arith.constant 0.899999976 : f32
    %302 = vector.broadcast %cst_143 : f32 to vector<1x1xf32>
    %303 = arith.mulf %301, %302 : vector<1x1xf32>
    %cst_144 = arith.constant 1.27551015E-4 : f32
    %304 = vector.broadcast %cst_144 : f32 to vector<1x1xf32>
    %305 = arith.mulf %291, %304 : vector<1x1xf32>
    %306 = arith.addf %303, %305 : vector<1x1xf32>
    %c5_145 = arith.constant 5 : index
    %c0_146 = arith.constant 0 : index
    %c0_147 = arith.constant 0 : index
    %307 = vector.load %arg7[%c5_145, %c0_146, %c0_147] : memref<8x1x2xf32, #tpu.memory_space<vmem>>, vector<1x1x1xf32>
    %308 = vector.shape_cast %307 : vector<1x1x1xf32> to vector<1x1xf32>
    %309 = vector.shape_cast %306 : vector<1x1xf32> to vector<1x1x1xf32>
    tpu.vector_store %arg7[%c5_145, %c0_146, %c0_147], %309 {strides = array<i32>} : memref<8x1x2xf32, #tpu.memory_space<vmem>>, vector<1x1x1xf32>,
    %cst_148 = arith.constant 0.899999976 : f32
    %310 = vector.broadcast %cst_148 : f32 to vector<1x1xf32>
    %311 = arith.mulf %296, %310 : vector<1x1xf32>
    %cst_149 = arith.constant 1.27551015E-4 : f32
    %312 = vector.broadcast %cst_149 : f32 to vector<1x1xf32>
    %313 = arith.mulf %286, %312 : vector<1x1xf32>
    %314 = arith.addf %311, %313 : vector<1x1xf32>
    %cst_150 = arith.constant 1.000000e+00 : f32
    %315 = vector.broadcast %cst_150 : f32 to vector<1x1xf32>
    %316 = arith.subf %315, %314 : vector<1x1xf32>
    %c5_151 = arith.constant 5 : index
    %c0_152 = arith.constant 0 : index
    %c1_153 = arith.constant 1 : index
    %317 = vector.load %arg7[%c5_151, %c0_152, %c1_153] : memref<8x1x2xf32, #tpu.memory_space<vmem>>, vector<1x1x1xf32>
    %318 = vector.shape_cast %317 : vector<1x1x1xf32> to vector<1x1xf32>
    %319 = vector.shape_cast %316 : vector<1x1xf32> to vector<1x1x1xf32>
    tpu.vector_store %arg7[%c5_151, %c0_152, %c1_153], %319 {strides = array<i32>} : memref<8x1x2xf32, #tpu.memory_space<vmem>>, vector<1x1x1xf32>,
    %c6 = arith.constant 6 : index
    %c0_154 = arith.constant 0 : index
    %c0_155 = arith.constant 0 : index
    %320 = vector.load %arg6[%c6, %c0_154, %c0_155] : memref<8x64x64xi8, #tpu.memory_space<vmem>>, vector<1x64x64xi8>
    %321 = vector.shape_cast %320 : vector<1x64x64xi8> to vector<64x64xi8>
    %322 = arith.sitofp %321 : vector<64x64xi8> to vector<64x64xf32>
    %323 = arith.truncf %322 : vector<64x64xf32> to vector<64x64xbf16>
    %cst_156 = arith.constant dense<0.000000e+00> : vector<32x64xf32>
    %324 = tpu.matmul %2, %323, %cst_156 {dimension_numbers = #tpu.dot_dimension_numbers<[1], [0], [0], [1], [0, 0, 1, 1], [], []>} : vector<32x64xbf16>, vector<64x64xbf16>, vector<32x64xf32> -> vector<32x64xf32>
    %325 = arith.truncf %324 : vector<32x64xf32> to vector<32x64xbf16>
    %cst_157 = arith.constant dense<0.000000e+00> : vector<32x32xf32>
    %326 = tpu.matmul %325, %3, %cst_157 {dimension_numbers = #tpu.dot_dimension_numbers<[1], [0], [0], [1], [0, 0, 1, 1], [], []>} : vector<32x64xbf16>, vector<64x32xbf16>, vector<32x32xf32> -> vector<32x32xf32>
    %cst_158 = arith.constant 5.000000e-01 : f32
    %327 = vector.broadcast %cst_158 : f32 to vector<32x32xf32>
    %328 = arith.cmpf ogt, %326, %327 : vector<32x32xf32>
    %329 = arith.extui %328 : vector<32x32xi1> to vector<32x32xi32>
    %330 = arith.sitofp %329 : vector<32x32xi32> to vector<32x32xf32>
    %331 = vector.extract_strided_slice %7 {offsets = [6, 0, 0], sizes = [1, 32, 32], strides = [1, 1, 1]} : vector<8x32x32xf32> to vector<1x32x32xf32>
    %332 = vector.shape_cast %331 : vector<1x32x32xf32> to vector<32x32xf32>
    %333 = arith.mulf %332, %330 : vector<32x32xf32>
    %334 = arith.subf %332, %333 : vector<32x32xf32>
    %cst_159 = arith.constant dense<0.000000e+00> : vector<32xf32>
    %335 = vector.multi_reduction <add>, %333, %cst_159 [1] : vector<32x32xf32> to vector<32xf32>
    %336 = vector.shape_cast %335 : vector<32xf32> to vector<32x1xf32>
    %cst_160 = arith.constant dense<0.000000e+00> : vector<1xf32>
    %337 = vector.multi_reduction <add>, %336, %cst_160 [0] : vector<32x1xf32> to vector<1xf32>
    %338 = vector.shape_cast %337 : vector<1xf32> to vector<1x1xf32>
    %cst_161 = arith.constant dense<0.000000e+00> : vector<32xf32>
    %339 = vector.multi_reduction <add>, %332, %cst_161 [1] : vector<32x32xf32> to vector<32xf32>
    %340 = vector.shape_cast %339 : vector<32xf32> to vector<32x1xf32>
    %cst_162 = arith.constant dense<0.000000e+00> : vector<1xf32>
    %341 = vector.multi_reduction <add>, %340, %cst_162 [0] : vector<32x1xf32> to vector<1xf32>
    %342 = vector.shape_cast %341 : vector<1xf32> to vector<1x1xf32>
    %343 = arith.subf %342, %338 : vector<1x1xf32>
    %344 = arith.addf %333, %1 : vector<32x32xf32>
    %cst_163 = arith.constant dense<0xFF800000> : vector<32xf32>
    %345 = vector.multi_reduction <maximumf>, %344, %cst_163 [1] : vector<32x32xf32> to vector<32xf32>
    %346 = vector.shape_cast %345 : vector<32xf32> to vector<32x1xf32>
    %cst_164 = arith.constant dense<0xFF800000> : vector<1xf32>
    %347 = vector.multi_reduction <maximumf>, %346, %cst_164 [0] : vector<32x1xf32> to vector<1xf32>
    %348 = vector.shape_cast %347 : vector<1xf32> to vector<1x1xf32>
    %349 = arith.addf %334, %1 : vector<32x32xf32>
    %cst_165 = arith.constant dense<0xFF800000> : vector<32xf32>
    %350 = vector.multi_reduction <maximumf>, %349, %cst_165 [1] : vector<32x32xf32> to vector<32xf32>
    %351 = vector.shape_cast %350 : vector<32xf32> to vector<32x1xf32>
    %cst_166 = arith.constant dense<0xFF800000> : vector<1xf32>
    %352 = vector.multi_reduction <maximumf>, %351, %cst_166 [0] : vector<32x1xf32> to vector<1xf32>
    %353 = vector.shape_cast %352 : vector<1xf32> to vector<1x1xf32>
    %cst_167 = arith.constant 0.899999976 : f32
    %354 = vector.broadcast %cst_167 : f32 to vector<1x1xf32>
    %355 = arith.mulf %353, %354 : vector<1x1xf32>
    %cst_168 = arith.constant 1.27551015E-4 : f32
    %356 = vector.broadcast %cst_168 : f32 to vector<1x1xf32>
    %357 = arith.mulf %343, %356 : vector<1x1xf32>
    %358 = arith.addf %355, %357 : vector<1x1xf32>
    %c6_169 = arith.constant 6 : index
    %c0_170 = arith.constant 0 : index
    %c0_171 = arith.constant 0 : index
    %359 = vector.load %arg7[%c6_169, %c0_170, %c0_171] : memref<8x1x2xf32, #tpu.memory_space<vmem>>, vector<1x1x1xf32>
    %360 = vector.shape_cast %359 : vector<1x1x1xf32> to vector<1x1xf32>
    %361 = vector.shape_cast %358 : vector<1x1xf32> to vector<1x1x1xf32>
    tpu.vector_store %arg7[%c6_169, %c0_170, %c0_171], %361 {strides = array<i32>} : memref<8x1x2xf32, #tpu.memory_space<vmem>>, vector<1x1x1xf32>,
    %cst_172 = arith.constant 0.899999976 : f32
    %362 = vector.broadcast %cst_172 : f32 to vector<1x1xf32>
    %363 = arith.mulf %348, %362 : vector<1x1xf32>
    %cst_173 = arith.constant 1.27551015E-4 : f32
    %364 = vector.broadcast %cst_173 : f32 to vector<1x1xf32>
    %365 = arith.mulf %338, %364 : vector<1x1xf32>
    %366 = arith.addf %363, %365 : vector<1x1xf32>
    %cst_174 = arith.constant 1.000000e+00 : f32
    %367 = vector.broadcast %cst_174 : f32 to vector<1x1xf32>
    %368 = arith.subf %367, %366 : vector<1x1xf32>
    %c6_175 = arith.constant 6 : index
    %c0_176 = arith.constant 0 : index
    %c1_177 = arith.constant 1 : index
    %369 = vector.load %arg7[%c6_175, %c0_176, %c1_177] : memref<8x1x2xf32, #tpu.memory_space<vmem>>, vector<1x1x1xf32>
    %370 = vector.shape_cast %369 : vector<1x1x1xf32> to vector<1x1xf32>
    %371 = vector.shape_cast %368 : vector<1x1xf32> to vector<1x1x1xf32>
    tpu.vector_store %arg7[%c6_175, %c0_176, %c1_177], %371 {strides = array<i32>} : memref<8x1x2xf32, #tpu.memory_space<vmem>>, vector<1x1x1xf32>,
    %c7 = arith.constant 7 : index
    %c0_178 = arith.constant 0 : index
    %c0_179 = arith.constant 0 : index
    %372 = vector.load %arg6[%c7, %c0_178, %c0_179] : memref<8x64x64xi8, #tpu.memory_space<vmem>>, vector<1x64x64xi8>
    %373 = vector.shape_cast %372 : vector<1x64x64xi8> to vector<64x64xi8>
    %374 = arith.sitofp %373 : vector<64x64xi8> to vector<64x64xf32>
    %375 = arith.truncf %374 : vector<64x64xf32> to vector<64x64xbf16>
    %cst_180 = arith.constant dense<0.000000e+00> : vector<32x64xf32>
    %376 = tpu.matmul %2, %375, %cst_180 {dimension_numbers = #tpu.dot_dimension_numbers<[1], [0], [0], [1], [0, 0, 1, 1], [], []>} : vector<32x64xbf16>, vector<64x64xbf16>, vector<32x64xf32> -> vector<32x64xf32>
    %377 = arith.truncf %376 : vector<32x64xf32> to vector<32x64xbf16>
    %cst_181 = arith.constant dense<0.000000e+00> : vector<32x32xf32>
    %378 = tpu.matmul %377, %3, %cst_181 {dimension_numbers = #tpu.dot_dimension_numbers<[1], [0], [0], [1], [0, 0, 1, 1], [], []>} : vector<32x64xbf16>, vector<64x32xbf16>, vector<32x32xf32> -> vector<32x32xf32>
    %cst_182 = arith.constant 5.000000e-01 : f32
    %379 = vector.broadcast %cst_182 : f32 to vector<32x32xf32>
    %380 = arith.cmpf ogt, %378, %379 : vector<32x32xf32>
    %381 = arith.extui %380 : vector<32x32xi1> to vector<32x32xi32>
    %382 = arith.sitofp %381 : vector<32x32xi32> to vector<32x32xf32>
    %383 = vector.extract_strided_slice %7 {offsets = [7, 0, 0], sizes = [1, 32, 32], strides = [1, 1, 1]} : vector<8x32x32xf32> to vector<1x32x32xf32>
    %384 = vector.shape_cast %383 : vector<1x32x32xf32> to vector<32x32xf32>
    %385 = arith.mulf %384, %382 : vector<32x32xf32>
    %386 = arith.subf %384, %385 : vector<32x32xf32>
    %cst_183 = arith.constant dense<0.000000e+00> : vector<32xf32>
    %387 = vector.multi_reduction <add>, %385, %cst_183 [1] : vector<32x32xf32> to vector<32xf32>
    %388 = vector.shape_cast %387 : vector<32xf32> to vector<32x1xf32>
    %cst_184 = arith.constant dense<0.000000e+00> : vector<1xf32>
    %389 = vector.multi_reduction <add>, %388, %cst_184 [0] : vector<32x1xf32> to vector<1xf32>
    %390 = vector.shape_cast %389 : vector<1xf32> to vector<1x1xf32>
    %cst_185 = arith.constant dense<0.000000e+00> : vector<32xf32>
    %391 = vector.multi_reduction <add>, %384, %cst_185 [1] : vector<32x32xf32> to vector<32xf32>
    %392 = vector.shape_cast %391 : vector<32xf32> to vector<32x1xf32>
    %cst_186 = arith.constant dense<0.000000e+00> : vector<1xf32>
    %393 = vector.multi_reduction <add>, %392, %cst_186 [0] : vector<32x1xf32> to vector<1xf32>
    %394 = vector.shape_cast %393 : vector<1xf32> to vector<1x1xf32>
    %395 = arith.subf %394, %390 : vector<1x1xf32>
    %396 = arith.addf %385, %1 : vector<32x32xf32>
    %cst_187 = arith.constant dense<0xFF800000> : vector<32xf32>
    %397 = vector.multi_reduction <maximumf>, %396, %cst_187 [1] : vector<32x32xf32> to vector<32xf32>
    %398 = vector.shape_cast %397 : vector<32xf32> to vector<32x1xf32>
    %cst_188 = arith.constant dense<0xFF800000> : vector<1xf32>
    %399 = vector.multi_reduction <maximumf>, %398, %cst_188 [0] : vector<32x1xf32> to vector<1xf32>
    %400 = vector.shape_cast %399 : vector<1xf32> to vector<1x1xf32>
    %401 = arith.addf %386, %1 : vector<32x32xf32>
    %cst_189 = arith.constant dense<0xFF800000> : vector<32xf32>
    %402 = vector.multi_reduction <maximumf>, %401, %cst_189 [1] : vector<32x32xf32> to vector<32xf32>
    %403 = vector.shape_cast %402 : vector<32xf32> to vector<32x1xf32>
    %cst_190 = arith.constant dense<0xFF800000> : vector<1xf32>
    %404 = vector.multi_reduction <maximumf>, %403, %cst_190 [0] : vector<32x1xf32> to vector<1xf32>
    %405 = vector.shape_cast %404 : vector<1xf32> to vector<1x1xf32>
    %cst_191 = arith.constant 0.899999976 : f32
    %406 = vector.broadcast %cst_191 : f32 to vector<1x1xf32>
    %407 = arith.mulf %405, %406 : vector<1x1xf32>
    %cst_192 = arith.constant 1.27551015E-4 : f32
    %408 = vector.broadcast %cst_192 : f32 to vector<1x1xf32>
    %409 = arith.mulf %395, %408 : vector<1x1xf32>
    %410 = arith.addf %407, %409 : vector<1x1xf32>
    %c7_193 = arith.constant 7 : index
    %c0_194 = arith.constant 0 : index
    %c0_195 = arith.constant 0 : index
    %411 = vector.load %arg7[%c7_193, %c0_194, %c0_195] : memref<8x1x2xf32, #tpu.memory_space<vmem>>, vector<1x1x1xf32>
    %412 = vector.shape_cast %411 : vector<1x1x1xf32> to vector<1x1xf32>
    %413 = vector.shape_cast %410 : vector<1x1xf32> to vector<1x1x1xf32>
    tpu.vector_store %arg7[%c7_193, %c0_194, %c0_195], %413 {strides = array<i32>} : memref<8x1x2xf32, #tpu.memory_space<vmem>>, vector<1x1x1xf32>,
    %cst_196 = arith.constant 0.899999976 : f32
    %414 = vector.broadcast %cst_196 : f32 to vector<1x1xf32>
    %415 = arith.mulf %400, %414 : vector<1x1xf32>
    %cst_197 = arith.constant 1.27551015E-4 : f32
    %416 = vector.broadcast %cst_197 : f32 to vector<1x1xf32>
    %417 = arith.mulf %390, %416 : vector<1x1xf32>
    %418 = arith.addf %415, %417 : vector<1x1xf32>
    %cst_198 = arith.constant 1.000000e+00 : f32
    %419 = vector.broadcast %cst_198 : f32 to vector<1x1xf32>
    %420 = arith.subf %419, %418 : vector<1x1xf32>
    %c7_199 = arith.constant 7 : index
    %c0_200 = arith.constant 0 : index
    %c1_201 = arith.constant 1 : index
    %421 = vector.load %arg7[%c7_199, %c0_200, %c1_201] : memref<8x1x2xf32, #tpu.memory_space<vmem>>, vector<1x1x1xf32>
    %422 = vector.shape_cast %421 : vector<1x1x1xf32> to vector<1x1xf32>
    %423 = vector.shape_cast %420 : vector<1x1xf32> to vector<1x1x1xf32>
    tpu.vector_store %arg7[%c7_199, %c0_200, %c1_201], %423 {strides = array<i32>} : memref<8x1x2xf32, #tpu.memory_space<vmem>>, vector<1x1x1xf32>,
    return
  }
  func.func @transform_0(%arg0: i32) -> (i32, i32) {
    %c0_i32 = arith.constant 0 : i32
    %c0_i32_0 = arith.constant 0 : i32
    %c0_i32_1 = arith.constant 0 : i32
    return %c0_i32, %c0_i32_0 : i32, i32
  }
  func.func @transform_1(%arg0: i32) -> (i32, i32) {
    %c0_i32 = arith.constant 0 : i32
    %c0_i32_0 = arith.constant 0 : i32
    %c0_i32_1 = arith.constant 0 : i32
    return %c0_i32, %c0_i32_0 : i32, i32
  }
  func.func @transform_2(%arg0: i32) -> (i32, i32) {
    %c0_i32 = arith.constant 0 : i32
    %c0_i32_0 = arith.constant 0 : i32
    %c0_i32_1 = arith.constant 0 : i32
    return %c0_i32, %c0_i32_0 : i32, i32
  }
  func.func @transform_3(%arg0: i32) -> (i32, i32) {
    %c0_i32 = arith.constant 0 : i32
    %c0_i32_0 = arith.constant 0 : i32
    %c0_i32_1 = arith.constant 0 : i32
    return %c0_i32, %c0_i32_0 : i32, i32
  }
  func.func @transform_4(%arg0: i32) -> (i32, i32, i32) {
    %c0_i32 = arith.constant 0 : i32
    %c0_i32_0 = arith.constant 0 : i32
    %c0_i32_1 = arith.constant 0 : i32
    return %arg0, %c0_i32, %c0_i32_0 : i32, i32, i32
  }
  func.func @transform_5(%arg0: i32) -> (i32, i32, i32) {
    %c0_i32 = arith.constant 0 : i32
    %c0_i32_0 = arith.constant 0 : i32
    %c0_i32_1 = arith.constant 0 : i32
    return %arg0, %c0_i32, %c0_i32_0 : i32, i32, i32
  }
  func.func @transform_6(%arg0: i32) -> (i32, i32, i32) {
    %c0_i32 = arith.constant 0 : i32
    %c0_i32_0 = arith.constant 0 : i32
    %c0_i32_1 = arith.constant 0 : i32
    return %arg0, %c0_i32, %c0_i32_0 : i32, i32, i32
  }
}

</mosaic_0001>

<bundles_post_ra>
// kernel: mask_loss.1
= control target key start
LH: loop header
LB: loop body
LE: loop exit
PB: predicated region body
PF: predicated region fallthrough
CT: control target
= control target key end

     0   :  { %11 = vsyncpa [#allocation3], 0  ;;  %s4044_s0 = inlined_call_operand.vmem [shape: f32[32,32], index: 0, kind: input, shape index: {}]   ;;  %s4045_s1 = inlined_call_operand.vmem [shape: f32[32,32], index: 1, kind: input, shape index: {}]   ;;  %s4046_s2 = inlined_call_operand.vmem [shape: bf16[32,64], index: 2, kind: input, shape index: {}]   ;;  %s4047_s3 = inlined_call_operand.vmem [shape: bf16[64,32], index: 3, kind: input, shape index: {}]   ;;  %s4048_s4 = inlined_call_operand.hbm [shape: f32[16,32,32], index: 4, kind: input, shape index: {}]   ;;  %s4049_s5 = inlined_call_operand.hbm [shape: s8[16,64,64], index: 5, kind: input, shape index: {}]   ;;  %s4050_s6 = inlined_call_operand.vmem [shape: f32[16,1,2], index: 6, kind: output, shape index: {}]  }
   0x1   :  { %13 = vsyncpa [#allocation3 + $0x1], 0 }
   0x2   :  { %14 = vsyncpa [#allocation5], 0 }
   0x3   :  { %16 = vsyncpa [#allocation5 + $0x1], 0  ;;  %s3017_s21 = smov 0   ;;  %s3019_s22 = smov 0  }
   0x4   :  { %s3021_s23 = smov 0   ;;  %s3023_s24 = smov 0  }
   0x5 LB: > { %s2414_s25 = sadd.s32 4294967295, %s2975_s24   ;;  %s3037_s26 = sadd.s32 1, %s2975_s24   ;;  %s2975_s24 = sphi %s3023_s24, %s4073_s24   ;;  %s2971_s23 = sphi %s3021_s23, %s4072_s23   ;;  %s2967_s22 = sphi %s3019_s22, %s4071_s22   ;;  %s2963_s21 = sphi %s3017_s21, %s4070_s21  }
   0x6   : > { %s110_s27 = ssub.s32 %s2975_s24, %s3037_s26  ;;  %s113_s28 = sadd.s32 1, %s2971_s23 }
   0x7   : > { %p111_p0 = scmp.eq.s32.totalorder %s110_s27, 0  ;;  %p120_p1 = scmp.ne.s32.totalorder %s2971_s23, %s2967_s22 }
   0x8   : > { %p121_p2 = scmp.eq.s32.totalorder %s2975_s24, 0  ;;  %p126_p3 = scmp.ne.s32.totalorder %s2967_s22, %s2963_s21 }
   0x9   : > { %s3047_s29 = scalar_select %p111_p0, %s2971_s23, %s113_s28  }
   0xa   : > { %p122_p4 = por %p121_p2, %p120_p1  ;;  %p127_p5 = scmp.eq.s32.totalorder %s2414_s25, 0 }
   0xb   : > { %p2833_p6 = scmp.lt.s32.totalorder %s2975_s24, 2  ;;  %s3057_s7 = sand.u32 1, %s2971_s23  }
   0xc   : > { %p3052_p7 = por %p127_p5, %p126_p3  ;;  %s2418_s8 = sshll.u32 %s3057_s7, 8 }
   0xd   : > { %s2531_s9 = sshll.u32 %s2975_s24, 12  ;;  %s218_s13 = scalar_lea.vmem [#allocation2], %s2418_s8 }
   0xe   : > { %s4054_s30 = scalar_select %p3052_p7, 1, 0 }
   0xf   : > { %s3064_s12 = scalar_lea.hbm %s4048_s4, %s2531_s9  ;;  %s226_s14 = sshll.u32 %s218_s13, 4  ;;  %s3066_s14 = int_to_ptr.vmem [resolvable:$true] %s226_s14 }
  0x10   : > { %p3068_p8 = pnand %p2833_p6, %p122_p4  ;;  %s215_s16 = scalar_lea.sflag [#allocation3], %s3057_s7 }
  0x11   : > { %s2877_s17 = scalar_lea.hbm %s3064_s12, 4096  ;;  %s2882_s20 = scalar_lea.hbm %s4048_s4, 8192 }
  0x12   : > { %p2878_p10 = scmp.ne.s32.totalorder %s3064_s12, %s2877_s17  ;;  %p2879_p11 = pneg %p3068_p8 }
  0x13   : > { %p2883_p0 = scmp.lt.u32.totalorder %s3064_s12, %s4048_s4  ;;  %p2884_p1 = scmp.lt.u32.totalorder %s2882_s20, %s2877_s17 }
  0x14   : > { %p2880_p12 = pnand %p2879_p11, %p2878_p10  ;;  %p2886_p3 = scmp.lt.u32.totalorder %s2877_s17, %s3064_s12 }
  0x15   : > { %p2885_p2 = por %p2884_p1, %p2883_p0 }
  0x16   : > { %p2881_p13 = pneg %p2880_p12 }
  0x17   : > { %p2887_p4 = por %p2886_p3, %p2885_p2 }
  0x19   : > { %p2888_p5 = pnand %p2887_p4, %p2881_p13 }
  0x1b   : > { %2891 = shalt.err (!%p2888_p5)
}
  0x1c   : > { %s2892_s28 = scalar_lea.vmem %s3066_s14, 4096  ;;  %s2977_s8 = smov [#allocation2]  }
  0x1d   : > { %p2893_p6 = scmp.ne.s32.totalorder %s3066_s14, %s2892_s28  ;;  %s2897_s9 = sshll.u32 %s2977_s8, 4  ;;  %s2898_s9 = int_to_ptr.vmem [resolvable:$false] %s2897_s9 }
  0x1e   : > { %s2899_s10 = scalar_lea.vmem %s2898_s9, 8192  ;;  %p2900_p9 = scmp.lt.s32.totalorder %s3066_s14, %s2898_s9 }
  0x1f   : > { %p2895_p10 = pnand %p2893_p6, %p2879_p11  ;;  %p2901_p0 = scmp.lt.s32.totalorder %s2899_s10, %s2892_s28 }
  0x21   : > { %p2896_p12 = pneg %p2895_p10  ;;  %p2902_p1 = por %p2901_p0, %p2900_p9 }
  0x23   : > { %p2903_p2 = pnand %p2902_p1, %p2896_p12 }
  0x25   : > { %2906 = shalt.err (!%p2903_p2)
}
  0x26   : > { %s2978_s11 = smov 128   ;;  %s2979_s13 = smov 8  }
  0x27   : > { %2829 = dma.hbm_to_vmem [thread:$0]  (!%p3068_p8), %s3064_s12, 4096, %s3066_s14, %s215_s16, %s2978_s11, %s2978_s11, %s2979_s13  }
  0x28   : > { %p256_p9 = scmp.lt.s32.totalorder %s2975_s24, 3  ;;  %s2422_s17 = sshll.u32 %s3057_s7, 7 }
  0x29   : > { %s2533_s18 = sshll.u32 %s2975_s24, 11  ;;  %p4056_p13 = scmp.ge.s32.totalorder %s2975_s24, 1 }
  0x2a   : > { %s3116_s27 = scalar_lea.hbm %s4049_s5, %s2533_s18  ;;  %s240_s28 = scalar_lea.vmem [#allocation4], %s2422_s17 }
  0x2b   : > { %p3109_p3 = pnand %p4056_p13, %p256_p9  ;;  %s248_s8 = sshll.u32 %s240_s28, 4  ;;  %s3118_s8 = int_to_ptr.vmem [resolvable:$true] %s248_s8 }
  0x2c   : > { %s237_s12 = scalar_lea.sflag [#allocation5], %s3057_s7  ;;  %s2907_s14 = scalar_lea.hbm %s3116_s27, 2048 }
  0x2d   : > { %p2908_p4 = scmp.ne.s32.totalorder %s3116_s27, %s2907_s14  ;;  %s2912_s10 = scalar_lea.hbm %s4049_s5, 4096 }
  0x2e   : > { %p2913_p10 = scmp.lt.u32.totalorder %s3116_s27, %s4049_s5  ;;  %p2914_p12 = scmp.lt.u32.totalorder %s2912_s10, %s2907_s14 }
  0x2f   : > { %p2910_p5 = pnand %p2908_p4, %p2879_p11  ;;  %p2916_p1 = scmp.lt.u32.totalorder %s2907_s14, %s3116_s27 }
  0x30   : > { %p2915_p0 = por %p2914_p12, %p2913_p10 }
  0x31   : > { %p2911_p6 = pneg %p2910_p5 }
  0x32   : > { %p2917_p2 = por %p2916_p1, %p2915_p0 }
  0x34   : > { %p2918_p9 = pnand %p2917_p2, %p2911_p6 }
  0x36   : > { %2921 = shalt.err (!%p2918_p9)
}
  0x37   : > { %s2922_s17 = scalar_lea.vmem %s3118_s8, 2048  ;;  %s2980_s21 = smov [#allocation4]  }
  0x38   : > { %p2923_p13 = scmp.ne.s32.totalorder %s3118_s8, %s2922_s17  ;;  %s2927_s28 = sshll.u32 %s2980_s21, 4  ;;  %s2928_s28 = int_to_ptr.vmem [resolvable:$false] %s2927_s28 }
  0x39   : > { %s2929_s16 = scalar_lea.vmem %s2928_s28, 4096  ;;  %p2930_p7 = scmp.lt.s32.totalorder %s3118_s8, %s2928_s28 }
  0x3a   : > { %p2925_p4 = pnand %p2923_p13, %p2879_p11  ;;  %p2931_p10 = scmp.lt.s32.totalorder %s2929_s16, %s2922_s17 }
  0x3c   : > { %p2926_p5 = pneg %p2925_p4  ;;  %p2932_p12 = por %p2931_p10, %p2930_p7 }
  0x3e   : > { %p2933_p0 = pnand %p2932_p12, %p2926_p5 }
  0x40   : > { %2936 = shalt.err (!%p2933_p0)
}
  0x41   : > { %2832 = dma.hbm_to_vmem [thread:$0]  (!%p3068_p8), %s3116_s27, 2048, %s3118_s8, %s237_s12, %s2978_s11, %s2978_s11, %s2979_s13  }
  0x42   : > { %260 = sbr.rel (%p3109_p3) target bundleno = 899 (0x383), region = 44 }
  0x49   : > { %s262_s14 = sand.u32 1, %s2967_s22   ;;  %p4058_p7 = scmp.ne.s32.totalorder %s4054_s30, 0 }
  0x4a   : > { %s2427_s9 = sshll.u32 %s262_s14, 8  ;;  %s263_s10 = scalar_lea.sflag [#allocation3], %s262_s14 }
  0x4b   : > { %s3152_s18 = scalar_lea.vmem [#allocation2], %s2427_s9 }
  0x4c   : > { %2954 = dma.done.wait (%p4058_p7), %s263_s10, 4096  }
  0x4d   : > { %2956 = vsyncadd (%p4058_p7), %s263_s10, 4294963200  ;;  %s2428_s7 = sshll.u32 %s262_s14, 7  ;;  %s272_s15 = scalar_lea.sflag [#allocation5], %s262_s14 }
  0x4e   : > { %s3158_s20 = scalar_lea.vmem [#allocation4], %s2428_s7 }
  0x4f   : > { %2958 = dma.done.wait (%p4058_p7), %s272_s15, 2048  }
  0x50   : > { %2960 = vsyncadd (%p4058_p7), %s272_s15, 4294965248  ;;  %v400_v0 = vld [vmem:[%s3158_s20] sm:$0xff]  ;;  %vm416_vm0 = vcmask 523264   ;;  %v401_v4 = vld [vmem:[%s3158_s20 + $0x8] sm:$0xff]  ;;  %vm573_vm1 = vcmask 261120   ;;  %s3932_s16 = sshll.u32 %s2414_s25, 3 }
  0x51   : > { %v402_v1 = vunpack.c.l.s8.bf16 %v400_v0  ;;  %v403_v2 = vunpack.c.h.s8.bf16 %v400_v0  ;;  %v3168_v3 = vld [vmem:[%s4046_s2] sm:$0xff]   ;;  %v404_v5 = vunpack.c.l.s8.bf16 %v401_v4  ;;  %v405_v7 = vunpack.c.h.s8.bf16 %v401_v4  ;;  %v3181_v8 = vld [vmem:[%s4047_s3 + $0x8] sm:$0xff]   ;;  %v2444_v9 = vld [vmem:[%s3158_s20 + $0x10] sm:$0xff]  ;;  %p311_p8 = scmp.lt.s32.totalorder %s3932_s16, 15 }
  0x52   : > { %2638 = vmatprep.mubr.msk.bf16.mxu0 %vm416_vm0, %v3168_v3  ;;  %v3176_v6 = vld [vmem:[%s4047_s3] sm:$0xff]   ;;  %v3190_v10 = vld [vmem:[%s4047_s3 + $0x10] sm:$0xff]   ;;  %v681_v11 = vunpack.c.l.s8.bf16 %v2444_v9  ;;  %v3195_v12 = vld [vmem:[%s4046_s2 + $0x8] sm:$0xff]   ;;  %v682_v13 = vunpack.c.h.s8.bf16 %v2444_v9 }
  0x53   : > { %2630 = vmatprep.subr.bf16.mxu0 %v402_v1  ;;  %2642 = vmatprep.subr.bf16.mxu1 %v3176_v6  ;;  %v2445_v14 = vld [vmem:[%s3158_s20 + $0x18] sm:$0xff]  ;;  %v2456_v17 = vld [vmem:[%s3158_s20 + $0x20] sm:$0xff]  ;;  %v2457_v20 = vld [vmem:[%s3158_s20 + $0x28] sm:$0xff]  ;;  %s4075_s16 = smov (!%p311_p8, %s3932_s16), 15 }
  0x54   : > { %2631 = vmatpush3.bf16.msra.mxu0 %v402_v1  ;;  %2643 = vmatpush3.bf16.msra.mxu1 %v3176_v6  ;;  %v683_v15 = vunpack.c.l.s8.bf16 %v2445_v14  ;;  %v684_v16 = vunpack.c.h.s8.bf16 %v2445_v14  ;;  %v917_v18 = vunpack.c.l.s8.bf16 %v2456_v17  ;;  %v918_v19 = vunpack.c.h.s8.bf16 %v2456_v17  ;;  %v2468_v23 = vld [vmem:[%s3158_s20 + $0x30] sm:$0xff]  ;;  %v2469_v26 = vld [vmem:[%s3158_s20 + $0x38] sm:$0xff]  ;;  %v2480_v29 = vld [vmem:[%s3158_s20 + $0x40] sm:$0xff]  ;;  %s3954_s14 = scalar_lea.vmem %s4050_s6, %s4075_s16 }
  0x55   : > { %2632 = vmatprep.subr.bf16.mxu0 %v403_v2  ;;  %2644 = vmatprep.subr.bf16.mxu1 %v3181_v8  ;;  %v919_v21 = vunpack.c.l.s8.bf16 %v2457_v20  ;;  %v920_v22 = vunpack.c.h.s8.bf16 %v2457_v20  ;;  %v1153_v24 = vunpack.c.l.s8.bf16 %v2468_v23  ;;  %v1154_v25 = vunpack.c.h.s8.bf16 %v2468_v23  ;;  %v2481_v32 = vld [vmem:[%s3158_s20 + $0x48] sm:$0xff]  ;;  %v2492_v35 = vld [vmem:[%s3158_s20 + $0x50] sm:$0xff]  ;;  %v2493_v38 = vld [vmem:[%s3158_s20 + $0x58] sm:$0xff] }
  0x56   : > { %v1155_v27 = vunpack.c.l.s8.bf16 %v2469_v26  ;;  %v1156_v28 = vunpack.c.h.s8.bf16 %v2469_v26  ;;  %v1389_v30 = vunpack.c.l.s8.bf16 %v2480_v29  ;;  %v1390_v31 = vunpack.c.h.s8.bf16 %v2480_v29  ;;  %v2504_v41 = vld [vmem:[%s3158_s20 + $0x60] sm:$0xff]  ;;  %v2505_v44 = vld [vmem:[%s3158_s20 + $0x68] sm:$0xff]  ;;  %v3238_v46 = vld [vmem:[%s4047_s3 + $0x18] sm:$0xff]  }
  0x57   : > { %v1391_v33 = vunpack.c.l.s8.bf16 %v2481_v32  ;;  %v1392_v34 = vunpack.c.h.s8.bf16 %v2481_v32  ;;  %v1625_v36 = vunpack.c.l.s8.bf16 %v2492_v35  ;;  %v1626_v37 = vunpack.c.h.s8.bf16 %v2492_v35  ;;  %v2516_v48 = vld [vmem:[%s3158_s20 + $0x70] sm:$0xff]  ;;  %v2517_v51 = vld [vmem:[%s3158_s20 + $0x78] sm:$0xff]  ;;  %v3254_v54 = vld [vmem:[%s4044_s0 + $0x8] sm:$0xff] }
  0x58   : > { %2633 = vmatpush3.bf16.msra.mxu0 %v403_v2  ;;  %2645 = vmatpush3.bf16.msra.mxu1 %v3181_v8  ;;  %v1627_v39 = vunpack.c.l.s8.bf16 %v2493_v38  ;;  %v1628_v40 = vunpack.c.h.s8.bf16 %v2493_v38  ;;  %v1861_v42 = vunpack.c.l.s8.bf16 %v2504_v41  ;;  %v1862_v43 = vunpack.c.h.s8.bf16 %v2504_v41  ;;  %v337_v55 = vld [vmem:[%s3152_s18 + $0x8] sm:$0xff]  ;;  %v3263_v57 = vld [vmem:[%s4044_s0 + $0x18] sm:$0xff]  ;;  %v336_v9 = vld [vmem:[%s3152_s18] sm:$0xff] }
  0x59   : > { %2634 = vmatprep.subr.bf16.mxu0 %v404_v5  ;;  %2646 = vmatprep.subr.bf16.mxu1 %v3190_v10  ;;  %v1863_v45 = vunpack.c.l.s8.bf16 %v2505_v44  ;;  %v1864_v47 = vunpack.c.h.s8.bf16 %v2505_v44  ;;  %v2097_v49 = vunpack.c.l.s8.bf16 %v2516_v48  ;;  %v2098_v50 = vunpack.c.h.s8.bf16 %v2516_v48  ;;  %v339_v58 = vld [vmem:[%s3152_s18 + $0x18] sm:$0xff]  ;;  %v341_v62 = vld [vmem:[%s3152_s18 + $0x28] sm:$0xff]  ;;  %v342_v26 = vld [vmem:[%s3152_s18 + $0x30] sm:$0xff] }
  0x5a   : > { %v2099_v52 = vunpack.c.l.s8.bf16 %v2517_v51  ;;  %v2100_v53 = vunpack.c.h.s8.bf16 %v2517_v51  ;;  %v3258_v56 = vmul.f32 %v337_v55, %v3254_v54  ;;  %v3267_v59 = vmul.f32 %v339_v58, %v3263_v57  ;;  %v343_v1 = vld [vmem:[%s3152_s18 + $0x38] sm:$0xff]  ;;  %v345_v4 = vld [vmem:[%s3152_s18 + $0x48] sm:$0xff]  ;;  %v344_v35 = vld [vmem:[%s3152_s18 + $0x40] sm:$0xff] }
  0x5b   : > { %v3275_v63 = vmul.f32 %v341_v62, %v3254_v54  ;;  %v3281_v2 = vmul.f32 %v343_v1, %v3263_v57  ;;  %v346_v44 = vld [vmem:[%s3152_s18 + $0x50] sm:$0xff]  ;;  %v348_v51 = vld [vmem:[%s3152_s18 + $0x60] sm:$0xff] }
  0x5c   : > { %2635 = vmatpush3.bf16.msra.mxu0 %v404_v5  ;;  %2647 = vmatpush3.bf16.msra.mxu1 %v3190_v10  ;;  %v598_v60 = vsel %vm573_vm1, %v3258_v56, 0.0  ;;  %v604_v61 = vsel %vm573_vm1, %v3267_v59, 0.0  ;;  %v3287_v5 = vmul.f32 %v345_v4, %v3254_v54 }
  0x5d   : > { %2636 = vmatprep.subr.bf16.mxu0 %v405_v7  ;;  %2648 = vmatprep.subr.bf16.mxu1 %v3238_v46  ;;  %v835_v0 = vsel %vm573_vm1, %v3275_v63, 0.0 }
  0x5e   : > { %599 = vadd.xlane.f32.xlu1 %v598_v60  ;;  %v361_v60 = vld [vmem:[%s3152_s18 + $0xc8] sm:$0xff] }
  0x5f   : > { %v3387_v1 = vmul.f32 %v361_v60, %v3254_v54 }
  0x60   : > { %2637 = vmatpush3.bf16.msra.mxu0 %v405_v7  ;;  %2649 = vmatpush3.bf16.msra.mxu1 %v3238_v46  ;;  %v3292_v7 = vld [vmem:[%s4044_s0] sm:$0xff] }
  0x61   : > { %2654 = vmatprep.subr.bf16.mxu0 %v681_v11  ;;  %2666 = vmatprep.subr.bf16.mxu1 %v3176_v6  ;;  %v3379_v58 = vmul.f32 %v348_v51, %v3292_v7 }
  0x62   : > { %605 = vadd.xlane.f32.xlu1 %v604_v61  ;;  %v350_v61 = vld [vmem:[%s3152_s18 + $0x70] sm:$0xff] }
  0x63   : > { %2639 = vmatmul.mubr.msk.bf16.vlgmr.msra.gmra.mrb[0].mxu0 %vm416_vm0, %v3195_v12  ;;  %v1304_v4 = vsel %vm573_vm1, %v3379_v58, 0.0 }
  0x64   : > { %2655 = vmatpush3.bf16.msra.mxu0 %v681_v11  ;;  %2662 = vmatprep.mubr.msk.bf16.mxu0 %vm416_vm0, %v3168_v3  ;;  %v347_v11 = vld [vmem:[%s3152_s18 + $0x58] sm:$0xff] }
  0x65   : > { %2656 = vmatprep.subr.bf16.mxu0 %v682_v13  ;;  %v3302_v14 = vmul.f32 %v347_v11, %v3263_v57  ;;  %v365_v11 = vld [vmem:[%s3152_s18 + $0xe8] sm:$0xff] }
  0x66   : > { %836 = vadd.xlane.f32.xlu1 %v835_v0 }
  0x68   : > { %2657 = vmatpush3.bf16.msra.mxu0 %v682_v13  ;;  %v3299_v13 = vmul.f32 %v336_v9, %v3292_v7 }
  0x69   : > { %2658 = vmatprep.subr.bf16.mxu0 %v683_v15 }
  0x6a   : > { %v595_v20 = vsel %vm573_vm1, %v3299_v13, 0.0 }
  0x6b   : > { %596 = vadd.xlane.f32.xlu0 %v595_v20 }
  0x6c   : > { %2659 = vmatpush3.bf16.msra.mxu0 %v683_v15  ;;  %v3307_v15 = vld [vmem:[%s4044_s0 + $0x10] sm:$0xff] }
  0x6d   : > { %2660 = vmatprep.subr.bf16.mxu0 %v684_v16  ;;  %v3337_v32 = vmul.f32 %v342_v26, %v3307_v15  ;;  %v3393_v9 = vmul.f32 %v350_v61, %v3307_v15  ;;  %v364_v61 = vld [vmem:[%s3152_s18 + $0xe0] sm:$0xff] }
  0x6f   : > { %v838_v41 = vsel %vm573_vm1, %v3337_v32, 0.0 }
  0x70   : > { %2661 = vmatpush3.bf16.msra.mxu0 %v684_v16  ;;  %v338_v16 = vld [vmem:[%s3152_s18 + $0x10] sm:$0xff] }
  0x71   : > { %2678 = vmatprep.subr.bf16.mxu0 %v917_v18  ;;  %v3311_v17 = vmul.f32 %v338_v16, %v3307_v15  ;;  %v352_v16 = vld [vmem:[%s3152_s18 + $0x80] sm:$0xff] }
  0x72   : > { %v3407_v26 = vmul.f32 %v352_v16, %v3292_v7  ;;  %v3466_v16 = vmul.f32 %v364_v61, %v3292_v7  ;;  %v367_v61 = vld [vmem:[%s3152_s18 + $0xf8] sm:$0xff] }
  0x73   : > { %2663 = vmatmul.mubr.msk.bf16.vlgmr.msra.gmra.mrb[4].mxu0 %vm416_vm0, %v3195_v12 }
  0x74   : > { %2679 = vmatpush3.bf16.msra.mxu0 %v917_v18  ;;  %2686 = vmatprep.mubr.msk.bf16.mxu0 %vm416_vm0, %v3168_v3  ;;  %v349_v18 = vld [vmem:[%s3152_s18 + $0x68] sm:$0xff] }
  0x75   : > { %2680 = vmatprep.subr.bf16.mxu0 %v918_v19  ;;  %v3322_v23 = vmul.f32 %v349_v18, %v3254_v54 }
  0x78   : > { %2681 = vmatpush3.bf16.msra.mxu0 %v918_v19  ;;  %v340_v19 = vld [vmem:[%s3152_s18 + $0x20] sm:$0xff] }
  0x79   : > { %2682 = vmatprep.subr.bf16.mxu0 %v919_v21 }
  0x7c   : > { %2683 = vmatpush3.bf16.msra.mxu0 %v919_v21  ;;  %v1077_v21 = vsel %vm573_vm1, %v3302_v14, 0.0 }
  0x7d   : > { %2684 = vmatprep.subr.bf16.mxu0 %v920_v22 }
  0x80   : > { %2685 = vmatpush3.bf16.msra.mxu0 %v920_v22  ;;  %v601_v22 = vsel %vm573_vm1, %v3311_v17, 0.0 }
  0x81   : > { %2702 = vmatprep.subr.bf16.mxu0 %v1153_v24  ;;  %602 = vadd.xlane.f32.xlu0 %v601_v22  ;;  %v3401_v22 = vmul.f32 %v365_v11, %v3254_v54 }
  0x83   : > { %2687 = vmatmul.mubr.msk.bf16.vlgmr.msra.gmra.mrb[8].mxu0 %vm416_vm0, %v3195_v12 }
  0x84   : > { %2703 = vmatpush3.bf16.msra.mxu0 %v1153_v24  ;;  %2710 = vmatprep.mubr.msk.bf16.mxu0 %vm416_vm0, %v3168_v3  ;;  %v3325_v24 = vmul.f32 %v340_v19, %v3292_v7 }
  0x85   : > { %2704 = vmatprep.subr.bf16.mxu0 %v1154_v25 }
  0x86   : > { %v832_v29 = vsel %vm573_vm1, %v3325_v24, 0.0 }
  0x87   : > { %833 = vadd.xlane.f32.xlu0 %v832_v29 }
  0x88   : > { %2705 = vmatpush3.bf16.msra.mxu0 %v1154_v25  ;;  %v351_v25 = vld [vmem:[%s3152_s18 + $0x78] sm:$0xff] }
  0x89   : > { %2706 = vmatprep.subr.bf16.mxu0 %v1155_v27 }
  0x8b   : > { %839 = vadd.xlane.f32.xlu0 %v838_v41 }
  0x8c   : > { %2707 = vmatpush3.bf16.msra.mxu0 %v1155_v27 }
  0x8d   : > { %2708 = vmatprep.subr.bf16.mxu0 %v1156_v28 }
  0x90   : > { %2709 = vmatpush3.bf16.msra.mxu0 %v1156_v28  ;;  %v1307_v28 = vsel %vm573_vm1, %v3322_v23, 0.0 }
  0x91   : > { %2726 = vmatprep.subr.bf16.mxu0 %v1389_v30 }
  0x93   : > { %2711 = vmatmul.mubr.msk.bf16.vlgmr.msra.gmra.mrb[12].mxu0 %vm416_vm0, %v3195_v12 }
  0x94   : > { %2727 = vmatpush3.bf16.msra.mxu0 %v1389_v30  ;;  %2734 = vmatprep.mubr.msk.bf16.mxu0 %vm416_vm0, %v3168_v3  ;;  %v3334_v30 = vmul.f32 %v351_v25, %v3263_v57  ;;  %v1310_v25 = vsel %vm573_vm1, %v3393_v9, 0.0 }
  0x95   : > { %2728 = vmatprep.subr.bf16.mxu0 %v1390_v31 }
  0x98   : > { %2729 = vmatpush3.bf16.msra.mxu0 %v1390_v31 }
  0x99   : > { %2730 = vmatprep.subr.bf16.mxu0 %v1391_v33 }
  0x9c   : > { %2731 = vmatpush3.bf16.msra.mxu0 %v1391_v33  ;;  %v353_v33 = vld [vmem:[%s3152_s18 + $0x88] sm:$0xff] }
  0x9d   : > { %2732 = vmatprep.subr.bf16.mxu0 %v1392_v34 }
  0xa0   : > { %2733 = vmatpush3.bf16.msra.mxu0 %v1392_v34 }
  0xa1   : > { %2750 = vmatprep.subr.bf16.mxu0 %v1625_v36 }
  0xa3   : > { %2735 = vmatmul.mubr.msk.bf16.vlgmr.msra.gmra.mrb[16].mxu0 %vm416_vm0, %v3195_v12 }
  0xa4   : > { %2751 = vmatpush3.bf16.msra.mxu0 %v1625_v36  ;;  %2758 = vmatprep.mubr.msk.bf16.mxu0 %vm416_vm0, %v3168_v3 }
  0xa5   : > { %2752 = vmatprep.subr.bf16.mxu0 %v1626_v37 }
  0xa8   : > { %2753 = vmatpush3.bf16.msra.mxu0 %v1626_v37 }
  0xa9   : > { %2754 = vmatprep.subr.bf16.mxu0 %v1627_v39 }
  0xac   : > { %2755 = vmatpush3.bf16.msra.mxu0 %v1627_v39  ;;  %v1313_v39 = vsel %vm573_vm1, %v3334_v30, 0.0 }
  0xad   : > { %2756 = vmatprep.subr.bf16.mxu0 %v1628_v40 }
  0xb0   : > { %2757 = vmatpush3.bf16.msra.mxu0 %v1628_v40  ;;  %v3344_v40 = vmul.f32 %v353_v33, %v3254_v54 }
  0xb1   : > { %2774 = vmatprep.subr.bf16.mxu0 %v1861_v42 }
  0xb3   : > { %2759 = vmatmul.mubr.msk.bf16.vlgmr.msra.gmra.mrb[20].mxu0 %vm416_vm0, %v3195_v12 }
  0xb4   : > { %2775 = vmatpush3.bf16.msra.mxu0 %v1861_v42  ;;  %2782 = vmatprep.mubr.msk.bf16.mxu0 %vm416_vm0, %v3168_v3  ;;  %v3349_v42 = vmul.f32 %v344_v35, %v3292_v7  ;;  %v356_v35 = vld [vmem:[%s3152_s18 + $0xa0] sm:$0xff] }
  0xb5   : > { %2776 = vmatprep.subr.bf16.mxu0 %v1862_v43  ;;  %v3438_v41 = vmul.f32 %v356_v35, %v3292_v7 }
  0xb6   : > { %v1068_v48 = vsel %vm573_vm1, %v3349_v42, 0.0 }
  0xb7   : > { %1069 = vadd.xlane.f32.xlu0 %v1068_v48  ;;  %v1776_v51 = vsel %vm573_vm1, %v3438_v41, 0.0 }
  0xb8   : > { %2777 = vmatpush3.bf16.msra.mxu0 %v1862_v43  ;;  %v355_v43 = vld [vmem:[%s3152_s18 + $0x98] sm:$0xff] }
  0xb9   : > { %2778 = vmatprep.subr.bf16.mxu0 %v1863_v45 }
  0xbc   : > { %2779 = vmatpush3.bf16.msra.mxu0 %v1863_v45  ;;  %v1543_v45 = vsel %vm573_vm1, %v3344_v40, 0.0 }
  0xbd   : > { %2780 = vmatprep.subr.bf16.mxu0 %v1864_v47 }
  0xc0   : > { %2781 = vmatpush3.bf16.msra.mxu0 %v1864_v47  ;;  %v3359_v47 = vmul.f32 %v355_v43, %v3263_v57  ;;  %v360_v43 = vld [vmem:[%s3152_s18 + $0xc0] sm:$0xff] }
  0xc1   : > { %2798 = vmatprep.subr.bf16.mxu0 %v2097_v49 }
  0xc3   : > { %2783 = vmatmul.mubr.msk.bf16.vlgmr.msra.gmra.mrb[24].mxu0 %vm416_vm0, %v3195_v12 }
  0xc4   : > { %2799 = vmatpush3.bf16.msra.mxu0 %v2097_v49  ;;  %2806 = vmatprep.mubr.msk.bf16.mxu0 %vm416_vm0, %v3168_v3  ;;  %v841_v3 = vsel %vm573_vm1, %v3281_v2, 0.0  ;;  %v3365_v49 = vmul.f32 %v346_v44, %v3307_v15 }
  0xc5   : > { %2800 = vmatprep.subr.bf16.mxu0 %v2098_v50  ;;  %842 = vadd.xlane.f32.xlu1 %v841_v3 }
  0xc6   : > { %v1074_v55 = vsel %vm573_vm1, %v3365_v49, 0.0 }
  0xc7   : > { %1075 = vadd.xlane.f32.xlu0 %v1074_v55  ;;  %v3452_v55 = vmul.f32 %v360_v43, %v3292_v7  ;;  %v2248_v7 = vsel %vm573_vm1, %v3466_v16, 0.0 }
  0xc8   : > { %2801 = vmatpush3.bf16.msra.mxu0 %v2098_v50  ;;  %v357_v50 = vld [vmem:[%s3152_s18 + $0xa8] sm:$0xff] }
  0xc9   : > { %2802 = vmatprep.subr.bf16.mxu0 %v2099_v52  ;;  %v2012_v11 = vsel %vm573_vm1, %v3452_v55, 0.0 }
  0xcb   : > { %1305 = vadd.xlane.f32.xlu0 %v1304_v4 }
  0xcc   : > { %2803 = vmatpush3.bf16.msra.mxu0 %v2099_v52  ;;  %v1549_v52 = vsel %vm573_vm1, %v3359_v47, 0.0 }
  0xcd   : > { %2804 = vmatprep.subr.bf16.mxu0 %v2100_v53 }
  0xcf   : > { %1311 = vadd.xlane.f32.xlu0 %v1310_v25 }
  0xd0   : > { %2805 = vmatpush3.bf16.msra.mxu0 %v2100_v53  ;;  %v3373_v53 = vmul.f32 %v357_v50, %v3254_v54  ;;  %v2251_v54 = vsel %vm573_vm1, %v3401_v22, 0.0 }
  0xd2   : > { %v1779_v0 = vsel %vm573_vm1, %v3373_v53, 0.0 }
  0xd3   : > { %2807 = vmatmul.mubr.msk.bf16.vlgmr.msra.gmra.mrb[28].mxu0 %vm416_vm0, %v3195_v12  ;;  %v1071_v12 = vsel %vm573_vm1, %v3287_v5, 0.0 }
  0xd4   : > { %1072 = vadd.xlane.f32.xlu1 %v1071_v12 }
  0xd8   : > { %1078 = vadd.xlane.f32.xlu1 %v1077_v21  ;;  %v2015_v21 = vsel %vm573_vm1, %v3387_v1, 0.0 }
  0xdc   : > { %1308 = vadd.xlane.f32.xlu1 %v1307_v28  ;;  %v354_v28 = vld [vmem:[%s3152_s18 + $0x90] sm:$0xff] }
  0xdd   : > { %v3423_v33 = vmul.f32 %v354_v28, %v3307_v15 }
  0xe0   : > { %1314 = vadd.xlane.f32.xlu1 %v1313_v39  ;;  %v366_v39 = vld [vmem:[%s3152_s18 + $0xf0] sm:$0xff] }
  0xe1   : > { %v3445_v48 = vmul.f32 %v366_v39, %v3307_v15 }
  0xe4   : > { %1544 = vadd.xlane.f32.xlu1 %v1543_v45 }
  0xe8   : > { %1550 = vadd.xlane.f32.xlu1 %v1549_v52  ;;  %v359_v52 = vld [vmem:[%s3152_s18 + $0xb8] sm:$0xff] }
  0xe9   : > { %v3459_v4 = vmul.f32 %v359_v52, %v3263_v57 }
  0xec   : > { %1780 = vadd.xlane.f32.xlu1 %v1779_v0 }
  0xf0   : > { %2016 = vadd.xlane.f32.xlu1 %v2015_v21 }
  0xf4   : > { %2252 = vadd.xlane.f32.xlu1 %v2251_v54 }
 0x136   : > { %v2640_v27 = vpop.f32.mrb[0].mxu0 }
 0x137   : > { %v457_v31 = vpop.f32.mrb[1].mxu0 }
 0x138   : > { %v2641_v34 = vpop.f32.mrb[2].mxu0 }
 0x139   : > { %v473_v36 = vpack.c.bf16 %v2641_v34, %v2640_v27  ;;  %v460_v37 = vpop.f32.mrb[3].mxu0  ;;  %v358_v27 = vld [vmem:[%s3152_s18 + $0xb0] sm:$0xff] }
 0x13a   : > { %v472_v38 = vpack.c.bf16 %v460_v37, %v457_v31  ;;  %v3417_v29 = vmul.f32 %v358_v27, %v3307_v15  ;;  %v1540_v31 = vsel %vm573_vm1, %v3407_v26, 0.0  ;;  %v362_v34 = vld [vmem:[%s3152_s18 + $0xd0] sm:$0xff] }
 0x13b   : > { %1541 = vadd.xlane.f32.xlu0 %v1540_v31  ;;  %v3431_v37 = vmul.f32 %v362_v34, %v3307_v15  ;;  %v2254_v15 = vsel %vm573_vm1, %v3445_v48, 0.0 }
 0x13c   : > { %2650 = vmatprep.mubr.msk.bf16.mxu1 %vm416_vm0, %v472_v38  ;;  %v1546_v38 = vsel %vm573_vm1, %v3423_v33, 0.0 }
 0x13d   : > { %2651 = vmatmul.mubr.msk.bf16.vlgmr.msra.gmra.mrb[0].mxu1 %vm416_vm0, %v473_v36  ;;  %v1782_v36 = vsel %vm573_vm1, %v3417_v29, 0.0  ;;  %v2018_v45 = vsel %vm573_vm1, %v3431_v37, 0.0 }
 0x13e   : > { %2667 = vmatpush3.bf16.msra.mxu1 %v3176_v6  ;;  %1783 = vadd.xlane.f32.xlu1 %v1782_v36 }
 0x13f   : > { %2668 = vmatprep.subr.bf16.mxu1 %v3181_v8  ;;  %1547 = vadd.xlane.f32.xlu0 %v1546_v38 }
 0x142   : > { %2669 = vmatpush3.bf16.msra.mxu1 %v3181_v8  ;;  %2019 = vadd.xlane.f32.xlu1 %v2018_v45 }
 0x143   : > { %2670 = vmatprep.subr.bf16.mxu1 %v3190_v10  ;;  %1777 = vadd.xlane.f32.xlu0 %v1776_v51 }
 0x146   : > { %v2664_v62 = vpop.f32.mrb[4].mxu0  ;;  %2671 = vmatpush3.bf16.msra.mxu1 %v3190_v10  ;;  %2255 = vadd.xlane.f32.xlu1 %v2254_v15 }
 0x147   : > { %v719_v3 = vpop.f32.mrb[5].mxu0  ;;  %2672 = vmatprep.subr.bf16.mxu1 %v3238_v46  ;;  %2013 = vadd.xlane.f32.xlu0 %v2012_v11 }
 0x148   : > { %v2665_v12 = vpop.f32.mrb[6].mxu0 }
 0x149   : > { %v735_v18 = vpack.c.bf16 %v2665_v12, %v2664_v62  ;;  %v722_v19 = vpop.f32.mrb[7].mxu0  ;;  %v363_v12 = vld [vmem:[%s3152_s18 + $0xd8] sm:$0xff] }
 0x14a   : > { %v734_v20 = vpack.c.bf16 %v722_v19, %v719_v3  ;;  %2673 = vmatpush3.bf16.msra.mxu1 %v3238_v46  ;;  %v3474_v19 = vmul.f32 %v363_v12, %v3263_v57 }
 0x14b   : > { %2690 = vmatprep.subr.bf16.mxu1 %v3176_v6  ;;  %2249 = vadd.xlane.f32.xlu0 %v2248_v7 }
 0x14c   : > { %2674 = vmatprep.mubr.msk.bf16.mxu1 %vm416_vm0, %v734_v20  ;;  %v2021_v20 = vsel %vm573_vm1, %v3474_v19, 0.0 }
 0x14d   : > { %2675 = vmatmul.mubr.msk.bf16.vlgmr.msra.gmra.mrb[4].mxu1 %vm416_vm0, %v735_v18  ;;  %v1785_v18 = vsel %vm573_vm1, %v3459_v4, 0.0 }
 0x14e   : > { %2691 = vmatpush3.bf16.msra.mxu1 %v3176_v6  ;;  %1786 = vadd.xlane.f32.xlu1 %v1785_v18 }
 0x14f   : > { %2692 = vmatprep.subr.bf16.mxu1 %v3181_v8 }
 0x152   : > { %2693 = vmatpush3.bf16.msra.mxu1 %v3181_v8  ;;  %2022 = vadd.xlane.f32.xlu1 %v2021_v20 }
 0x153   : > { %2694 = vmatprep.subr.bf16.mxu1 %v3190_v10 }
 0x156   : > { %v2688_v44 = vpop.f32.mrb[8].mxu0  ;;  %2695 = vmatpush3.bf16.msra.mxu1 %v3190_v10 }
 0x157   : > { %v955_v50 = vpop.f32.mrb[9].mxu0  ;;  %2696 = vmatprep.subr.bf16.mxu1 %v3238_v46 }
 0x158   : > { %v2689_v60 = vpop.f32.mrb[10].mxu0 }
 0x159   : > { %v971_v62 = vpack.c.bf16 %v2689_v60, %v2688_v44  ;;  %v958_v0 = vpop.f32.mrb[11].mxu0 }
 0x15a   : > { %v970_v3 = vpack.c.bf16 %v958_v0, %v955_v50  ;;  %2697 = vmatpush3.bf16.msra.mxu1 %v3238_v46 }
 0x15b   : > { %2714 = vmatprep.subr.bf16.mxu1 %v3176_v6 }
 0x15c   : > { %2698 = vmatprep.mubr.msk.bf16.mxu1 %vm416_vm0, %v970_v3 }
 0x15d   : > { %2699 = vmatmul.mubr.msk.bf16.vlgmr.msra.gmra.mrb[8].mxu1 %vm416_vm0, %v971_v62  ;;  %v3512_v62 = vmul.f32 %v367_v61, %v3263_v57 }
 0x15e   : > { %2715 = vmatpush3.bf16.msra.mxu1 %v3176_v6 }
 0x15f   : > { %2716 = vmatprep.subr.bf16.mxu1 %v3181_v8  ;;  %v2257_v0 = vsel %vm573_vm1, %v3512_v62, 0.0 }
 0x160   : > { %2258 = vadd.xlane.f32.xlu1 %v2257_v0 }
 0x162   : > { %2717 = vmatpush3.bf16.msra.mxu1 %v3181_v8 }
 0x163   : > { %2718 = vmatprep.subr.bf16.mxu1 %v3190_v10 }
 0x166   : > { %v2712_v21 = vpop.f32.mrb[12].mxu0  ;;  %2719 = vmatpush3.bf16.msra.mxu1 %v3190_v10 }
 0x167   : > { %v1191_v25 = vpop.f32.mrb[13].mxu0  ;;  %2720 = vmatprep.subr.bf16.mxu1 %v3238_v46 }
 0x168   : > { %v2713_v27 = vpop.f32.mrb[14].mxu0 }
 0x169   : > { %v1207_v28 = vpack.c.bf16 %v2713_v27, %v2712_v21  ;;  %v1194_v54 = vpop.f32.mrb[15].mxu0 }
 0x16a   : > { %v1206_v31 = vpack.c.bf16 %v1194_v54, %v1191_v25  ;;  %2721 = vmatpush3.bf16.msra.mxu1 %v3238_v46  ;;  %v4052_v54 = vmov 0.0  }
 0x16b   : > { %2738 = vmatprep.subr.bf16.mxu1 %v3176_v6 }
 0x16c   : > { %2722 = vmatprep.mubr.msk.bf16.mxu1 %vm416_vm0, %v1206_v31 }
 0x16d   : > { %2723 = vmatmul.mubr.msk.bf16.vlgmr.msra.gmra.mrb[12].mxu1 %vm416_vm0, %v1207_v28 }
 0x16e   : > { %2739 = vmatpush3.bf16.msra.mxu1 %v3176_v6 }
 0x16f   : > { %2740 = vmatprep.subr.bf16.mxu1 %v3181_v8 }
 0x172   : > { %2741 = vmatpush3.bf16.msra.mxu1 %v3181_v8 }
 0x173   : > { %2742 = vmatprep.subr.bf16.mxu1 %v3190_v10 }
 0x176   : > { %v2736_v34 = vpop.f32.mrb[16].mxu0  ;;  %2743 = vmatpush3.bf16.msra.mxu1 %v3190_v10 }
 0x177   : > { %v1427_v35 = vpop.f32.mrb[17].mxu0  ;;  %2744 = vmatprep.subr.bf16.mxu1 %v3238_v46 }
 0x178   : > { %v2737_v36 = vpop.f32.mrb[18].mxu0 }
 0x179   : > { %v1443_v38 = vpack.c.bf16 %v2737_v36, %v2736_v34  ;;  %v1430_v39 = vpop.f32.mrb[19].mxu0 }
 0x17a   : > { %v1442_v43 = vpack.c.bf16 %v1430_v39, %v1427_v35  ;;  %2745 = vmatpush3.bf16.msra.mxu1 %v3238_v46 }
 0x17b   : > { %2762 = vmatprep.subr.bf16.mxu1 %v3176_v6 }
 0x17c   : > { %2746 = vmatprep.mubr.msk.bf16.mxu1 %vm416_vm0, %v1442_v43 }
 0x17d   : > { %2747 = vmatmul.mubr.msk.bf16.vlgmr.msra.gmra.mrb[16].mxu1 %vm416_vm0, %v1443_v38 }
 0x17e   : > { %2763 = vmatpush3.bf16.msra.mxu1 %v3176_v6 }
 0x17f   : > { %2764 = vmatprep.subr.bf16.mxu1 %v3181_v8 }
 0x182   : > { %2765 = vmatpush3.bf16.msra.mxu1 %v3181_v8 }
 0x183   : > { %2766 = vmatprep.subr.bf16.mxu1 %v3190_v10 }
 0x186   : > { %v2760_v44 = vpop.f32.mrb[20].mxu0  ;;  %2767 = vmatpush3.bf16.msra.mxu1 %v3190_v10 }
 0x187   : > { %v1663_v45 = vpop.f32.mrb[21].mxu0  ;;  %2768 = vmatprep.subr.bf16.mxu1 %v3238_v46 }
 0x188   : > { %v2761_v50 = vpop.f32.mrb[22].mxu0 }
 0x189   : > { %v1679_v51 = vpack.c.bf16 %v2761_v50, %v2760_v44  ;;  %v1666_v52 = vpop.f32.mrb[23].mxu0 }
 0x18a   : > { %v1678_v60 = vpack.c.bf16 %v1666_v52, %v1663_v45  ;;  %2769 = vmatpush3.bf16.msra.mxu1 %v3238_v46  ;;  %v3552_v52 = vld [vmem:[%s4045_s1 + $0x18] sm:$0xff] }
 0x18b   : > { %2786 = vmatprep.subr.bf16.mxu1 %v3176_v6 }
 0x18c   : > { %2770 = vmatprep.mubr.msk.bf16.mxu1 %vm416_vm0, %v1678_v60 }
 0x18d   : > { %2771 = vmatmul.mubr.msk.bf16.vlgmr.msra.gmra.mrb[20].mxu1 %vm416_vm0, %v1679_v51 }
 0x18e   : > { %2787 = vmatpush3.bf16.msra.mxu1 %v3176_v6 }
 0x18f   : > { %2788 = vmatprep.subr.bf16.mxu1 %v3181_v8 }
 0x192   : > { %2789 = vmatpush3.bf16.msra.mxu1 %v3181_v8 }
 0x193   : > { %2790 = vmatprep.subr.bf16.mxu1 %v3190_v10 }
 0x196   : > { %v2784_v3 = vpop.f32.mrb[24].mxu0  ;;  %2791 = vmatpush3.bf16.msra.mxu1 %v3190_v10 }
 0x197   : > { %v1899_v15 = vpop.f32.mrb[25].mxu0  ;;  %2792 = vmatprep.subr.bf16.mxu1 %v3238_v46 }
 0x198   : > { %v2785_v11 = vpop.f32.mrb[26].mxu0 }
 0x199   : > { %v1915_v12 = vpack.c.bf16 %v2785_v11, %v2784_v3  ;;  %v1902_v57 = vpop.f32.mrb[27].mxu0  ;;  %v3566_v11 = vld [vmem:[%s4045_s1] sm:$0xff] }
 0x19a   : > { %v1914_v18 = vpack.c.bf16 %v1902_v57, %v1899_v15  ;;  %2793 = vmatpush3.bf16.msra.mxu1 %v3238_v46  ;;  %v3561_v15 = vld [vmem:[%s4045_s1 + $0x8] sm:$0xff] }
 0x19b   : > { %2810 = vmatprep.subr.bf16.mxu1 %v3176_v6 }
 0x19c   : > { %2794 = vmatprep.mubr.msk.bf16.mxu1 %vm416_vm0, %v1914_v18 }
 0x19d   : > { %2795 = vmatmul.mubr.msk.bf16.vlgmr.msra.gmra.mrb[24].mxu1 %vm416_vm0, %v1915_v12 }
 0x19e   : > { %2811 = vmatpush3.bf16.msra.mxu1 %v3176_v6 }
 0x19f   : > { %2812 = vmatprep.subr.bf16.mxu1 %v3181_v8 }
 0x1a2   : > { %2813 = vmatpush3.bf16.msra.mxu1 %v3181_v8 }
 0x1a3   : > { %2814 = vmatprep.subr.bf16.mxu1 %v3190_v10 }
 0x1a6   : > { %v2808_v7 = vpop.f32.mrb[28].mxu0  ;;  %2815 = vmatpush3.bf16.msra.mxu1 %v3190_v10 }
 0x1a7   : > { %v2135_v20 = vpop.f32.mrb[29].mxu0  ;;  %2816 = vmatprep.subr.bf16.mxu1 %v3238_v46 }
 0x1a8   : > { %v2809_v21 = vpop.f32.mrb[30].mxu0 }
 0x1a9   : > { %v2151_v25 = vpack.c.bf16 %v2809_v21, %v2808_v7  ;;  %v2138_v27 = vpop.f32.mrb[31].mxu0 }
 0x1aa   : > { %v2150_v28 = vpack.c.bf16 %v2138_v27, %v2135_v20  ;;  %2817 = vmatpush3.bf16.msra.mxu1 %v3238_v46  ;;  %v3540_v46 = vld [vmem:[%s4045_s1 + $0x10] sm:$0xff] }
 0x1ac   : > { %2818 = vmatprep.mubr.msk.bf16.mxu1 %vm416_vm0, %v2150_v28 }
 0x1ad   : > { %2819 = vmatmul.mubr.msk.bf16.vlgmr.msra.gmra.mrb[28].mxu1 %vm416_vm0, %v2151_v25 }
 0x210   : > { %v2652_v6 = vpop.f32.mrb[0].mxu1 }
 0x211   : > { %vm555_vm2 = vcmp.gt.f32.partialorder %v2652_v6, 0.5  ;;  %v538_v8 = vpop.f32.mrb[1].mxu1 }
 0x212   : > { %v2442_v31 = vsel %vm555_vm2, 1.0, %v4052_v54  ;;  %vm553_vm3 = vcmp.gt.f32.partialorder %v538_v8, 0.5  ;;  %v2653_v10 = vpop.f32.mrb[2].mxu1 }
 0x213   : > { %v567_v34 = vmul.f32 %v2442_v31, %v3311_v17  ;;  %v2440_v35 = vsel %vm553_vm3, 1.0, %v4052_v54  ;;  %vm556_vm4 = vcmp.gt.f32.partialorder %v2653_v10, 0.5  ;;  %v541_v36 = vpop.f32.mrb[3].mxu1 }
 0x214   : > { %v565_v38 = vmul.f32 %v2440_v35, %v3299_v13  ;;  %v2443_v39 = vsel %vm556_vm4, 1.0, %v4052_v54  ;;  %vm554_vm5 = vcmp.gt.f32.partialorder %v541_v36, 0.5 }
 0x215   : > { %v568_v43 = vmul.f32 %v2443_v39, %v3267_v59  ;;  %v580_v44 = vsel %vm573_vm1, %v567_v34, 0.0  ;;  %v2441_v45 = vsel %vm554_vm5, 1.0, %v4052_v54  ;;  %v619_v51 = vadd.f32 %v567_v34, %v3540_v46 }
 0x216   : > { %581 = vadd.xlane.f32.xlu1 %v580_v44  ;;  %v574_v50 = vsel %vm573_vm1, %v565_v38, 0.0  ;;  %v566_v60 = vmul.f32 %v2441_v45, %v3258_v56  ;;  %v617_v20 = vadd.f32 %v565_v38, %v3566_v11  ;;  %v571_v21 = vsub.f32 %v3311_v17, %v567_v34 }
 0x217   : > { %575 = vadd.xlane.f32.xlu0 %v574_v50  ;;  %v583_v61 = vsel %vm573_vm1, %v568_v43, 0.0  ;;  %v620_v0 = vadd.f32 %v568_v43, %v3552_v52  ;;  %v627_v3 = vsel %vm573_vm1, %v619_v51, -inf  ;;  %v572_v18 = vsub.f32 %v3267_v59, %v568_v43 }
 0x218   : > { %v618_v57 = vadd.f32 %v566_v60, %v3561_v15  ;;  %v577_v7 = vsel %vm573_vm1, %v566_v60, 0.0  ;;  %v570_v8 = vsub.f32 %v3258_v56, %v566_v60  ;;  %v621_v31 = vsel %vm573_vm1, %v617_v20, -inf }
 0x219   : > { %v630_v12 = vsel %vm573_vm1, %v620_v0, -inf  ;;  %v645_v6 = vadd.f32 %v572_v18, %v3552_v52  ;;  %v644_v10 = vadd.f32 %v571_v21, %v3540_v46  ;;  %v569_v35 = vsub.f32 %v3299_v13, %v565_v38  ;;  %v3598_v21 = vpop.xlane.xlu1 %599 }
 0x21a   : > { %584 = vadd.xlane.f32.xlu1 %v583_v61  ;;  %v624_v27 = vsel %vm573_vm1, %v618_v57, -inf  ;;  %v643_v36 = vadd.f32 %v570_v8, %v3561_v15 }
 0x21b   : > { %628 = vmax.xlane.f32.xlu0 %v627_v3  ;;  %v655_v34 = vsel %vm573_vm1, %v645_v6, -inf  ;;  %v652_v56 = vsel %vm573_vm1, %v644_v10, -inf  ;;  %v642_v43 = vadd.f32 %v569_v35, %v3566_v11 }
 0x21c   : > { %v649_v38 = vsel %vm573_vm1, %v643_v36, -inf }
 0x21d   : > { %v646_v51 = vsel %vm573_vm1, %v642_v43, -inf }
 0x21e   : > { %631 = vmax.xlane.f32.xlu1 %v630_v12 }
 0x21f   : > { %578 = vadd.xlane.f32.xlu0 %v577_v7 }
 0x220   : > { %v2676_v25 = vpop.f32.mrb[4].mxu1 }
 0x221   : > { %v776_v28 = vpop.f32.mrb[5].mxu1  ;;  %vm793_vm7 = vcmp.gt.f32.partialorder %v2676_v25, 0.5 }
 0x222   : > { %625 = vmax.xlane.f32.xlu1 %v624_v27  ;;  %v2677_v59 = vpop.f32.mrb[6].mxu1  ;;  %v2452_v44 = vsel %vm793_vm7, 1.0, %v4052_v54  ;;  %vm791_vm9 = vcmp.gt.f32.partialorder %v776_v28, 0.5 }
 0x223   : > { %622 = vmax.xlane.f32.xlu0 %v621_v31  ;;  %vm794_vm6 = vcmp.gt.f32.partialorder %v2677_v59, 0.5  ;;  %v779_v17 = vpop.f32.mrb[7].mxu1  ;;  %v805_v45 = vmul.f32 %v2452_v44, %v3337_v32  ;;  %v2450_v60 = vsel %vm791_vm9, 1.0, %v4052_v54 }
 0x224   : > { %v2453_v39 = vsel %vm794_vm6, 1.0, %v4052_v54  ;;  %vm792_vm8 = vcmp.gt.f32.partialorder %v779_v17, 0.5  ;;  %v803_v3 = vmul.f32 %v2450_v60, %v3325_v24 }
 0x225   : > { %v806_v13 = vmul.f32 %v2453_v39, %v3281_v2  ;;  %v2451_v50 = vsel %vm792_vm8, 1.0, %v4052_v54  ;;  %v817_v12 = vsel %vm573_vm1, %v805_v45, 0.0  ;;  %v856_v27 = vadd.f32 %v805_v45, %v3540_v46 }
 0x226   : > { %656 = vmax.xlane.f32.xlu1 %v655_v34  ;;  %v804_v61 = vmul.f32 %v2451_v50, %v3275_v63  ;;  %v811_v25 = vsel %vm573_vm1, %v803_v3, 0.0  ;;  %v854_v35 = vadd.f32 %v803_v3, %v3566_v11  ;;  %v809_v17 = vsub.f32 %v3337_v32, %v805_v45  ;;  %v3608_v34 = vpop.xlane.xlu1 %605 }
 0x227   : > { %653 = vmax.xlane.f32.xlu0 %v652_v56  ;;  %v820_v0 = vsel %vm573_vm1, %v806_v13, 0.0  ;;  %v857_v7 = vadd.f32 %v806_v13, %v3552_v52  ;;  %v810_v59 = vsub.f32 %v3281_v2, %v806_v13  ;;  %v864_v10 = vsel %vm573_vm1, %v856_v27, -inf }
 0x228   : > { %v814_v18 = vsel %vm573_vm1, %v804_v61, 0.0  ;;  %v855_v31 = vadd.f32 %v804_v61, %v3561_v15  ;;  %v808_v56 = vsub.f32 %v3275_v63, %v804_v61  ;;  %v858_v43 = vsel %vm573_vm1, %v854_v35, -inf }
 0x229   : > { %v867_v8 = vsel %vm573_vm1, %v857_v7, -inf  ;;  %v882_v39 = vadd.f32 %v810_v59, %v3552_v52  ;;  %v881_v2 = vadd.f32 %v809_v17, %v3540_v46  ;;  %v807_v44 = vsub.f32 %v3325_v24, %v803_v3 }
 0x22a   : > { %650 = vmax.xlane.f32.xlu1 %v649_v38  ;;  %v861_v36 = vsel %vm573_vm1, %v855_v31, -inf  ;;  %v880_v13 = vadd.f32 %v808_v56, %v3561_v15  ;;  %v3618_v38 = vpop.xlane.xlu1 %836 }
 0x22b   : > { %647 = vmax.xlane.f32.xlu0 %v646_v51  ;;  %v892_v32 = vsel %vm573_vm1, %v882_v39, -inf  ;;  %v889_v63 = vsel %vm573_vm1, %v881_v2, -inf  ;;  %v879_v50 = vadd.f32 %v807_v44, %v3566_v11 }
 0x22c   : > { %v886_v61 = vsel %vm573_vm1, %v880_v13, -inf }
 0x22e   : > { %821 = vadd.xlane.f32.xlu1 %v820_v0 }
 0x22f   : > { %818 = vadd.xlane.f32.xlu0 %v817_v12 }
 0x230   : > { %v2700_v57 = vpop.f32.mrb[8].mxu1 }
 0x231   : > { %v1012_v20 = vpop.f32.mrb[9].mxu1  ;;  %vm1029_vm11 = vcmp.gt.f32.partialorder %v2700_v57, 0.5  ;;  %v883_v57 = vsel %vm573_vm1, %v879_v50, -inf }
 0x232   : > { %815 = vadd.xlane.f32.xlu1 %v814_v18  ;;  %v2701_v28 = vpop.f32.mrb[10].mxu1  ;;  %v2464_v51 = vsel %vm1029_vm11, 1.0, %v4052_v54  ;;  %vm1027_vm13 = vcmp.gt.f32.partialorder %v1012_v20, 0.5  ;;  %v3632_v20 = vpop.xlane.xlu1 %842 }
 0x233   : > { %812 = vadd.xlane.f32.xlu0 %v811_v25  ;;  %v1015_v6 = vpop.f32.mrb[11].mxu1  ;;  %vm1030_vm10 = vcmp.gt.f32.partialorder %v2701_v28, 0.5  ;;  %v1041_v3 = vmul.f32 %v2464_v51, %v3365_v49  ;;  %v2462_v7 = vsel %vm1027_vm13, 1.0, %v4052_v54 }
 0x234   : > { %v2465_v45 = vsel %vm1030_vm10, 1.0, %v4052_v54  ;;  %vm1028_vm12 = vcmp.gt.f32.partialorder %v1015_v6, 0.5  ;;  %v1039_v6 = vmul.f32 %v2462_v7, %v3349_v42 }
 0x235   : > { %v1042_v60 = vmul.f32 %v2465_v45, %v3302_v14  ;;  %v2463_v12 = vsel %vm1028_vm12, 1.0, %v4052_v54  ;;  %v1092_v17 = vadd.f32 %v1041_v3, %v3540_v46  ;;  %v1045_v44 = vsub.f32 %v3365_v49, %v1041_v3 }
 0x236   : > { %868 = vmax.xlane.f32.xlu1 %v867_v8  ;;  %v1040_v27 = vmul.f32 %v2463_v12, %v3287_v5  ;;  %v1053_v8 = vsel %vm573_vm1, %v1041_v3, 0.0  ;;  %v1047_v35 = vsel %vm573_vm1, %v1039_v6, 0.0  ;;  %v1090_v2 = vadd.f32 %v1039_v6, %v3566_v11 }
 0x237   : > { %865 = vmax.xlane.f32.xlu0 %v864_v10  ;;  %v1056_v28 = vsel %vm573_vm1, %v1042_v60, 0.0  ;;  %v1093_v59 = vadd.f32 %v1042_v60, %v3552_v52  ;;  %v3640_v10 = vpop.xlane.xlu1 %1072  ;;  %v1046_v56 = vsub.f32 %v3302_v14, %v1042_v60  ;;  %v1117_v60 = vadd.f32 %v1045_v44, %v3540_v46 }
 0x238   : > { %v1050_v31 = vsel %vm573_vm1, %v1040_v27, 0.0  ;;  %v1091_v39 = vadd.f32 %v1040_v27, %v3561_v15  ;;  %v1044_v50 = vsub.f32 %v3287_v5, %v1040_v27  ;;  %v1094_v14 = vsel %vm573_vm1, %v1090_v2, -inf }
 0x239   : > { %v1043_v49 = vsub.f32 %v3349_v42, %v1039_v6  ;;  %v1125_v27 = vsel %vm573_vm1, %v1117_v60, -inf }
 0x23a   : > { %862 = vmax.xlane.f32.xlu1 %v861_v36  ;;  %v1103_v36 = vsel %vm573_vm1, %v1093_v59, -inf  ;;  %v1097_v45 = vsel %vm573_vm1, %v1091_v39, -inf  ;;  %v1116_v5 = vadd.f32 %v1044_v50, %v3561_v15  ;;  %v3680_v59 = vpop.xlane.xlu0 %596 }
 0x23b   : > { %859 = vmax.xlane.f32.xlu0 %v858_v43  ;;  %v1100_v43 = vsel %vm573_vm1, %v1092_v17, -inf  ;;  %v1115_v42 = vadd.f32 %v1043_v49, %v3566_v11 }
 0x23e   : > { %893 = vmax.xlane.f32.xlu1 %v892_v32  ;;  %v3650_v32 = vpop.xlane.xlu1 %1078 }
 0x23f   : > { %890 = vmax.xlane.f32.xlu0 %v889_v63  ;;  %v1118_v63 = vadd.f32 %v1046_v56, %v3552_v52  ;;  %v3689_v56 = vpop.xlane.xlu0 %602 }
 0x240   : > { %v2724_v24 = vpop.f32.mrb[12].mxu1 }
 0x241   : > { %v3626_v0 = vpop.f32.mrb[13].mxu1  ;;  %vm1265_vm15 = vcmp.gt.f32.partialorder %v2724_v24, 0.5  ;;  %v1128_v12 = vsel %vm573_vm1, %v1118_v63, -inf }
 0x242   : > { %887 = vmax.xlane.f32.xlu1 %v886_v61  ;;  %v2725_v18 = vpop.f32.mrb[14].mxu1  ;;  %vm1263_vm2 = vcmp.gt.f32.partialorder %v3626_v0, 0.5 }
 0x243   : > { %884 = vmax.xlane.f32.xlu0 %v883_v57  ;;  %v1251_v25 = vpop.f32.mrb[15].mxu1  ;;  %vm1266_vm14 = vcmp.gt.f32.partialorder %v2725_v18, 0.5  ;;  %v3668_v57 = vpop.xlane.xlu1 %1308  ;;  %v1122_v18 = vsel %vm573_vm1, %v1116_v5, -inf }
 0x244   : > { %v2477_v7 = vsel %vm1266_vm14, 1.0, %v4052_v54  ;;  %vm1264_vm0 = vcmp.gt.f32.partialorder %v1251_v25, 0.5 }
 0x245   : > { %v1278_v24 = vmul.f32 %v2477_v7, %v3334_v30 }
 0x246   : > { %1057 = vadd.xlane.f32.xlu1 %v1056_v28  ;;  %v2476_v28 = vsel %vm1265_vm15, 1.0, %v4052_v54 }
 0x247   : > { %1054 = vadd.xlane.f32.xlu0 %v1053_v8  ;;  %v1277_v6 = vmul.f32 %v2476_v28, %v3393_v9  ;;  %v2475_v8 = vsel %vm1264_vm0, 1.0, %v4052_v54  ;;  %v3683_v25 = vpop.xlane.xlu1 %1314  ;;  %v1292_v17 = vsel %vm573_vm1, %v1278_v24, 0.0  ;;  %v1329_v44 = vadd.f32 %v1278_v24, %v3552_v52 }
 0x248   : > { %v1276_v0 = vmul.f32 %v2475_v8, %v3322_v23  ;;  %v1282_v7 = vsub.f32 %v3334_v30, %v1278_v24 }
 0x249   : > { %v1289_v39 = vsel %vm573_vm1, %v1277_v6, 0.0  ;;  %v1281_v28 = vsub.f32 %v3393_v9, %v1277_v6 }
 0x24a   : > { %1051 = vadd.xlane.f32.xlu1 %v1050_v31  ;;  %v1119_v31 = vsel %vm573_vm1, %v1115_v42, -inf  ;;  %v1286_v2 = vsel %vm573_vm1, %v1276_v0, 0.0  ;;  %v1327_v5 = vadd.f32 %v1276_v0, %v3561_v15 }
 0x24b   : > { %1048 = vadd.xlane.f32.xlu0 %v1047_v35  ;;  %v2474_v35 = vsel %vm1263_vm2, 1.0, %v4052_v54  ;;  %v1353_v24 = vadd.f32 %v1281_v28, %v3540_v46 }
 0x24e   : > { %1104 = vmax.xlane.f32.xlu1 %v1103_v36  ;;  %v1275_v36 = vmul.f32 %v2474_v35, %v3379_v58  ;;  %v1354_v35 = vadd.f32 %v1282_v7, %v3552_v52 }
 0x24f   : > { %1101 = vmax.xlane.f32.xlu0 %v1100_v43 }
 0x250   : > { %v3652_v13 = vpop.f32.mrb[16].mxu1  ;;  %v1283_v50 = vsel %vm573_vm1, %v1275_v36, 0.0  ;;  %v1326_v42 = vadd.f32 %v1275_v36, %v3566_v11 }
 0x251   : > { %v3657_v51 = vpop.f32.mrb[17].mxu1  ;;  %vm1501_vm4 = vcmp.gt.f32.partialorder %v3652_v13, 0.5 }
 0x252   : > { %1098 = vmax.xlane.f32.xlu1 %v1097_v45  ;;  %v3662_v61 = vpop.f32.mrb[18].mxu1  ;;  %v3695_v45 = vpop.xlane.xlu1 %1544  ;;  %v1330_v30 = vsel %vm573_vm1, %v1326_v42, -inf  ;;  %vm1499_vm6 = vcmp.gt.f32.partialorder %v3657_v51, 0.5 }
 0x253   : > { %1095 = vmax.xlane.f32.xlu0 %v1094_v14  ;;  %v3664_v3 = vpop.f32.mrb[19].mxu1  ;;  %v1328_v14 = vadd.f32 %v1277_v6, %v3540_v46  ;;  %vm1502_vm3 = vcmp.gt.f32.partialorder %v3662_v61, 0.5  ;;  %v1364_v6 = vsel %vm573_vm1, %v1354_v35, -inf  ;;  %v2486_v51 = vsel %vm1499_vm6, 1.0, %v4052_v54 }
 0x254   : > { %vm1500_vm5 = vcmp.gt.f32.partialorder %v3664_v3, 0.5 }
 0x256   : > { %1129 = vmax.xlane.f32.xlu1 %v1128_v12  ;;  %v1339_v12 = vsel %vm573_vm1, %v1329_v44, -inf  ;;  %v3713_v8 = vpop.xlane.xlu1 %1550 }
 0x257   : > { %1126 = vmax.xlane.f32.xlu0 %v1125_v27  ;;  %v1336_v27 = vsel %vm573_vm1, %v1328_v14, -inf }
 0x25a   : > { %1123 = vmax.xlane.f32.xlu1 %v1122_v18  ;;  %v3711_v18 = vpop.xlane.xlu0 %833  ;;  %v3727_v44 = vpop.xlane.xlu1 %1780 }
 0x25b   : > { %1120 = vmax.xlane.f32.xlu0 %v1119_v31  ;;  %v1333_v31 = vsel %vm573_vm1, %v1327_v5, -inf  ;;  %v2487_v5 = vsel %vm1500_vm5, 1.0, %v4052_v54  ;;  %vm676_vm5 = vcmask 8200  }
 0x25e   : > { %1293 = vadd.xlane.f32.xlu1 %v1292_v17  ;;  %v1280_v17 = vsub.f32 %v3322_v23, %v1276_v0  ;;  %v3723_v9 = vpop.xlane.xlu0 %839  ;;  %v2489_v23 = vsel %vm1502_vm3, 1.0, %v4052_v54  ;;  %v1361_v0 = vsel %vm573_vm1, %v1353_v24, -inf  ;;  %v3749_v42 = vpop.xlane.xlu1 %2016 }
 0x25f   : > { %1290 = vadd.xlane.f32.xlu0 %v1289_v39  ;;  %v1279_v39 = vsub.f32 %v3379_v58, %v1275_v36  ;;  %v2488_v36 = vsel %vm1501_vm4, 1.0, %v4052_v54  ;;  %v1514_v61 = vmul.f32 %v2489_v23, %v3359_v47  ;;  %vm670_vm4 = vcmask 0  }
 0x260   : > { %v3691_v43 = vpop.f32.mrb[20].mxu1 }
 0x261   : > { %v3697_v63 = vpop.f32.mrb[21].mxu1  ;;  %v1351_v58 = vadd.f32 %v1279_v39, %v3566_v11  ;;  %v1528_v35 = vsel %vm573_vm1, %v1514_v61, 0.0  ;;  %vm1737_vm9 = vcmp.gt.f32.partialorder %v3691_v43, 0.5 }
 0x262   : > { %1287 = vadd.xlane.f32.xlu1 %v1286_v2  ;;  %v3701_v60 = vpop.f32.mrb[22].mxu1  ;;  %v1352_v2 = vadd.f32 %v1280_v17, %v3561_v15  ;;  %v1511_v17 = vmul.f32 %v2486_v51, %v3407_v26  ;;  %vm1735_vm10 = vcmp.gt.f32.partialorder %v3697_v63, 0.5 }
 0x263   : > { %1284 = vadd.xlane.f32.xlu0 %v1283_v50  ;;  %v3703_v49 = vpop.f32.mrb[23].mxu1  ;;  %v1355_v7 = vsel %vm573_vm1, %v1351_v58, -inf  ;;  %vm1738_vm7 = vcmp.gt.f32.partialorder %v3701_v60, 0.5 }
 0x264   : > { %v1358_v50 = vsel %vm573_vm1, %v1352_v2, -inf  ;;  %v3761_v2 = vpop.xlane.xlu1 %2252  ;;  %v1519_v23 = vsel %vm573_vm1, %v1511_v17, 0.0  ;;  %v1562_v51 = vadd.f32 %v1511_v17, %v3566_v11  ;;  %vm1736_vm8 = vcmp.gt.f32.partialorder %v3703_v49, 0.5 }
 0x265   : > { %4059 = vst [vmem:[#allocation8_spill] sm:$0xff] %v3761_v2 }
 0x266   : > { %1340 = vmax.xlane.f32.xlu1 %v1339_v12  ;;  %v1513_v12 = vmul.f32 %v2488_v36, %v3423_v33 }
 0x267   : > { %1337 = vmax.xlane.f32.xlu0 %v1336_v27  ;;  %v3744_v27 = vpop.xlane.xlu0 %1069 }
 0x26a   : > { %1334 = vmax.xlane.f32.xlu1 %v1333_v31  ;;  %v1512_v31 = vmul.f32 %v2487_v5, %v3344_v40 }
 0x26b   : > { %1331 = vmax.xlane.f32.xlu0 %v1330_v30  ;;  %v1525_v30 = vsel %vm573_vm1, %v1513_v12, 0.0  ;;  %v3757_v24 = vpop.xlane.xlu0 %1075 }
 0x26c   : > { %v1522_v39 = vsel %vm573_vm1, %v1512_v31, 0.0  ;;  %v1563_v36 = vadd.f32 %v1512_v31, %v3561_v15 }
 0x26e   : > { %1365 = vmax.xlane.f32.xlu1 %v1364_v6  ;;  %v1565_v6 = vadd.f32 %v1514_v61, %v3552_v52 }
 0x26f   : > { %1362 = vmax.xlane.f32.xlu0 %v1361_v0  ;;  %v1564_v0 = vadd.f32 %v1513_v12, %v3540_v46 }
 0x270   : > { %v3735_v13 = vpop.f32.mrb[24].mxu1  ;;  %v1575_v58 = vsel %vm573_vm1, %v1565_v6, -inf  ;;  %v1569_v6 = vsel %vm573_vm1, %v1563_v36, -inf }
 0x271   : > { %v3739_v14 = vpop.f32.mrb[25].mxu1  ;;  %v1572_v5 = vsel %vm573_vm1, %v1564_v0, -inf  ;;  %v1566_v0 = vsel %vm573_vm1, %v1562_v51, -inf  ;;  %v2500_v51 = vsel %vm1737_vm9, 1.0, %v4052_v54  ;;  %vm1973_vm13 = vcmp.gt.f32.partialorder %v3735_v13, 0.5 }
 0x272   : > { %1359 = vmax.xlane.f32.xlu1 %v1358_v50  ;;  %v3746_v3 = vpop.f32.mrb[26].mxu1  ;;  %v1518_v50 = vsub.f32 %v3359_v47, %v1514_v61  ;;  %v1516_v47 = vsub.f32 %v3344_v40, %v1512_v31  ;;  %vm1971_vm14 = vcmp.gt.f32.partialorder %v3739_v14, 0.5 }
 0x273   : > { %1356 = vmax.xlane.f32.xlu0 %v1355_v7  ;;  %v3751_v28 = vpop.f32.mrb[27].mxu1  ;;  %v3769_v7 = vpop.xlane.xlu0 %1305  ;;  %vm1974_vm11 = vcmp.gt.f32.partialorder %v3746_v3, 0.5 }
 0x274   : > { %vm1972_vm12 = vcmp.gt.f32.partialorder %v3751_v28, 0.5 }
 0x276   : > { %1529 = vadd.xlane.f32.xlu1 %v1528_v35  ;;  %v1517_v35 = vsub.f32 %v3423_v33, %v1513_v12  ;;  %v1515_v33 = vsub.f32 %v3407_v26, %v1511_v17  ;;  %v2501_v26 = vsel %vm1738_vm7, 1.0, %v4052_v54  ;;  %v2499_v17 = vsel %vm1736_vm8, 1.0, %v4052_v54 }
 0x277   : > { %1526 = vadd.xlane.f32.xlu0 %v1525_v30  ;;  %v3773_v30 = vpop.xlane.xlu1 %1783  ;;  %v3792_v40 = vpop.xlane.xlu0 %1311  ;;  %v1750_v43 = vmul.f32 %v2501_v26, %v3459_v4 }
 0x278   : > { %v1587_v49 = vadd.f32 %v1515_v33, %v3566_v11 }
 0x279   : > { %v1764_v3 = vsel %vm573_vm1, %v1750_v43, 0.0 }
 0x27a   : > { %1523 = vadd.xlane.f32.xlu1 %v1522_v39 }
 0x27b   : > { %1520 = vadd.xlane.f32.xlu0 %v1519_v23  ;;  %v1590_v23 = vadd.f32 %v1518_v50, %v3552_v52  ;;  %v1588_v50 = vadd.f32 %v1516_v47, %v3561_v15  ;;  %v3808_v47 = vpop.xlane.xlu0 %1541 }
 0x27d   : > { %v1600_v31 = vsel %vm573_vm1, %v1590_v23, -inf  ;;  %v1749_v23 = vmul.f32 %v2500_v51, %v3417_v29 }
 0x27e   : > { %1576 = vmax.xlane.f32.xlu1 %v1575_v58  ;;  %v1589_v58 = vadd.f32 %v1517_v35, %v3540_v46  ;;  %v1748_v35 = vmul.f32 %v2499_v17, %v3373_v53 }
 0x27f   : > { %1573 = vmax.xlane.f32.xlu0 %v1572_v5  ;;  %v3796_v5 = vpop.xlane.xlu1 %2019  ;;  %v3818_v17 = vpop.xlane.xlu0 %1547 }
 0x280   : > { %v3775_v39 = vpop.f32.mrb[28].mxu1  ;;  %v1597_v60 = vsel %vm573_vm1, %v1589_v58, -inf  ;;  %v2498_v58 = vsel %vm1735_vm10, 1.0, %v4052_v54  ;;  %v1758_v63 = vsel %vm573_vm1, %v1748_v35, 0.0  ;;  %v1799_v51 = vadd.f32 %v1748_v35, %v3561_v15 }
 0x281   : > { %v3780_v61 = vpop.f32.mrb[29].mxu1  ;;  %v1747_v26 = vmul.f32 %v2498_v58, %v3438_v41  ;;  %v1800_v54 = vadd.f32 %v1749_v23, %v3540_v46  ;;  %vm2209_vm2 = vcmp.gt.f32.partialorder %v3775_v39, 0.5 }
 0x282   : > { %1570 = vmax.xlane.f32.xlu1 %v1569_v6  ;;  %v3785_v12 = vpop.f32.mrb[30].mxu1  ;;  %v1594_v6 = vsel %vm573_vm1, %v1588_v50, -inf  ;;  %v1761_v50 = vsel %vm573_vm1, %v1749_v23, 0.0  ;;  %vm2207_vm3 = vcmp.gt.f32.partialorder %v3780_v61, 0.5 }
 0x283   : > { %1567 = vmax.xlane.f32.xlu0 %v1566_v0  ;;  %v3789_v36 = vpop.f32.mrb[31].mxu1  ;;  %v1591_v0 = vsel %vm573_vm1, %v1587_v49, -inf  ;;  %v3812_v33 = vpop.xlane.xlu1 %2255  ;;  %v1798_v28 = vadd.f32 %v1747_v26, %v3566_v11  ;;  %vm2210_vm15 = vcmp.gt.f32.partialorder %v3785_v12, 0.5 }
 0x284   : > { %4060 = vst [vmem:[#allocation9_spill] sm:$0xff] %v3812_v33  ;;  %v3827_v58 = vpop.xlane.xlu0 %1777  ;;  %v4062_v33 = vmov 0.0   ;;  %vm2208_vm0 = vcmp.gt.f32.partialorder %v3789_v36, 0.5 }
 0x285   : > { %v2511_v2 = vsel %vm1972_vm12, 1.0, %v4062_v33 }
 0x286   : > { %1601 = vmax.xlane.f32.xlu1 %v1600_v31  ;;  %v1801_v31 = vadd.f32 %v1750_v43, %v3552_v52 }
 0x287   : > { %1598 = vmax.xlane.f32.xlu0 %v1597_v60  ;;  %v3821_v49 = vpop.xlane.xlu1 %1786 }
 0x288   : > { %v1811_v60 = vsel %vm573_vm1, %v1801_v31, -inf }
 0x28a   : > { %1595 = vmax.xlane.f32.xlu1 %v1594_v6  ;;  %v1754_v6 = vsub.f32 %v3459_v4, %v1750_v43  ;;  %v1808_v4 = vsel %vm573_vm1, %v1800_v54, -inf  ;;  %v1753_v54 = vsub.f32 %v3417_v29, %v1749_v23  ;;  %v1751_v43 = vsub.f32 %v3438_v41, %v1747_v26 }
 0x28b   : > { %1592 = vmax.xlane.f32.xlu0 %v1591_v0  ;;  %v1755_v0 = vsel %vm573_vm1, %v1747_v26, 0.0  ;;  %v2512_v41 = vsel %vm1973_vm13, 1.0, %v4062_v33 }
 0x28c   : > { %v1826_v31 = vadd.f32 %v1754_v6, %v3552_v52  ;;  %v3874_v13 = vmul.f32 %v2512_v41, %v3431_v37 }
 0x28e   : > { %1759 = vadd.xlane.f32.xlu1 %v1758_v63  ;;  %v1752_v63 = vsub.f32 %v3373_v53, %v1748_v35  ;;  %v1836_v53 = vsel %vm573_vm1, %v1826_v31, -inf }
 0x28f   : > { %1762 = vadd.xlane.f32.xlu0 %v1761_v50  ;;  %v1805_v50 = vsel %vm573_vm1, %v1799_v51, -inf  ;;  %v3841_v51 = vpop.xlane.xlu0 %2013 }
 0x290   : > { %v1824_v35 = vadd.f32 %v1752_v63, %v3561_v15  ;;  %v1802_v63 = vsel %vm573_vm1, %v1798_v28, -inf }
 0x292   : > { %1812 = vmax.xlane.f32.xlu1 %v1811_v60  ;;  %v3835_v60 = vpop.xlane.xlu1 %2022  ;;  %v1830_v31 = vsel %vm573_vm1, %v1824_v35, -inf }
 0x293   : > { %1756 = vadd.xlane.f32.xlu0 %v1755_v0  ;;  %4061 = vst [vmem:[#allocation10_spill] sm:$0xff] %v3835_v60  ;;  %v2513_v0 = vsel %vm1974_vm11, 1.0, %v4062_v33 }
 0x294   : > { %v3847_v6 = vmul.f32 %v2513_v0, %v3474_v19  ;;  %v3862_v0 = vpop.xlane.xlu0 %2249 }
 0x295   : > { %4064 = vst [vmem:[#allocation12_spill] sm:$0xff] %v3862_v0 }
 0x296   : > { %1806 = vmax.xlane.f32.xlu1 %v1805_v50  ;;  %v1984_v50 = vmul.f32 %v2511_v2, %v3387_v1  ;;  %v2037_v23 = vadd.f32 %v3847_v6, %v3552_v52  ;;  %v607_v2 = vadd.f32 %v3598_v21, %v3680_v59  ;;  %v1990_v59 = vsub.f32 %v3474_v19, %v3847_v6 }
 0x297   : > { %1809 = vmax.xlane.f32.xlu0 %v1808_v4  ;;  %v3850_v4 = vpop.xlane.xlu1 %2258 }
 0x298   : > { %4063 = vst [vmem:[#allocation11_spill] sm:$0xff] %v3850_v4  ;;  %v1994_v29 = vsel %vm573_vm1, %v1984_v50, 0.0  ;;  %v2047_v28 = vsel %vm573_vm1, %v2037_v23, -inf  ;;  %v2062_v14 = vadd.f32 %v1990_v59, %v3552_v52  ;;  %v1988_v19 = vsub.f32 %v3387_v1, %v1984_v50 }
 0x29a   : > { %1837 = vmax.xlane.f32.xlu1 %v1836_v53  ;;  %v1825_v53 = vadd.f32 %v1753_v54, %v3540_v46  ;;  %v2035_v54 = vadd.f32 %v1984_v50, %v3561_v15  ;;  %v2072_v36 = vsel %vm573_vm1, %v2062_v14, -inf  ;;  %v2060_v1 = vadd.f32 %v1988_v19, %v3561_v15 }
 0x29b   : > { %1765 = vadd.xlane.f32.xlu0 %v1764_v3  ;;  %v1823_v3 = vadd.f32 %v1751_v43, %v3566_v11 }
 0x29c   : > { %v1833_v35 = vsel %vm573_vm1, %v1825_v53, -inf  ;;  %v2510_v53 = vsel %vm1971_vm14, 1.0, %v4062_v33 }
 0x29e   : > { %1831 = vmax.xlane.f32.xlu1 %v1830_v31  ;;  %v608_v31 = vadd.f32 %v607_v2, %v3689_v56  ;;  %v3885_v2 = vmul.f32 %v2510_v53, %v3452_v55 }
 0x29f   : > { %1803 = vmax.xlane.f32.xlu0 %v1802_v63  ;;  %v1827_v63 = vsel %vm573_vm1, %v1823_v3, -inf }
 0x2a0   : > { %v609_v56 = vadd.f32 %v608_v31, %v3608_v34  ;;  %v1991_v50 = vsel %vm573_vm1, %v3885_v2, 0.0  ;;  %v2036_v31 = vadd.f32 %v3874_v13, %v3540_v46 }
 0x2a2   : > { %1995 = vadd.xlane.f32.xlu1 %v1994_v29  ;;  %v2041_v29 = vsel %vm573_vm1, %v2035_v54, -inf  ;;  %v610_v41 = vrot.slane %v609_v56, 4  ;;  %v2523_v54 = vsel %vm2208_vm0, 1.0, %v4062_v33  ;;  %v2044_v4 = vsel %vm573_vm1, %v2036_v31, -inf }
 0x2a3   : > { %v582_v26 = vpop.xlane.xlu1 %581  ;;  %1834 = vmax.xlane.f32.xlu0 %v1833_v35  ;;  %v1997_v35 = vsel %vm573_vm1, %v3874_v13, 0.0 }
 0x2a4   : > { %v576_v21 = vpop.xlane.xlu0 %575 }
 0x2a6   : > { %2048 = vmax.xlane.f32.xlu1 %v2047_v28  ;;  %v2525_v28 = vsel %vm2210_vm15, 1.0, %v4062_v33 }
 0x2a7   : > { %v585_v43 = vpop.xlane.xlu1 %584  ;;  %1828 = vmax.xlane.f32.xlu0 %v1827_v63  ;;  %v3898_v53 = vmul.f32 %v2525_v28, %v3512_v62 }
 0x2a8   : > { %v629_v23 = vpop.xlane.xlu0 %628 }
 0x2a9   : > { %v2273_v28 = vadd.f32 %v3898_v53, %v3552_v52 }
 0x2aa   : > { %2042 = vmax.xlane.f32.xlu1 %v2041_v29  ;;  %v2220_v29 = vmul.f32 %v2523_v54, %v3401_v22 }
 0x2ab   : > { %v632_v3 = vpop.xlane.xlu1 %631  ;;  %1998 = vadd.xlane.f32.xlu0 %v1997_v35 }
 0x2ac   : > { %v579_v34 = vpop.xlane.xlu0 %578  ;;  %v634_v14 = vmax.f32 %v629_v23, %v632_v3  ;;  %v2034_v3 = vadd.f32 %v3885_v2, %v3566_v11 }
 0x2ad   : > { %v586_v12 = vadd.f32 %v579_v34, %v576_v21  ;;  %v611_v21 = vadd.f32 %v610_v41, %v609_v56 }
 0x2ae   : > { %2073 = vmax.xlane.f32.xlu1 %v2072_v36  ;;  %v2066_v36 = vsel %vm573_vm1, %v2060_v1, -inf  ;;  %v2271_v1 = vadd.f32 %v2220_v29, %v3561_v15 }
 0x2af   : > { %v587_v59 = vadd.f32 %v586_v12, %v582_v26  ;;  %v626_v63 = vpop.xlane.xlu1 %625  ;;  %1992 = vadd.xlane.f32.xlu0 %v1991_v50  ;;  %v2230_v12 = vsel %vm573_vm1, %v2220_v29, 0.0  ;;  %v612_v54 = vrot.slane %v611_v21, 2 }
 0x2b0   : > { %v623_v35 = vpop.xlane.xlu0 %622 }
 0x2b1   : > { %v588_v34 = vadd.f32 %v587_v59, %v585_v43  ;;  %v633_v19 = vmax.f32 %v623_v35, %v626_v63  ;;  %v2000_v43 = vsel %vm573_vm1, %v3847_v6, 0.0  ;;  %v2283_v63 = vsel %vm573_vm1, %v2273_v28, -inf }
 0x2b2   : > { %2067 = vmax.xlane.f32.xlu1 %v2066_v36  ;;  %v613_v35 = vadd.f32 %v612_v54, %v611_v21  ;;  %v844_v6 = vadd.f32 %v3618_v38, %v3711_v18  ;;  %v2277_v18 = vsel %vm573_vm1, %v2271_v1, -inf }
 0x2b3   : > { %v589_v0 = vrot.slane %v588_v34, 4  ;;  %v635_v60 = vmax.f32 %v633_v19, %v634_v14  ;;  %v657_v26 = vpop.xlane.xlu1 %656  ;;  %2045 = vmax.xlane.f32.xlu0 %v2044_v4  ;;  %v1989_v4 = vsub.f32 %v3431_v37, %v3874_v13  ;;  %v2038_v37 = vsel %vm573_vm1, %v2034_v3, -inf }
 0x2b4   : > { %v654_v56 = vpop.xlane.xlu0 %653  ;;  %v1987_v13 = vsub.f32 %v3452_v55, %v3885_v2  ;;  %v845_v55 = vadd.f32 %v844_v6, %v3723_v9 }
 0x2b5   : > { %v590_v41 = vadd.f32 %v589_v0, %v588_v34  ;;  %v636_v23 = vrot.slane %v635_v60, 4  ;;  %v2224_v0 = vsub.f32 %v3401_v22, %v2220_v29  ;;  %v659_v36 = vmax.f32 %v654_v56, %v657_v26 }
 0x2b6   : > { %2231 = vadd.xlane.f32.xlu1 %v2230_v12  ;;  %v2226_v22 = vsub.f32 %v3512_v62, %v3898_v53  ;;  %v2059_v2 = vadd.f32 %v1987_v13, %v3566_v11 }
 0x2b7   : > { %v591_v50 = vrot.slane %v590_v41, 2  ;;  %v637_v31 = vmax.f32 %v635_v60, %v636_v23  ;;  %v651_v59 = vpop.xlane.xlu1 %650  ;;  %2001 = vadd.xlane.f32.xlu0 %v2000_v43  ;;  %v2061_v60 = vadd.f32 %v1989_v4, %v3540_v46  ;;  %v2296_v26 = vadd.f32 %v2224_v0, %v3561_v15 }
 0x2b8   : > { %v648_v14 = vpop.xlane.xlu0 %647  ;;  %v614_v23 = vrot.slane %v613_v35, 1  ;;  %v2524_v43 = vsel %vm2209_vm2, 1.0, %v4062_v33  ;;  %v2298_v1 = vadd.f32 %v2226_v22, %v3552_v52  ;;  %v846_v0 = vadd.f32 %v845_v55, %v3632_v20 }
 0x2b9   : > { %v592_v34 = vadd.f32 %v591_v50, %v590_v41  ;;  %v638_v19 = vrot.slane %v637_v31, 2  ;;  %v658_v12 = vmax.f32 %v648_v14, %v651_v59  ;;  %v2069_v62 = vsel %vm573_vm1, %v2061_v60, -inf }
 0x2ba   : > { %2284 = vmax.xlane.f32.xlu1 %v2283_v63  ;;  %v2302_v39 = vsel %vm573_vm1, %v2296_v26, -inf  ;;  %v615_v63 = vadd.f32 %v614_v23, %v613_v35  ;;  %v3939_v6 = vmul.f32 %v2524_v43, %v3445_v48  ;;  %v2063_v14 = vsel %vm573_vm1, %v2059_v2, -inf }
 0x2bb   : > { %v639_v29 = vmax.f32 %v637_v31, %v638_v19  ;;  %v660_v21 = vmax.f32 %v658_v12, %v659_v36  ;;  %v822_v38 = vpop.xlane.xlu1 %821  ;;  %2039 = vmax.xlane.f32.xlu0 %v2038_v37  ;;  %v593_v28 = vrot.slane %v592_v34, 1  ;;  %v2522_v52 = vsel %vm2207_vm3, 1.0, %v4062_v33 }
 0x2bc   : > { %v819_v54 = vpop.xlane.xlu0 %818  ;;  %v2308_v36 = vsel %vm573_vm1, %v2298_v1, -inf  ;;  %v847_v13 = vrot.slane %v846_v0, 4  ;;  %v2233_v33 = vsel %vm573_vm1, %v3939_v6, 0.0  ;;  %v2272_v43 = vadd.f32 %v3939_v6, %v3540_v46 }
 0x2bd   : > { %v640_v56 = vrot.slane %v639_v29, 1  ;;  %v661_v41 = vrot.slane %v660_v21, 4  ;;  %v594_v4 = vadd.f32 %v593_v28, %v592_v34 }
 0x2be   : > { %2278 = vmax.xlane.f32.xlu1 %v2277_v18 }
 0x2bf   : > { %v662_v15 = vmax.f32 %v660_v21, %v661_v41  ;;  %v816_v3 = vpop.xlane.xlu1 %815  ;;  %2070 = vmax.xlane.f32.xlu0 %v2069_v62  ;;  %v641_v9 = vmax.f32 %v639_v29, %v640_v56  ;;  %v616_v35 = vsub.f32 %v615_v63, %v594_v4  ;;  %v673_v22 = vmul.f32 0.00012755101, %v594_v4 }
 0x2c0   : > { %v813_v50 = vpop.xlane.xlu0 %812  ;;  %v2219_v29 = vmul.f32 %v2522_v52, %v3466_v16  ;;  %v848_v62 = vadd.f32 %v847_v13, %v846_v0  ;;  %v1080_v52 = vadd.f32 %v3640_v10, %v3744_v27 }
 0x2c1   : > { %v663_v31 = vrot.slane %v662_v15, 2  ;;  %v823_v59 = vadd.f32 %v816_v3, %v813_v50  ;;  %v672_v12 = vmul.f32 0.9, %v641_v9 }
 0x2c2   : > { %2303 = vmax.xlane.f32.xlu1 %v2302_v39  ;;  %v2227_v2 = vsel %vm573_vm1, %v2219_v29, 0.0 }
 0x2c3   : > { %v664_v34 = vmax.f32 %v662_v15, %v663_v31  ;;  %v824_v61 = vadd.f32 %v823_v59, %v819_v54  ;;  %v869_v19 = vpop.xlane.xlu1 %868  ;;  %2064 = vmax.xlane.f32.xlu0 %v2063_v14  ;;  %v674_v28 = vadd.f32 %v673_v22, %v672_v12  ;;  %v668_v54 = vmul.f32 0.00012755101, %v616_v35 }
 0x2c4   : > { %v866_v20 = vpop.xlane.xlu0 %865  ;;  %v849_v31 = vrot.slane %v848_v62, 2  ;;  %v2280_v59 = vsel %vm573_vm1, %v2272_v43, -inf  ;;  %v2236_v35 = vsel %vm573_vm1, %v3898_v53, 0.0  ;;  %v2270_v12 = vadd.f32 %v2219_v29, %v3566_v11  ;;  %v2875_v53 = vld [vmem:[%s4045_s1] sm:$0xff] }
 0x2c5   : > { %v665_v37 = vrot.slane %v664_v34, 1  ;;  %v825_v60 = vadd.f32 %v824_v61, %v822_v38  ;;  %v871_v38 = vmax.f32 %v866_v20, %v869_v19  ;;  %v675_v1 = vsub.f32 1.0, %v674_v28 }
 0x2c6   : > { %2309 = vmax.xlane.f32.xlu1 %v2308_v36  ;;  %v850_v36 = vadd.f32 %v849_v31, %v848_v62  ;;  %v2223_v20 = vsub.f32 %v3466_v16, %v2219_v29  ;;  %v2225_v16 = vsub.f32 %v3445_v48, %v3939_v6 }
 0x2c7   : > { %v666_v21 = vmax.f32 %v664_v34, %v665_v37  ;;  %v826_v18 = vrot.slane %v825_v60, 4  ;;  %v863_v26 = vpop.xlane.xlu1 %862  ;;  %2234 = vadd.xlane.f32.xlu0 %v2233_v33 }
 0x2c8   : > { %v860_v56 = vpop.xlane.xlu0 %859  ;;  %v2295_v11 = vadd.f32 %v2875_v53, %v2223_v20 }
 0x2c9   : > { %v667_v41 = vmul.f32 0.9, %v666_v21  ;;  %v827_v23 = vadd.f32 %v826_v18, %v825_v60  ;;  %v870_v55 = vmax.f32 %v860_v56, %v863_v26  ;;  %v1081_v21 = vadd.f32 %v1080_v52, %v3757_v24 }
 0x2ca   : > { %v851_v18 = vrot.slane %v850_v36, 1  ;;  %v2274_v26 = vsel %vm573_vm1, %v2270_v12, -inf  ;;  %v2299_v62 = vsel %vm573_vm1, %v2295_v11, -inf }
 0x2cb   : > { %v669_v15 = vadd.f32 %v668_v54, %v667_v41  ;;  %v872_v3 = vmax.f32 %v870_v55, %v871_v38  ;;  %v894_v39 = vpop.xlane.xlu1 %893  ;;  %2228 = vadd.xlane.f32.xlu0 %v2227_v2  ;;  %v828_v4 = vrot.slane %v827_v23, 2  ;;  %v1082_v55 = vadd.f32 %v1081_v21, %v3650_v32  ;;  %v2876_v2 = vld [vmem:[%s4045_s1 + $0x10] sm:$0xff] }
 0x2cc   : > { %v891_v9 = vpop.xlane.xlu0 %890  ;;  %v852_v38 = vadd.f32 %v851_v18, %v850_v36  ;;  %v2297_v43 = vadd.f32 %v2876_v2, %v2225_v16 }
 0x2cd   : > { %671 = vst.msk [vmem:[%s3954_s14] sm:$0x1] %vm670_vm4, %v669_v15  ;;  %v873_v50 = vrot.slane %v872_v3, 4  ;;  %v829_v46 = vadd.f32 %v828_v4, %v827_v23  ;;  %v896_v61 = vmax.f32 %v891_v9, %v894_v39 }
 0x2ce   : > { %677 = vst.msk [vmem:[%s3954_s14] sm:$0x1] %vm676_vm5, %v675_v1  ;;  %v2305_v32 = vsel %vm573_vm1, %v2297_v43, -inf }
 0x2cf   : > { %v874_v63 = vmax.f32 %v872_v3, %v873_v50  ;;  %v888_v0 = vpop.xlane.xlu1 %887  ;;  %2281 = vmax.xlane.f32.xlu0 %v2280_v59  ;;  %v830_v22 = vrot.slane %v829_v46, 1  ;;  %v1083_v50 = vrot.slane %v1082_v55, 4 }
 0x2d0   : > { %v885_v14 = vpop.xlane.xlu0 %884 }
 0x2d1   : > { %v875_v34 = vrot.slane %v874_v63, 2  ;;  %v895_v19 = vmax.f32 %v885_v14, %v888_v0  ;;  %v831_v54 = vadd.f32 %v830_v22, %v829_v46 }
 0x2d3   : > { %v876_v37 = vmax.f32 %v874_v63, %v875_v34  ;;  %v897_v60 = vmax.f32 %v895_v19, %v896_v61  ;;  %v1058_v13 = vpop.xlane.xlu1 %1057  ;;  %2237 = vadd.xlane.f32.xlu0 %v2236_v35  ;;  %v853_v3 = vsub.f32 %v852_v38, %v831_v54  ;;  %v910_v31 = vmul.f32 0.00012755101, %v831_v54 }
 0x2d4   : > { %v1055_v33 = vpop.xlane.xlu0 %1054  ;;  %v1084_v35 = vadd.f32 %v1083_v50, %v1082_v55 }
 0x2d5   : > { %v877_v10 = vrot.slane %v876_v37, 1  ;;  %v898_v27 = vrot.slane %v897_v60, 4  ;;  %v905_v14 = vmul.f32 0.00012755101, %v853_v3 }
 0x2d6   : > { %v1085_v21 = vrot.slane %v1084_v35, 2 }
 0x2d7   : > { %v899_v29 = vmax.f32 %v897_v60, %v898_v27  ;;  %v1052_v28 = vpop.xlane.xlu1 %1051  ;;  %2275 = vmax.xlane.f32.xlu0 %v2274_v26  ;;  %v878_v56 = vmax.f32 %v876_v37, %v877_v10 }
 0x2d8   : > { %v1049_v41 = vpop.xlane.xlu0 %1048 }
 0x2d9   : > { %v900_v24 = vrot.slane %v899_v29, 2  ;;  %v1059_v23 = vadd.f32 %v1052_v28, %v1049_v41  ;;  %v909_v39 = vmul.f32 0.9, %v878_v56  ;;  %v1316_v28 = vadd.f32 %v3668_v57, %v3769_v7 }
 0x2db   : > { %v901_v15 = vmax.f32 %v899_v29, %v900_v24  ;;  %v1060_v48 = vadd.f32 %v1059_v23, %v1055_v33  ;;  %v1105_v6 = vpop.xlane.xlu1 %1104  ;;  %2300 = vmax.xlane.f32.xlu0 %v2299_v62  ;;  %v911_v46 = vadd.f32 %v910_v31, %v909_v39  ;;  %v1086_v29 = vadd.f32 %v1085_v21, %v1084_v35 }
 0x2dc   : > { %v1102_v1 = vpop.xlane.xlu0 %1101  ;;  %v1317_v2 = vadd.f32 %v1316_v28, %v3792_v40 }
 0x2dd   : > { %v902_v4 = vrot.slane %v901_v15, 1  ;;  %v1061_v9 = vadd.f32 %v1060_v48, %v1058_v13  ;;  %v1107_v19 = vmax.f32 %v1102_v1, %v1105_v6  ;;  %v912_v60 = vsub.f32 1.0, %v911_v46 }
 0x2de   : > { %v1087_v62 = vrot.slane %v1086_v29, 1  ;;  %v1318_v57 = vadd.f32 %v1317_v2, %v3683_v25 }
 0x2df   : > { %v903_v59 = vmax.f32 %v901_v15, %v902_v4  ;;  %v1062_v63 = vrot.slane %v1061_v9, 4  ;;  %v1099_v0 = vpop.xlane.xlu1 %1098  ;;  %2306 = vmax.xlane.f32.xlu0 %v2305_v32 }
 0x2e0   : > { %v1096_v52 = vpop.xlane.xlu0 %1095  ;;  %v1088_v4 = vadd.f32 %v1087_v62, %v1086_v29  ;;  %v1319_v46 = vrot.slane %v1318_v57, 4 }
 0x2e1   : > { %v904_v34 = vmul.f32 0.9, %v903_v59  ;;  %v1063_v61 = vadd.f32 %v1062_v63, %v1061_v9  ;;  %v1106_v36 = vmax.f32 %v1096_v52, %v1099_v0 }
 0x2e3   : > { %v906_v12 = vadd.f32 %v905_v14, %v904_v34  ;;  %v1108_v20 = vmax.f32 %v1106_v36, %v1107_v19  ;;  %v1130_v37 = vpop.xlane.xlu1 %1129  ;;  %v1064_v13 = vrot.slane %v1063_v61, 2 }
 0x2e4   : > { %v1127_v22 = vpop.xlane.xlu0 %1126 }
 0x2e5   : > { %2454 = vst.msk [vmem:[%s3954_s14 + $0x1] sm:$0x1] %vm670_vm4, %v906_v12  ;;  %v1109_v33 = vrot.slane %v1108_v20, 4  ;;  %v1065_v18 = vadd.f32 %v1064_v13, %v1063_v61  ;;  %v1132_v11 = vmax.f32 %v1127_v22, %v1130_v37  ;;  %v1320_v37 = vadd.f32 %v1319_v46, %v1318_v57 }
 0x2e6   : > { %2455 = vst.msk [vmem:[%s3954_s14 + $0x1] sm:$0x1] %vm676_vm5, %v912_v60 }
 0x2e7   : > { %v1110_v10 = vmax.f32 %v1108_v20, %v1109_v33  ;;  %v1124_v27 = vpop.xlane.xlu1 %1123  ;;  %v1066_v24 = vrot.slane %v1065_v18, 1 }
 0x2e8   : > { %v1121_v26 = vpop.xlane.xlu0 %1120 }
 0x2e9   : > { %v1111_v53 = vrot.slane %v1110_v10, 2  ;;  %v1131_v16 = vmax.f32 %v1121_v26, %v1124_v27  ;;  %v1067_v48 = vadd.f32 %v1066_v24, %v1065_v18  ;;  %v1321_v18 = vrot.slane %v1320_v37, 2 }
 0x2eb   : > { %v1112_v54 = vmax.f32 %v1110_v10, %v1111_v53  ;;  %v1133_v56 = vmax.f32 %v1131_v16, %v1132_v11  ;;  %v1294_v41 = vpop.xlane.xlu1 %1293  ;;  %v1089_v31 = vsub.f32 %v1088_v4, %v1067_v48  ;;  %v1146_v40 = vmul.f32 0.00012755101, %v1067_v48 }
 0x2ec   : > { %v1291_v23 = vpop.xlane.xlu0 %1290 }
 0x2ed   : > { %v1113_v38 = vrot.slane %v1112_v54, 1  ;;  %v1134_v55 = vrot.slane %v1133_v56, 4  ;;  %v1141_v19 = vmul.f32 0.00012755101, %v1089_v31 }
 0x2ef   : > { %v1135_v43 = vmax.f32 %v1133_v56, %v1134_v55  ;;  %v1288_v15 = vpop.xlane.xlu1 %1287  ;;  %v1114_v6 = vmax.f32 %v1112_v54, %v1113_v38  ;;  %v1322_v56 = vadd.f32 %v1321_v18, %v1320_v37 }
 0x2f0   : > { %v1285_v3 = vpop.xlane.xlu0 %1284 }
 0x2f1   : > { %v1136_v39 = vrot.slane %v1135_v43, 2  ;;  %v1295_v1 = vadd.f32 %v1288_v15, %v1285_v3  ;;  %v1145_v32 = vmul.f32 0.9, %v1114_v6  ;;  %v1323_v15 = vrot.slane %v1322_v56, 1 }
 0x2f3   : > { %v1137_v7 = vmax.f32 %v1135_v43, %v1136_v39  ;;  %v1296_v9 = vadd.f32 %v1295_v1, %v1291_v23  ;;  %v1341_v50 = vpop.xlane.xlu1 %1340  ;;  %v1147_v61 = vadd.f32 %v1146_v40, %v1145_v32 }
 0x2f4   : > { %v1338_v59 = vpop.xlane.xlu0 %1337 }
 0x2f5   : > { %v1138_v63 = vrot.slane %v1137_v7, 1  ;;  %v1297_v0 = vadd.f32 %v1296_v9, %v1294_v41  ;;  %v1343_v12 = vmax.f32 %v1338_v59, %v1341_v50  ;;  %v1148_v33 = vsub.f32 1.0, %v1147_v61 }
 0x2f6   : > { %v1552_v41 = vadd.f32 %v3695_v45, %v3808_v47  ;;  %v1324_v9 = vadd.f32 %v1323_v15, %v1322_v56 }
 0x2f7   : > { %v1139_v14 = vmax.f32 %v1137_v7, %v1138_v63  ;;  %v1298_v52 = vrot.slane %v1297_v0, 4  ;;  %v1335_v34 = vpop.xlane.xlu1 %1334 }
 0x2f8   : > { %v1332_v36 = vpop.xlane.xlu0 %1331  ;;  %v1553_v48 = vadd.f32 %v1552_v41, %v3818_v17 }
 0x2f9   : > { %v1140_v35 = vmul.f32 0.9, %v1139_v14  ;;  %v1299_v25 = vadd.f32 %v1298_v52, %v1297_v0  ;;  %v1342_v20 = vmax.f32 %v1332_v36, %v1335_v34 }
 0x2fa   : > { %v1554_v45 = vadd.f32 %v1553_v48, %v3713_v8 }
 0x2fb   : > { %v1142_v60 = vadd.f32 %v1141_v19, %v1140_v35  ;;  %v1344_v13 = vmax.f32 %v1342_v20, %v1343_v12  ;;  %v1366_v22 = vpop.xlane.xlu1 %1365  ;;  %v1300_v21 = vrot.slane %v1299_v25, 2 }
 0x2fc   : > { %v1363_v10 = vpop.xlane.xlu0 %1362  ;;  %v1555_v17 = vrot.slane %v1554_v45, 4 }
 0x2fd   : > { %2466 = vst.msk [vmem:[%s3954_s14 + $0x2] sm:$0x1] %vm670_vm4, %v1142_v60  ;;  %v1345_v27 = vrot.slane %v1344_v13, 4  ;;  %v1301_v11 = vadd.f32 %v1300_v21, %v1299_v25  ;;  %v1368_v28 = vmax.f32 %v1363_v10, %v1366_v22 }
 0x2fe   : > { %2467 = vst.msk [vmem:[%s3954_s14 + $0x2] sm:$0x1] %vm676_vm5, %v1148_v33  ;;  %v1556_v20 = vadd.f32 %v1555_v17, %v1554_v45 }
 0x2ff   : > { %v1346_v26 = vmax.f32 %v1344_v13, %v1345_v27  ;;  %v1360_v53 = vpop.xlane.xlu1 %1359  ;;  %v1302_v55 = vrot.slane %v1301_v11, 1 }
 0x300   : > { %v1357_v16 = vpop.xlane.xlu0 %1356  ;;  %v1557_v27 = vrot.slane %v1556_v20, 2 }
 0x301   : > { %v1347_v29 = vrot.slane %v1346_v26, 2  ;;  %v1367_v54 = vmax.f32 %v1357_v16, %v1360_v53  ;;  %v1303_v39 = vadd.f32 %v1302_v55, %v1301_v11 }
 0x303   : > { %v1348_v24 = vmax.f32 %v1346_v26, %v1347_v29  ;;  %v1369_v23 = vmax.f32 %v1367_v54, %v1368_v28  ;;  %v1530_v38 = vpop.xlane.xlu1 %1529  ;;  %v1325_v32 = vsub.f32 %v1324_v9, %v1303_v39  ;;  %v1382_v40 = vmul.f32 0.00012755101, %v1303_v39 }
 0x304   : > { %v1527_v62 = vpop.xlane.xlu0 %1526  ;;  %v1558_v54 = vadd.f32 %v1557_v27, %v1556_v20 }
 0x305   : > { %v1349_v2 = vrot.slane %v1348_v24, 1  ;;  %v1370_v43 = vrot.slane %v1369_v23, 4  ;;  %v1377_v19 = vmul.f32 0.00012755101, %v1325_v32 }
 0x307   : > { %v1371_v6 = vmax.f32 %v1369_v23, %v1370_v43  ;;  %v1524_v3 = vpop.xlane.xlu1 %1523  ;;  %v1350_v1 = vmax.f32 %v1348_v24, %v1349_v2  ;;  %v1559_v2 = vrot.slane %v1558_v54, 1  ;;  %v1788_v43 = vadd.f32 %v3727_v44, %v3827_v58 }
 0x308   : > { %v1521_v4 = vpop.xlane.xlu0 %1520 }
 0x309   : > { %v1372_v57 = vrot.slane %v1371_v6, 2  ;;  %v1531_v7 = vadd.f32 %v1524_v3, %v1521_v4  ;;  %v1381_v59 = vmul.f32 0.9, %v1350_v1  ;;  %v1560_v4 = vadd.f32 %v1559_v2, %v1558_v54 }
 0x30b   : > { %v1373_v47 = vmax.f32 %v1371_v6, %v1372_v57  ;;  %v1532_v50 = vadd.f32 %v1531_v7, %v1527_v62  ;;  %v1577_v31 = vpop.xlane.xlu1 %1576  ;;  %v1383_v61 = vadd.f32 %v1382_v40, %v1381_v59  ;;  %v1789_v57 = vadd.f32 %v1788_v43, %v3773_v30 }
 0x30c   : > { %v1574_v63 = vpop.xlane.xlu0 %1573 }
 0x30d   : > { %v1374_v0 = vrot.slane %v1373_v47, 1  ;;  %v1533_v46 = vadd.f32 %v1532_v50, %v1530_v38  ;;  %v1579_v25 = vmax.f32 %v1574_v63, %v1577_v31  ;;  %v1384_v22 = vsub.f32 1.0, %v1383_v61 }
 0x30e   : > { %v1790_v44 = vadd.f32 %v1789_v57, %v3821_v49 }
 0x30f   : > { %v1375_v14 = vmax.f32 %v1373_v47, %v1374_v0  ;;  %v1534_v52 = vrot.slane %v1533_v46, 4  ;;  %v1571_v34 = vpop.xlane.xlu1 %1570 }
 0x310   : > { %v1568_v36 = vpop.xlane.xlu0 %1567 }
 0x311   : > { %v1376_v35 = vmul.f32 0.9, %v1375_v14  ;;  %v1535_v8 = vadd.f32 %v1534_v52, %v1533_v46  ;;  %v1578_v12 = vmax.f32 %v1568_v36, %v1571_v34  ;;  %v1791_v52 = vrot.slane %v1790_v44, 4 }
 0x313   : > { %v1378_v37 = vadd.f32 %v1377_v19, %v1376_v35  ;;  %v1580_v60 = vmax.f32 %v1578_v12, %v1579_v25  ;;  %v1602_v13 = vpop.xlane.xlu1 %1601  ;;  %v1536_v21 = vrot.slane %v1535_v8, 2  ;;  %v1792_v49 = vadd.f32 %v1791_v52, %v1790_v44 }
 0x314   : > { %v1599_v33 = vpop.xlane.xlu0 %1598 }
 0x315   : > { %2478 = vst.msk [vmem:[%s3954_s14 + $0x3] sm:$0x1] %vm670_vm4, %v1378_v37  ;;  %v1581_v10 = vrot.slane %v1580_v60, 4  ;;  %v1537_v11 = vadd.f32 %v1536_v21, %v1535_v8  ;;  %v1604_v29 = vmax.f32 %v1599_v33, %v1602_v13 }
 0x316   : > { %2479 = vst.msk [vmem:[%s3954_s14 + $0x3] sm:$0x1] %vm676_vm5, %v1384_v22  ;;  %v1793_v22 = vrot.slane %v1792_v49, 2 }
 0x317   : > { %v1582_v18 = vmax.f32 %v1580_v60, %v1581_v10  ;;  %v1596_v26 = vpop.xlane.xlu1 %1595  ;;  %v1538_v38 = vrot.slane %v1537_v11, 1 }
 0x318   : > { %v1593_v53 = vpop.xlane.xlu0 %1592 }
 0x319   : > { %v1583_v16 = vrot.slane %v1582_v18, 2  ;;  %v1603_v28 = vmax.f32 %v1593_v53, %v1596_v26  ;;  %v1539_v39 = vadd.f32 %v1538_v38, %v1537_v11  ;;  %v1794_v11 = vadd.f32 %v1793_v22, %v1792_v49 }
 0x31b   : > { %v1584_v56 = vmax.f32 %v1582_v18, %v1583_v16  ;;  %v1605_v41 = vmax.f32 %v1603_v28, %v1604_v29  ;;  %v1760_v24 = vpop.xlane.xlu1 %1759  ;;  %v1561_v31 = vsub.f32 %v1560_v4, %v1539_v39  ;;  %v1618_v59 = vmul.f32 0.00012755101, %v1539_v39 }
 0x31c   : > { %v1763_v23 = vpop.xlane.xlu0 %1762 }
 0x31d   : > { %v1585_v55 = vrot.slane %v1584_v56, 1  ;;  %v1606_v62 = vrot.slane %v1605_v41, 4  ;;  %v1613_v40 = vmul.f32 0.00012755101, %v1561_v31 }
 0x31f   : > { %v1607_v15 = vmax.f32 %v1605_v41, %v1606_v62  ;;  %v1813_v48 = vpop.xlane.xlu1 %1812  ;;  %v1586_v6 = vmax.f32 %v1584_v56, %v1585_v55 }
 0x320   : > { %v1757_v3 = vpop.xlane.xlu0 %1756 }
 0x321   : > { %v1608_v1 = vrot.slane %v1607_v15, 2  ;;  %v1767_v9 = vadd.f32 %v1760_v24, %v1757_v3  ;;  %v1617_v45 = vmul.f32 0.9, %v1586_v6  ;;  %v1795_v24 = vrot.slane %v1794_v11, 1 }
 0x323   : > { %v1609_v7 = vmax.f32 %v1607_v15, %v1608_v1  ;;  %v1807_v47 = vpop.xlane.xlu1 %1806  ;;  %v1768_v63 = vadd.f32 %v1767_v9, %v1763_v23  ;;  %v1619_v0 = vadd.f32 %v1618_v59, %v1617_v45  ;;  %v2024_v23 = vadd.f32 %v3749_v42, %v3841_v51 }
 0x324   : > { %v1810_v50 = vpop.xlane.xlu0 %1809 }
 0x325   : > { %v1610_v32 = vrot.slane %v1609_v7, 1  ;;  %v1620_v19 = vsub.f32 1.0, %v1619_v0  ;;  %v1815_v35 = vmax.f32 %v1810_v50, %v1813_v48  ;;  %v1796_v48 = vadd.f32 %v1795_v24, %v1794_v11 }
 0x326   : > { %v2025_v6 = vadd.f32 %v2024_v23, %v3796_v5 }
 0x327   : > { %v1611_v58 = vmax.f32 %v1609_v7, %v1610_v32  ;;  %v1838_v30 = vpop.xlane.xlu1 %1837 }
 0x328   : > { %v1766_v46 = vpop.xlane.xlu0 %1765 }
 0x329   : > { %v1612_v17 = vmul.f32 0.9, %v1611_v58  ;;  %v1769_v14 = vadd.f32 %v1768_v63, %v1766_v46 }
 0x32b   : > { %v1614_v34 = vadd.f32 %v1613_v40, %v1612_v17  ;;  %v1770_v61 = vrot.slane %v1769_v14, 4  ;;  %v1832_v20 = vpop.xlane.xlu1 %1831 }
 0x32c   : > { %v1804_v36 = vpop.xlane.xlu0 %1803 }
 0x32d   : > { %2490 = vst.msk [vmem:[%s3954_s14 + $0x4] sm:$0x1] %vm670_vm4, %v1614_v34  ;;  %v1771_v8 = vadd.f32 %v1770_v61, %v1769_v14  ;;  %v1814_v25 = vmax.f32 %v1804_v36, %v1807_v47  ;;  %v4065_v47 = vld [vmem:[#allocation10_spill] sm:$0xff] }
 0x32e   : > { %2491 = vst.msk [vmem:[%s3954_s14 + $0x4] sm:$0x1] %vm676_vm5, %v1620_v19  ;;  %v2026_v42 = vadd.f32 %v2025_v6, %v4065_v47 }
 0x32f   : > { %v1816_v12 = vmax.f32 %v1814_v25, %v1815_v35  ;;  %v1772_v60 = vrot.slane %v1771_v8, 2  ;;  %v1996_v53 = vpop.xlane.xlu1 %1995 }
 0x330   : > { %v1835_v37 = vpop.xlane.xlu0 %1834  ;;  %v2027_v5 = vrot.slane %v2026_v42, 4 }
 0x331   : > { %v1817_v13 = vrot.slane %v1816_v12, 4  ;;  %v1773_v10 = vadd.f32 %v1772_v60, %v1771_v8  ;;  %v1840_v18 = vmax.f32 %v1835_v37, %v1838_v30 }
 0x332   : > { %v2028_v34 = vadd.f32 %v2027_v5, %v2026_v42 }
 0x333   : > { %v1818_v33 = vmax.f32 %v1816_v12, %v1817_v13  ;;  %v1774_v54 = vrot.slane %v1773_v10, 1  ;;  %v2049_v62 = vpop.xlane.xlu1 %2048 }
 0x334   : > { %v1829_v21 = vpop.xlane.xlu0 %1828  ;;  %v2029_v25 = vrot.slane %v2028_v34, 2 }
 0x335   : > { %v1819_v27 = vrot.slane %v1818_v33, 2  ;;  %v1839_v26 = vmax.f32 %v1829_v21, %v1832_v20  ;;  %v1775_v43 = vadd.f32 %v1774_v54, %v1773_v10 }
 0x336   : > { %v2030_v22 = vadd.f32 %v2029_v25, %v2028_v34 }
 0x337   : > { %v1820_v16 = vmax.f32 %v1818_v33, %v1819_v27  ;;  %v1841_v29 = vmax.f32 %v1839_v26, %v1840_v18  ;;  %v1797_v57 = vsub.f32 %v1796_v48, %v1775_v43  ;;  %v1854_v9 = vmul.f32 0.00012755101, %v1775_v43  ;;  %v2043_v45 = vpop.xlane.xlu1 %2042 }
 0x338   : > { %v1999_v28 = vpop.xlane.xlu0 %1998  ;;  %v2031_v11 = vrot.slane %v2030_v22, 1 }
 0x339   : > { %v1821_v56 = vrot.slane %v1820_v16, 1  ;;  %v1842_v41 = vrot.slane %v1841_v29, 4  ;;  %v1849_v59 = vmul.f32 0.00012755101, %v1797_v57 }
 0x33b   : > { %v1843_v38 = vmax.f32 %v1841_v29, %v1842_v41  ;;  %v1822_v55 = vmax.f32 %v1820_v16, %v1821_v56  ;;  %v2074_v40 = vpop.xlane.xlu1 %2073  ;;  %v4066_v16 = vld [vmem:[#allocation12_spill] sm:$0xff] }
 0x33c   : > { %v1993_v2 = vpop.xlane.xlu0 %1992  ;;  %v4067_v29 = vld [vmem:[#allocation8_spill] sm:$0xff] }
 0x33d   : > { %v1844_v15 = vrot.slane %v1843_v38, 2  ;;  %v2003_v39 = vadd.f32 %v1996_v53, %v1993_v2  ;;  %v1853_v1 = vmul.f32 0.9, %v1822_v55  ;;  %v2032_v55 = vadd.f32 %v2031_v11, %v2030_v22 }
 0x33f   : > { %v1845_v3 = vmax.f32 %v1843_v38, %v1844_v15  ;;  %v2004_v50 = vadd.f32 %v2003_v39, %v1999_v28  ;;  %v1855_v31 = vadd.f32 %v1854_v9, %v1853_v1  ;;  %v2068_v8 = vpop.xlane.xlu1 %2067  ;;  %v2260_v28 = vadd.f32 %v4067_v29, %v4066_v16 }
 0x340   : > { %v2046_v4 = vpop.xlane.xlu0 %2045 }
 0x341   : > { %v1846_v7 = vrot.slane %v1845_v3, 1  ;;  %v1856_v46 = vsub.f32 1.0, %v1855_v31  ;;  %v2051_v14 = vmax.f32 %v2046_v4, %v2049_v62  ;;  %v4068_v62 = vld [vmem:[#allocation9_spill] sm:$0xff]  ;;  %v4069_v4 = vld [vmem:[#allocation11_spill] sm:$0xff] }
 0x342   : > { %v2261_v2 = vadd.f32 %v2260_v28, %v4068_v62 }
 0x343   : > { %v1847_v51 = vmax.f32 %v1845_v3, %v1846_v7  ;;  %v2232_v10 = vpop.xlane.xlu1 %2231 }
 0x344   : > { %v2002_v32 = vpop.xlane.xlu0 %2001  ;;  %v2262_v57 = vadd.f32 %v2261_v2, %v4069_v4 }
 0x345   : > { %v1848_v44 = vmul.f32 0.9, %v1847_v51  ;;  %v2005_v58 = vadd.f32 %v2004_v50, %v2002_v32 }
 0x346   : > { %v2263_v32 = vrot.slane %v2262_v57, 4 }
 0x347   : > { %v1850_v63 = vadd.f32 %v1849_v59, %v1848_v44  ;;  %v2006_v0 = vrot.slane %v2005_v58, 4  ;;  %v2285_v38 = vpop.xlane.xlu1 %2284 }
 0x348   : > { %v2040_v17 = vpop.xlane.xlu0 %2039 }
 0x349   : > { %2502 = vst.msk [vmem:[%s3954_s14 + $0x5] sm:$0x1] %vm670_vm4, %v1850_v63  ;;  %v2007_v30 = vadd.f32 %v2006_v0, %v2005_v58  ;;  %v2050_v52 = vmax.f32 %v2040_v17, %v2043_v45  ;;  %v2264_v17 = vadd.f32 %v2263_v32, %v2262_v57 }
 0x34a   : > { %2503 = vst.msk [vmem:[%s3954_s14 + $0x5] sm:$0x1] %vm676_vm5, %v1856_v46 }
 0x34b   : > { %v2052_v61 = vmax.f32 %v2050_v52, %v2051_v14  ;;  %v2008_v36 = vrot.slane %v2007_v30, 2  ;;  %v2279_v47 = vpop.xlane.xlu1 %2278 }
 0x34c   : > { %v2071_v19 = vpop.xlane.xlu0 %2070 }
 0x34d   : > { %v2053_v35 = vrot.slane %v2052_v61, 4  ;;  %v2009_v20 = vadd.f32 %v2008_v36, %v2007_v30  ;;  %v2076_v60 = vmax.f32 %v2071_v19, %v2074_v40 }
 0x34f   : > { %v2054_v49 = vmax.f32 %v2052_v61, %v2053_v35  ;;  %v2010_v18 = vrot.slane %v2009_v20, 1  ;;  %v2304_v40 = vpop.xlane.xlu1 %2303  ;;  %v2265_v61 = vrot.slane %v2264_v17, 2 }
 0x350   : > { %v2065_v12 = vpop.xlane.xlu0 %2064 }
 0x351   : > { %v2055_v37 = vrot.slane %v2054_v49, 2  ;;  %v2075_v13 = vmax.f32 %v2065_v12, %v2068_v8  ;;  %v2011_v24 = vadd.f32 %v2010_v18, %v2009_v20  ;;  %v2266_v20 = vadd.f32 %v2265_v61, %v2264_v17 }
 0x353   : > { %v2056_v33 = vmax.f32 %v2054_v49, %v2055_v37  ;;  %v2077_v21 = vmax.f32 %v2075_v13, %v2076_v60  ;;  %v2033_v3 = vsub.f32 %v2032_v55, %v2011_v24  ;;  %v2090_v1 = vmul.f32 0.00012755101, %v2011_v24  ;;  %v2310_v36 = vpop.xlane.xlu1 %2309 }
 0x354   : > { %v2235_v27 = vpop.xlane.xlu0 %2234 }
 0x355   : > { %v2057_v26 = vrot.slane %v2056_v33, 1  ;;  %v2078_v53 = vrot.slane %v2077_v21, 4  ;;  %v2085_v51 = vmul.f32 0.00012755101, %v2033_v3 }
 0x357   : > { %v2079_v54 = vmax.f32 %v2077_v21, %v2078_v53  ;;  %v2058_v56 = vmax.f32 %v2056_v33, %v2057_v26  ;;  %v2267_v21 = vrot.slane %v2266_v20, 1 }
 0x358   : > { %v2229_v41 = vpop.xlane.xlu0 %2228 }
 0x359   : > { %v2080_v23 = vrot.slane %v2079_v54, 2  ;;  %v2239_v15 = vadd.f32 %v2232_v10, %v2229_v41  ;;  %v2089_v48 = vmul.f32 0.9, %v2058_v56  ;;  %v2268_v53 = vadd.f32 %v2267_v21, %v2266_v20 }
 0x35b   : > { %v2081_v43 = vmax.f32 %v2079_v54, %v2080_v23  ;;  %v2240_v9 = vadd.f32 %v2239_v15, %v2235_v27  ;;  %v2091_v45 = vadd.f32 %v2090_v1, %v2089_v48 }
 0x35c   : > { %v2282_v6 = vpop.xlane.xlu0 %2281 }
 0x35d   : > { %v2082_v39 = vrot.slane %v2081_v43, 1  ;;  %v2092_v58 = vsub.f32 1.0, %v2091_v45  ;;  %v2287_v63 = vmax.f32 %v2282_v6, %v2285_v38 }
 0x35f   : > { %v2083_v7 = vmax.f32 %v2081_v43, %v2082_v39 }
 0x360   : > { %v2238_v42 = vpop.xlane.xlu0 %2237 }
 0x361   : > { %v2084_v50 = vmul.f32 0.9, %v2083_v7  ;;  %v2241_v31 = vadd.f32 %v2240_v9, %v2238_v42 }
 0x363   : > { %v2086_v59 = vadd.f32 %v2085_v51, %v2084_v50  ;;  %v2242_v44 = vrot.slane %v2241_v31, 4 }
 0x364   : > { %v2276_v5 = vpop.xlane.xlu0 %2275 }
 0x365   : > { %2514 = vst.msk [vmem:[%s3954_s14 + $0x6] sm:$0x1] %vm670_vm4, %v2086_v59  ;;  %v2243_v0 = vadd.f32 %v2242_v44, %v2241_v31  ;;  %v2286_v46 = vmax.f32 %v2276_v5, %v2279_v47 }
 0x366   : > { %2515 = vst.msk [vmem:[%s3954_s14 + $0x6] sm:$0x1] %vm676_vm5, %v2092_v58 }
 0x367   : > { %v2288_v14 = vmax.f32 %v2286_v46, %v2287_v63  ;;  %v2244_v52 = vrot.slane %v2243_v0, 2 }
 0x368   : > { %v2301_v30 = vpop.xlane.xlu0 %2300 }
 0x369   : > { %v2289_v34 = vrot.slane %v2288_v14, 4  ;;  %v2245_v8 = vadd.f32 %v2244_v52, %v2243_v0  ;;  %v2311_v49 = vmax.f32 %v2301_v30, %v2304_v40 }
 0x36b   : > { %v2290_v19 = vmax.f32 %v2288_v14, %v2289_v34  ;;  %v2246_v13 = vrot.slane %v2245_v8, 1 }
 0x36c   : > { %v2307_v35 = vpop.xlane.xlu0 %2306 }
 0x36d   : > { %v2291_v25 = vrot.slane %v2290_v19, 2  ;;  %v2312_v12 = vmax.f32 %v2307_v35, %v2310_v36  ;;  %v2247_v18 = vadd.f32 %v2246_v13, %v2245_v8 }
 0x36f   : > { %v2292_v37 = vmax.f32 %v2290_v19, %v2291_v25  ;;  %v2313_v60 = vmax.f32 %v2311_v49, %v2312_v12  ;;  %v2269_v29 = vsub.f32 %v2268_v53, %v2247_v18  ;;  %v2326_v54 = vmul.f32 0.00012755101, %v2247_v18 }
 0x371   : > { %v2293_v22 = vrot.slane %v2292_v37, 1  ;;  %v2314_v33 = vrot.slane %v2313_v60, 4  ;;  %v2321_v24 = vmul.f32 0.00012755101, %v2269_v29 }
 0x373   : > { %v2315_v10 = vmax.f32 %v2313_v60, %v2314_v33  ;;  %v2294_v27 = vmax.f32 %v2292_v37, %v2293_v22 }
 0x375   : > { %v2316_v26 = vrot.slane %v2315_v10, 2  ;;  %v2325_v16 = vmul.f32 0.9, %v2294_v27 }
 0x377   : > { %v2317_v11 = vmax.f32 %v2315_v10, %v2316_v26  ;;  %v2327_v41 = vadd.f32 %v2326_v54, %v2325_v16 }
 0x379   : > { %v2318_v28 = vrot.slane %v2317_v11, 1  ;;  %v2328_v55 = vsub.f32 1.0, %v2327_v41 }
 0x37b   : > { %v2319_v56 = vmax.f32 %v2317_v11, %v2318_v28 }
 0x37d   : > { %v2320_v23 = vmul.f32 0.9, %v2319_v56 }
 0x37f   : > { %v2322_v38 = vadd.f32 %v2321_v24, %v2320_v23 }
 0x381   : > { %2526 = vst.msk [vmem:[%s3954_s14 + $0x7] sm:$0x1] %vm670_vm4, %v2322_v38 }
 0x382   : > { %2527 = vst.msk [vmem:[%s3954_s14 + $0x7] sm:$0x1] %vm676_vm5, %v2328_v55 }
 0x383 PF: > { %p19_p11 = scmp.ge.s32.totalorder %s3037_s26, 4   ;;  %s4070_s21 = smov %s2967_s22 }
 0x384   : > { %s4071_s22 = smov %s2971_s23  ;;  %s4072_s23 = smov %s3047_s29 }
 0x385   : > { %s4073_s24 = smov %s3037_s26  ;;  %21 = sbr.rel (!%p19_p11) target bundleno = 5 (0x5), region = 111 }
 0x38c   :  { %2350 = vsyncpa [#allocation3], 1 }
 0x38d   :  { %2352 = vsyncpa [#allocation3 + $0x1], 1 }
 0x38e   :  { %2353 = vsyncpa [#allocation5], 1 }
 0x38f   :  { %2355 = vsyncpa [#allocation5 + $0x1], 1 }

</bundles_post_ra>
